<compile_context>
chip_gen: v5e
topology: v5e:2x2
jax: 0.10.0
libtpu: 0.0.40
codegen_flags: <defaults>
</compile_context>

<pallas_src>
import jax
import jax.numpy as jnp
from jax.experimental import pallas as pl
from jax.experimental.pallas import tpu as pltpu  # noqa: F401  (gridless fused kernel; no TPU-specific params needed)

EMBED = 15
NUM_CLASSES = 29
NUM_NODES = 82
SEQ_LEN = 10
HIDDEN = 300


# ---------------------------------------------------------------------------
# Fused kernel: GCNConv -> relu -> GCNConv -> relu -> fc1 -> relu -> out
# All arrays live whole in VMEM (no grid).  Transposed orientation:
#   h_t = relu((W^T @ x_t) @ adj^T + b_col),  h_t has shape (EMBED, NUM_NODES)
# ---------------------------------------------------------------------------
def gcn_fused_kernel(xt_ref, adjT_ref, w1t_ref, b1c_ref, w2t_ref, b2c_ref,
                     wfc_ref, bfc_ref, wout_ref, bout_ref, o_ref):
    adjT = adjT_ref[...]          # (N, N)
    w1t = w1t_ref[...]            # (E, S)
    w2t = w2t_ref[...]            # (E, E)
    b1c = b1c_ref[...]            # (E, 1)   broadcasts over nodes (lanes)
    b2c = b2c_ref[...]            # (E, 1)
    bfc = bfc_ref[...]            # (1, H)
    wout = wout_ref[...]          # (H, C)
    bout = bout_ref[...]          # (1, C)

    B = xt_ref.shape[0]
    for b in range(B):            # static unroll: whole batch in ONE invocation
        xt = xt_ref[b]                                                     # (S, N)

        # layer 1:  (adj @ (x @ W1))^T = (W1^T @ x^T) @ adj^T
        a1 = jnp.dot(w1t, xt, preferred_element_type=jnp.float32)          # (E, N)
        h1 = jnp.maximum(
            jnp.dot(a1, adjT, preferred_element_type=jnp.float32) + b1c, 0.0)

        # layer 2
        a2 = jnp.dot(w2t, h1, preferred_element_type=jnp.float32)          # (E, N)
        h2 = jnp.maximum(
            jnp.dot(a2, adjT, preferred_element_type=jnp.float32) + b2c, 0.0)

        # fc1: z[h] = sum_{n,e} h2_orig[n,e] * Wfc1[n*E+e, h]
        #           = sum_e  h2[e, :] @ wfc[e]      (wfc[e,n,h] = Wfc1[n*E+e, h])
        # -> no flatten/reshape of the activation is ever needed.
        z = jnp.dot(h2[0:1, :], wfc_ref[0], preferred_element_type=jnp.float32)   # (1, H)
        for e in range(1, EMBED):
            z = z + jnp.dot(h2[e:e + 1, :], wfc_ref[e],
                            preferred_element_type=jnp.float32)
        z = jnp.maximum(z + bfc, 0.0)                                       # (1, H)

        # output head
        ob = jnp.dot(z, wout, preferred_element_type=jnp.float32) + bout    # (1, C)
        o_ref[pl.ds(b, 1), :] = ob


def _cost_estimate(B):
    flops_per_b = (
        2 * EMBED * SEQ_LEN * NUM_NODES          # W1^T @ x^T
        + 2 * EMBED * NUM_NODES * NUM_NODES      # (.) @ adj^T
        + 2 * EMBED * EMBED * NUM_NODES          # W2^T @ h1
        + 2 * EMBED * NUM_NODES * NUM_NODES      # (.) @ adj^T
        + 2 * NUM_NODES * EMBED * HIDDEN         # fc1
        + 2 * HIDDEN * NUM_CLASSES               # out
    )
    bytes_accessed = 4 * (
        B * NUM_NODES * SEQ_LEN                  # x
        + NUM_NODES * NUM_NODES                  # adj
        + SEQ_LEN * EMBED + EMBED                # W1, b1
        + EMBED * EMBED + EMBED                  # W2, b2
        + NUM_NODES * EMBED * HIDDEN + HIDDEN    # Wfc1, bfc1
        + HIDDEN * NUM_CLASSES + NUM_CLASSES     # Wout, bout
        + B * NUM_CLASSES                        # output
    )
    return pl.CostEstimate(flops=B * flops_per_b, transcendentals=0,
                           bytes_accessed=bytes_accessed)


# ---------------------------------------------------------------------------
# One-time parameter preparation (checkpoint-load-time layout plumbing):
# transposed GCN weights, column biases, and the fc1 weight permuted so the
# kernel never needs the 'b n x -> b (n x)' activation flatten.
#   wfc[e, n, h] = Wfc1[n*EMBED + e, h]
# Doing this once (instead of per forward call) removes a 1.5 MiB read+write
# transpose from the per-inference HBM traffic.
# ---------------------------------------------------------------------------
def prepare_params(params):
    prep = {
        "w1t":  params["w1"].T,                                   # (E, S)
        "w2t":  params["w2"].T,                                   # (E, E)
        "b1c":  params["b1"].reshape(EMBED, 1),                   # (E, 1)
        "b2c":  params["b2"].reshape(EMBED, 1),                   # (E, 1)
        "wfc":  params["wfc1"].reshape(NUM_NODES, EMBED, HIDDEN)
                               .transpose(1, 0, 2),               # (E, N, H)
        "bfc":  params["bfc1"].reshape(1, HIDDEN),                # (1, H)
        "wout": params["wout"],                                   # (H, C)
        "bout": params["bout"].reshape(1, NUM_CLASSES),           # (1, C)
    }
    return jax.tree_util.tree_map(jnp.asarray, prep)


# ---------------------------------------------------------------------------
# Per-call forward: two tiny input transposes + one fused pallas_call.
# ---------------------------------------------------------------------------
@jax.jit
def gcn_forward(x, adj, prep):
    B = x.shape[0]
    xt = jnp.swapaxes(x, 1, 2)                                    # (B, S, N)  ~6.6 KiB
    adjT = adj.T                                                  # (N, N)     ~27 KiB

    return pl.pallas_call(
        gcn_fused_kernel,
        out_shape=jax.ShapeDtypeStruct((B, NUM_CLASSES), jnp.float32),
        cost_estimate=_cost_estimate(B),
    )(xt, adjT, prep["w1t"], prep["b1c"], prep["w2t"], prep["b2c"],
      prep["wfc"], prep["bfc"], prep["wout"], prep["bout"])


def reference_forward(x, adj, p):
    h1 = jnp.maximum(jnp.einsum("ij,bjk->bik", adj, x @ p["w1"]) + p["b1"], 0.0)
    h2 = jnp.maximum(jnp.einsum("ij,bjk->bik", adj, h1 @ p["w2"]) + p["b2"], 0.0)
    flat = h2.reshape(x.shape[0], NUM_NODES * EMBED)
    z = jnp.maximum(flat @ p["wfc1"] + p["bfc1"], 0.0)
    return z @ p["wout"] + p["bout"]


if __name__ == "__main__":
    key = jax.random.PRNGKey(0)
    keys = jax.random.split(key, 10)

    B = 2
    x = jax.random.normal(keys[0], (B, NUM_NODES, SEQ_LEN), dtype=jnp.float32)
    adj = jax.random.uniform(keys[1], (NUM_NODES, NUM_NODES), dtype=jnp.float32)

    # Deterministic synthetic parameters (same shapes as the PyTorch module).
    params = {
        "w1":   0.1 * jax.random.normal(keys[2], (SEQ_LEN, EMBED), jnp.float32),
        "b1":   0.1 * jax.random.normal(keys[3], (1, EMBED), jnp.float32),
        "w2":   0.1 * jax.random.normal(keys[4], (EMBED, EMBED), jnp.float32),
        "b2":   0.1 * jax.random.normal(keys[5], (1, EMBED), jnp.float32),
        "wfc1": 0.05 * jax.random.normal(keys[6], (NUM_NODES * EMBED, HIDDEN), jnp.float32),
        "bfc1": 0.05 * jax.random.normal(keys[7], (1, HIDDEN), jnp.float32),
        "wout": 0.05 * jax.random.normal(keys[8], (HIDDEN, NUM_CLASSES), jnp.float32),
        "bout": 0.05 * jax.random.normal(keys[9], (1, NUM_CLASSES), jnp.float32),
    }

    prep = prepare_params(params)          # one-time (checkpoint-load) work
    prep = jax.block_until_ready(prep)

    out = gcn_forward(x, adj, prep)
    out = jax.block_until_ready(out)

    ref = reference_forward(x, adj, params)
    assert out.shape == (B, NUM_CLASSES)
    assert jnp.allclose(out, ref, atol=1e-3, rtol=1e-3)

    print("KERNEL_OK")
</pallas_src>

<mosaic_0001>
module attributes {stable_mosaic.version = 11 : i64} {
  func.func @gcn_fused_kernel(%arg0: memref<2x10x82xf32, #tpu.memory_space<vmem>>, %arg1: memref<82x82xf32, #tpu.memory_space<vmem>>, %arg2: memref<15x10xf32, #tpu.memory_space<vmem>>, %arg3: memref<15x1xf32, #tpu.memory_space<vmem>>, %arg4: memref<15x15xf32, #tpu.memory_space<vmem>>, %arg5: memref<15x1xf32, #tpu.memory_space<vmem>>, %arg6: memref<15x82x300xf32, #tpu.memory_space<vmem>>, %arg7: memref<1x300xf32, #tpu.memory_space<vmem>>, %arg8: memref<300x29xf32, #tpu.memory_space<vmem>>, %arg9: memref<1x29xf32, #tpu.memory_space<vmem>>, %arg10: memref<2x29xf32, #tpu.memory_space<vmem>>) attributes {dimension_semantics = [], scalar_prefetch = 0 : i64, scratch_operands = 0 : i64, tpu.core_type = #tpu.core_type<tc>} {
    %c0 = arith.constant 0 : index
    %c0_0 = arith.constant 0 : index
    %0 = vector.load %arg1[%c0, %c0_0] : memref<82x82xf32, #tpu.memory_space<vmem>>, vector<82x82xf32>
    %c0_1 = arith.constant 0 : index
    %c0_2 = arith.constant 0 : index
    %1 = vector.load %arg2[%c0_1, %c0_2] : memref<15x10xf32, #tpu.memory_space<vmem>>, vector<15x10xf32>
    %c0_3 = arith.constant 0 : index
    %c0_4 = arith.constant 0 : index
    %2 = vector.load %arg4[%c0_3, %c0_4] : memref<15x15xf32, #tpu.memory_space<vmem>>, vector<15x15xf32>
    %c0_5 = arith.constant 0 : index
    %c0_6 = arith.constant 0 : index
    %3 = vector.load %arg3[%c0_5, %c0_6] : memref<15x1xf32, #tpu.memory_space<vmem>>, vector<15x1xf32>
    %c0_7 = arith.constant 0 : index
    %c0_8 = arith.constant 0 : index
    %4 = vector.load %arg5[%c0_7, %c0_8] : memref<15x1xf32, #tpu.memory_space<vmem>>, vector<15x1xf32>
    %c0_9 = arith.constant 0 : index
    %c0_10 = arith.constant 0 : index
    %5 = vector.load %arg7[%c0_9, %c0_10] : memref<1x300xf32, #tpu.memory_space<vmem>>, vector<1x300xf32>
    %c0_11 = arith.constant 0 : index
    %c0_12 = arith.constant 0 : index
    %6 = vector.load %arg8[%c0_11, %c0_12] : memref<300x29xf32, #tpu.memory_space<vmem>>, vector<300x29xf32>
    %c0_13 = arith.constant 0 : index
    %c0_14 = arith.constant 0 : index
    %7 = vector.load %arg9[%c0_13, %c0_14] : memref<1x29xf32, #tpu.memory_space<vmem>>, vector<1x29xf32>
    %c0_15 = arith.constant 0 : index
    %c0_16 = arith.constant 0 : index
    %c0_17 = arith.constant 0 : index
    %8 = vector.load %arg0[%c0_15, %c0_16, %c0_17] : memref<2x10x82xf32, #tpu.memory_space<vmem>>, vector<1x10x82xf32>
    %9 = vector.shape_cast %8 : vector<1x10x82xf32> to vector<10x82xf32>
    %cst = arith.constant dense<0.000000e+00> : vector<15x82xf32>
    %10 = tpu.matmul %1, %9, %cst {dimension_numbers = #tpu.dot_dimension_numbers<[1], [0], [0], [1], [0, 0, 1, 1], [], []>} : vector<15x10xf32>, vector<10x82xf32>, vector<15x82xf32> -> vector<15x82xf32>
    %cst_18 = arith.constant dense<0.000000e+00> : vector<15x82xf32>
    %11 = tpu.matmul %10, %0, %cst_18 {dimension_numbers = #tpu.dot_dimension_numbers<[1], [0], [0], [1], [0, 0, 1, 1], [], []>} : vector<15x82xf32>, vector<82x82xf32>, vector<15x82xf32> -> vector<15x82xf32>
    %12 = vector.broadcast %3 : vector<15x1xf32> to vector<15x82xf32>
    %13 = arith.addf %11, %12 : vector<15x82xf32>
    %cst_19 = arith.constant 0.000000e+00 : f32
    %14 = vector.broadcast %cst_19 : f32 to vector<15x82xf32>
    %15 = arith.maximumf %13, %14 : vector<15x82xf32>
    %cst_20 = arith.constant dense<0.000000e+00> : vector<15x82xf32>
    %16 = tpu.matmul %2, %15, %cst_20 {dimension_numbers = #tpu.dot_dimension_numbers<[1], [0], [0], [1], [0, 0, 1, 1], [], []>} : vector<15x15xf32>, vector<15x82xf32>, vector<15x82xf32> -> vector<15x82xf32>
    %cst_21 = arith.constant dense<0.000000e+00> : vector<15x82xf32>
    %17 = tpu.matmul %16, %0, %cst_21 {dimension_numbers = #tpu.dot_dimension_numbers<[1], [0], [0], [1], [0, 0, 1, 1], [], []>} : vector<15x82xf32>, vector<82x82xf32>, vector<15x82xf32> -> vector<15x82xf32>
    %18 = vector.broadcast %4 : vector<15x1xf32> to vector<15x82xf32>
    %19 = arith.addf %17, %18 : vector<15x82xf32>
    %cst_22 = arith.constant 0.000000e+00 : f32
    %20 = vector.broadcast %cst_22 : f32 to vector<15x82xf32>
    %21 = arith.maximumf %19, %20 : vector<15x82xf32>
    %22 = vector.extract_strided_slice %21 {offsets = [0, 0], sizes = [1, 82], strides = [1, 1]} : vector<15x82xf32> to vector<1x82xf32>
    %c0_23 = arith.constant 0 : index
    %c0_24 = arith.constant 0 : index
    %c0_25 = arith.constant 0 : index
    %23 = vector.load %arg6[%c0_23, %c0_24, %c0_25] : memref<15x82x300xf32, #tpu.memory_space<vmem>>, vector<1x82x300xf32>
    %24 = vector.shape_cast %23 : vector<1x82x300xf32> to vector<82x300xf32>
    %cst_26 = arith.constant dense<0.000000e+00> : vector<1x300xf32>
    %25 = tpu.matmul %22, %24, %cst_26 {dimension_numbers = #tpu.dot_dimension_numbers<[1], [0], [0], [1], [0, 0, 1, 1], [], []>} : vector<1x82xf32>, vector<82x300xf32>, vector<1x300xf32> -> vector<1x300xf32>
    %26 = vector.extract_strided_slice %21 {offsets = [1, 0], sizes = [1, 82], strides = [1, 1]} : vector<15x82xf32> to vector<1x82xf32>
    %c1 = arith.constant 1 : index
    %c0_27 = arith.constant 0 : index
    %c0_28 = arith.constant 0 : index
    %27 = vector.load %arg6[%c1, %c0_27, %c0_28] : memref<15x82x300xf32, #tpu.memory_space<vmem>>, vector<1x82x300xf32>
    %28 = vector.shape_cast %27 : vector<1x82x300xf32> to vector<82x300xf32>
    %cst_29 = arith.constant dense<0.000000e+00> : vector<1x300xf32>
    %29 = tpu.matmul %26, %28, %cst_29 {dimension_numbers = #tpu.dot_dimension_numbers<[1], [0], [0], [1], [0, 0, 1, 1], [], []>} : vector<1x82xf32>, vector<82x300xf32>, vector<1x300xf32> -> vector<1x300xf32>
    %30 = arith.addf %25, %29 : vector<1x300xf32>
    %31 = vector.extract_strided_slice %21 {offsets = [2, 0], sizes = [1, 82], strides = [1, 1]} : vector<15x82xf32> to vector<1x82xf32>
    %c2 = arith.constant 2 : index
    %c0_30 = arith.constant 0 : index
    %c0_31 = arith.constant 0 : index
    %32 = vector.load %arg6[%c2, %c0_30, %c0_31] : memref<15x82x300xf32, #tpu.memory_space<vmem>>, vector<1x82x300xf32>
    %33 = vector.shape_cast %32 : vector<1x82x300xf32> to vector<82x300xf32>
    %cst_32 = arith.constant dense<0.000000e+00> : vector<1x300xf32>
    %34 = tpu.matmul %31, %33, %cst_32 {dimension_numbers = #tpu.dot_dimension_numbers<[1], [0], [0], [1], [0, 0, 1, 1], [], []>} : vector<1x82xf32>, vector<82x300xf32>, vector<1x300xf32> -> vector<1x300xf32>
    %35 = arith.addf %30, %34 : vector<1x300xf32>
    %36 = vector.extract_strided_slice %21 {offsets = [3, 0], sizes = [1, 82], strides = [1, 1]} : vector<15x82xf32> to vector<1x82xf32>
    %c3 = arith.constant 3 : index
    %c0_33 = arith.constant 0 : index
    %c0_34 = arith.constant 0 : index
    %37 = vector.load %arg6[%c3, %c0_33, %c0_34] : memref<15x82x300xf32, #tpu.memory_space<vmem>>, vector<1x82x300xf32>
    %38 = vector.shape_cast %37 : vector<1x82x300xf32> to vector<82x300xf32>
    %cst_35 = arith.constant dense<0.000000e+00> : vector<1x300xf32>
    %39 = tpu.matmul %36, %38, %cst_35 {dimension_numbers = #tpu.dot_dimension_numbers<[1], [0], [0], [1], [0, 0, 1, 1], [], []>} : vector<1x82xf32>, vector<82x300xf32>, vector<1x300xf32> -> vector<1x300xf32>
    %40 = arith.addf %35, %39 : vector<1x300xf32>
    %41 = vector.extract_strided_slice %21 {offsets = [4, 0], sizes = [1, 82], strides = [1, 1]} : vector<15x82xf32> to vector<1x82xf32>
    %c4 = arith.constant 4 : index
    %c0_36 = arith.constant 0 : index
    %c0_37 = arith.constant 0 : index
    %42 = vector.load %arg6[%c4, %c0_36, %c0_37] : memref<15x82x300xf32, #tpu.memory_space<vmem>>, vector<1x82x300xf32>
    %43 = vector.shape_cast %42 : vector<1x82x300xf32> to vector<82x300xf32>
    %cst_38 = arith.constant dense<0.000000e+00> : vector<1x300xf32>
    %44 = tpu.matmul %41, %43, %cst_38 {dimension_numbers = #tpu.dot_dimension_numbers<[1], [0], [0], [1], [0, 0, 1, 1], [], []>} : vector<1x82xf32>, vector<82x300xf32>, vector<1x300xf32> -> vector<1x300xf32>
    %45 = arith.addf %40, %44 : vector<1x300xf32>
    %46 = vector.extract_strided_slice %21 {offsets = [5, 0], sizes = [1, 82], strides = [1, 1]} : vector<15x82xf32> to vector<1x82xf32>
    %c5 = arith.constant 5 : index
    %c0_39 = arith.constant 0 : index
    %c0_40 = arith.constant 0 : index
    %47 = vector.load %arg6[%c5, %c0_39, %c0_40] : memref<15x82x300xf32, #tpu.memory_space<vmem>>, vector<1x82x300xf32>
    %48 = vector.shape_cast %47 : vector<1x82x300xf32> to vector<82x300xf32>
    %cst_41 = arith.constant dense<0.000000e+00> : vector<1x300xf32>
    %49 = tpu.matmul %46, %48, %cst_41 {dimension_numbers = #tpu.dot_dimension_numbers<[1], [0], [0], [1], [0, 0, 1, 1], [], []>} : vector<1x82xf32>, vector<82x300xf32>, vector<1x300xf32> -> vector<1x300xf32>
    %50 = arith.addf %45, %49 : vector<1x300xf32>
    %51 = vector.extract_strided_slice %21 {offsets = [6, 0], sizes = [1, 82], strides = [1, 1]} : vector<15x82xf32> to vector<1x82xf32>
    %c6 = arith.constant 6 : index
    %c0_42 = arith.constant 0 : index
    %c0_43 = arith.constant 0 : index
    %52 = vector.load %arg6[%c6, %c0_42, %c0_43] : memref<15x82x300xf32, #tpu.memory_space<vmem>>, vector<1x82x300xf32>
    %53 = vector.shape_cast %52 : vector<1x82x300xf32> to vector<82x300xf32>
    %cst_44 = arith.constant dense<0.000000e+00> : vector<1x300xf32>
    %54 = tpu.matmul %51, %53, %cst_44 {dimension_numbers = #tpu.dot_dimension_numbers<[1], [0], [0], [1], [0, 0, 1, 1], [], []>} : vector<1x82xf32>, vector<82x300xf32>, vector<1x300xf32> -> vector<1x300xf32>
    %55 = arith.addf %50, %54 : vector<1x300xf32>
    %56 = vector.extract_strided_slice %21 {offsets = [7, 0], sizes = [1, 82], strides = [1, 1]} : vector<15x82xf32> to vector<1x82xf32>
    %c7 = arith.constant 7 : index
    %c0_45 = arith.constant 0 : index
    %c0_46 = arith.constant 0 : index
    %57 = vector.load %arg6[%c7, %c0_45, %c0_46] : memref<15x82x300xf32, #tpu.memory_space<vmem>>, vector<1x82x300xf32>
    %58 = vector.shape_cast %57 : vector<1x82x300xf32> to vector<82x300xf32>
    %cst_47 = arith.constant dense<0.000000e+00> : vector<1x300xf32>
    %59 = tpu.matmul %56, %58, %cst_47 {dimension_numbers = #tpu.dot_dimension_numbers<[1], [0], [0], [1], [0, 0, 1, 1], [], []>} : vector<1x82xf32>, vector<82x300xf32>, vector<1x300xf32> -> vector<1x300xf32>
    %60 = arith.addf %55, %59 : vector<1x300xf32>
    %61 = vector.extract_strided_slice %21 {offsets = [8, 0], sizes = [1, 82], strides = [1, 1]} : vector<15x82xf32> to vector<1x82xf32>
    %c8 = arith.constant 8 : index
    %c0_48 = arith.constant 0 : index
    %c0_49 = arith.constant 0 : index
    %62 = vector.load %arg6[%c8, %c0_48, %c0_49] : memref<15x82x300xf32, #tpu.memory_space<vmem>>, vector<1x82x300xf32>
    %63 = vector.shape_cast %62 : vector<1x82x300xf32> to vector<82x300xf32>
    %cst_50 = arith.constant dense<0.000000e+00> : vector<1x300xf32>
    %64 = tpu.matmul %61, %63, %cst_50 {dimension_numbers = #tpu.dot_dimension_numbers<[1], [0], [0], [1], [0, 0, 1, 1], [], []>} : vector<1x82xf32>, vector<82x300xf32>, vector<1x300xf32> -> vector<1x300xf32>
    %65 = arith.addf %60, %64 : vector<1x300xf32>
    %66 = vector.extract_strided_slice %21 {offsets = [9, 0], sizes = [1, 82], strides = [1, 1]} : vector<15x82xf32> to vector<1x82xf32>
    %c9 = arith.constant 9 : index
    %c0_51 = arith.constant 0 : index
    %c0_52 = arith.constant 0 : index
    %67 = vector.load %arg6[%c9, %c0_51, %c0_52] : memref<15x82x300xf32, #tpu.memory_space<vmem>>, vector<1x82x300xf32>
    %68 = vector.shape_cast %67 : vector<1x82x300xf32> to vector<82x300xf32>
    %cst_53 = arith.constant dense<0.000000e+00> : vector<1x300xf32>
    %69 = tpu.matmul %66, %68, %cst_53 {dimension_numbers = #tpu.dot_dimension_numbers<[1], [0], [0], [1], [0, 0, 1, 1], [], []>} : vector<1x82xf32>, vector<82x300xf32>, vector<1x300xf32> -> vector<1x300xf32>
    %70 = arith.addf %65, %69 : vector<1x300xf32>
    %71 = vector.extract_strided_slice %21 {offsets = [10, 0], sizes = [1, 82], strides = [1, 1]} : vector<15x82xf32> to vector<1x82xf32>
    %c10 = arith.constant 10 : index
    %c0_54 = arith.constant 0 : index
    %c0_55 = arith.constant 0 : index
    %72 = vector.load %arg6[%c10, %c0_54, %c0_55] : memref<15x82x300xf32, #tpu.memory_space<vmem>>, vector<1x82x300xf32>
    %73 = vector.shape_cast %72 : vector<1x82x300xf32> to vector<82x300xf32>
    %cst_56 = arith.constant dense<0.000000e+00> : vector<1x300xf32>
    %74 = tpu.matmul %71, %73, %cst_56 {dimension_numbers = #tpu.dot_dimension_numbers<[1], [0], [0], [1], [0, 0, 1, 1], [], []>} : vector<1x82xf32>, vector<82x300xf32>, vector<1x300xf32> -> vector<1x300xf32>
    %75 = arith.addf %70, %74 : vector<1x300xf32>
    %76 = vector.extract_strided_slice %21 {offsets = [11, 0], sizes = [1, 82], strides = [1, 1]} : vector<15x82xf32> to vector<1x82xf32>
    %c11 = arith.constant 11 : index
    %c0_57 = arith.constant 0 : index
    %c0_58 = arith.constant 0 : index
    %77 = vector.load %arg6[%c11, %c0_57, %c0_58] : memref<15x82x300xf32, #tpu.memory_space<vmem>>, vector<1x82x300xf32>
    %78 = vector.shape_cast %77 : vector<1x82x300xf32> to vector<82x300xf32>
    %cst_59 = arith.constant dense<0.000000e+00> : vector<1x300xf32>
    %79 = tpu.matmul %76, %78, %cst_59 {dimension_numbers = #tpu.dot_dimension_numbers<[1], [0], [0], [1], [0, 0, 1, 1], [], []>} : vector<1x82xf32>, vector<82x300xf32>, vector<1x300xf32> -> vector<1x300xf32>
    %80 = arith.addf %75, %79 : vector<1x300xf32>
    %81 = vector.extract_strided_slice %21 {offsets = [12, 0], sizes = [1, 82], strides = [1, 1]} : vector<15x82xf32> to vector<1x82xf32>
    %c12 = arith.constant 12 : index
    %c0_60 = arith.constant 0 : index
    %c0_61 = arith.constant 0 : index
    %82 = vector.load %arg6[%c12, %c0_60, %c0_61] : memref<15x82x300xf32, #tpu.memory_space<vmem>>, vector<1x82x300xf32>
    %83 = vector.shape_cast %82 : vector<1x82x300xf32> to vector<82x300xf32>
    %cst_62 = arith.constant dense<0.000000e+00> : vector<1x300xf32>
    %84 = tpu.matmul %81, %83, %cst_62 {dimension_numbers = #tpu.dot_dimension_numbers<[1], [0], [0], [1], [0, 0, 1, 1], [], []>} : vector<1x82xf32>, vector<82x300xf32>, vector<1x300xf32> -> vector<1x300xf32>
    %85 = arith.addf %80, %84 : vector<1x300xf32>
    %86 = vector.extract_strided_slice %21 {offsets = [13, 0], sizes = [1, 82], strides = [1, 1]} : vector<15x82xf32> to vector<1x82xf32>
    %c13 = arith.constant 13 : index
    %c0_63 = arith.constant 0 : index
    %c0_64 = arith.constant 0 : index
    %87 = vector.load %arg6[%c13, %c0_63, %c0_64] : memref<15x82x300xf32, #tpu.memory_space<vmem>>, vector<1x82x300xf32>
    %88 = vector.shape_cast %87 : vector<1x82x300xf32> to vector<82x300xf32>
    %cst_65 = arith.constant dense<0.000000e+00> : vector<1x300xf32>
    %89 = tpu.matmul %86, %88, %cst_65 {dimension_numbers = #tpu.dot_dimension_numbers<[1], [0], [0], [1], [0, 0, 1, 1], [], []>} : vector<1x82xf32>, vector<82x300xf32>, vector<1x300xf32> -> vector<1x300xf32>
    %90 = arith.addf %85, %89 : vector<1x300xf32>
    %91 = vector.extract_strided_slice %21 {offsets = [14, 0], sizes = [1, 82], strides = [1, 1]} : vector<15x82xf32> to vector<1x82xf32>
    %c14 = arith.constant 14 : index
    %c0_66 = arith.constant 0 : index
    %c0_67 = arith.constant 0 : index
    %92 = vector.load %arg6[%c14, %c0_66, %c0_67] : memref<15x82x300xf32, #tpu.memory_space<vmem>>, vector<1x82x300xf32>
    %93 = vector.shape_cast %92 : vector<1x82x300xf32> to vector<82x300xf32>
    %cst_68 = arith.constant dense<0.000000e+00> : vector<1x300xf32>
    %94 = tpu.matmul %91, %93, %cst_68 {dimension_numbers = #tpu.dot_dimension_numbers<[1], [0], [0], [1], [0, 0, 1, 1], [], []>} : vector<1x82xf32>, vector<82x300xf32>, vector<1x300xf32> -> vector<1x300xf32>
    %95 = arith.addf %90, %94 : vector<1x300xf32>
    %96 = arith.addf %95, %5 : vector<1x300xf32>
    %cst_69 = arith.constant 0.000000e+00 : f32
    %97 = vector.broadcast %cst_69 : f32 to vector<1x300xf32>
    %98 = arith.maximumf %96, %97 : vector<1x300xf32>
    %cst_70 = arith.constant dense<0.000000e+00> : vector<1x29xf32>
    %99 = tpu.matmul %98, %6, %cst_70 {dimension_numbers = #tpu.dot_dimension_numbers<[1], [0], [0], [1], [0, 0, 1, 1], [], []>} : vector<1x300xf32>, vector<300x29xf32>, vector<1x29xf32> -> vector<1x29xf32>
    %100 = arith.addf %99, %7 : vector<1x29xf32>
    %c0_71 = arith.constant 0 : index
    %c0_72 = arith.constant 0 : index
    %101 = vector.load %arg10[%c0_71, %c0_72] : memref<2x29xf32, #tpu.memory_space<vmem>>, vector<1x29xf32>
    tpu.vector_store %arg10[%c0_71, %c0_72], %100 {strides = array<i32>} : memref<2x29xf32, #tpu.memory_space<vmem>>, vector<1x29xf32>,
    %c1_73 = arith.constant 1 : index
    %c0_74 = arith.constant 0 : index
    %c0_75 = arith.constant 0 : index
    %102 = vector.load %arg0[%c1_73, %c0_74, %c0_75] : memref<2x10x82xf32, #tpu.memory_space<vmem>>, vector<1x10x82xf32>
    %103 = vector.shape_cast %102 : vector<1x10x82xf32> to vector<10x82xf32>
    %cst_76 = arith.constant dense<0.000000e+00> : vector<15x82xf32>
    %104 = tpu.matmul %1, %103, %cst_76 {dimension_numbers = #tpu.dot_dimension_numbers<[1], [0], [0], [1], [0, 0, 1, 1], [], []>} : vector<15x10xf32>, vector<10x82xf32>, vector<15x82xf32> -> vector<15x82xf32>
    %cst_77 = arith.constant dense<0.000000e+00> : vector<15x82xf32>
    %105 = tpu.matmul %104, %0, %cst_77 {dimension_numbers = #tpu.dot_dimension_numbers<[1], [0], [0], [1], [0, 0, 1, 1], [], []>} : vector<15x82xf32>, vector<82x82xf32>, vector<15x82xf32> -> vector<15x82xf32>
    %106 = vector.broadcast %3 : vector<15x1xf32> to vector<15x82xf32>
    %107 = arith.addf %105, %106 : vector<15x82xf32>
    %cst_78 = arith.constant 0.000000e+00 : f32
    %108 = vector.broadcast %cst_78 : f32 to vector<15x82xf32>
    %109 = arith.maximumf %107, %108 : vector<15x82xf32>
    %cst_79 = arith.constant dense<0.000000e+00> : vector<15x82xf32>
    %110 = tpu.matmul %2, %109, %cst_79 {dimension_numbers = #tpu.dot_dimension_numbers<[1], [0], [0], [1], [0, 0, 1, 1], [], []>} : vector<15x15xf32>, vector<15x82xf32>, vector<15x82xf32> -> vector<15x82xf32>
    %cst_80 = arith.constant dense<0.000000e+00> : vector<15x82xf32>
    %111 = tpu.matmul %110, %0, %cst_80 {dimension_numbers = #tpu.dot_dimension_numbers<[1], [0], [0], [1], [0, 0, 1, 1], [], []>} : vector<15x82xf32>, vector<82x82xf32>, vector<15x82xf32> -> vector<15x82xf32>
    %112 = vector.broadcast %4 : vector<15x1xf32> to vector<15x82xf32>
    %113 = arith.addf %111, %112 : vector<15x82xf32>
    %cst_81 = arith.constant 0.000000e+00 : f32
    %114 = vector.broadcast %cst_81 : f32 to vector<15x82xf32>
    %115 = arith.maximumf %113, %114 : vector<15x82xf32>
    %116 = vector.extract_strided_slice %115 {offsets = [0, 0], sizes = [1, 82], strides = [1, 1]} : vector<15x82xf32> to vector<1x82xf32>
    %c0_82 = arith.constant 0 : index
    %c0_83 = arith.constant 0 : index
    %c0_84 = arith.constant 0 : index
    %117 = vector.load %arg6[%c0_82, %c0_83, %c0_84] : memref<15x82x300xf32, #tpu.memory_space<vmem>>, vector<1x82x300xf32>
    %118 = vector.shape_cast %117 : vector<1x82x300xf32> to vector<82x300xf32>
    %cst_85 = arith.constant dense<0.000000e+00> : vector<1x300xf32>
    %119 = tpu.matmul %116, %118, %cst_85 {dimension_numbers = #tpu.dot_dimension_numbers<[1], [0], [0], [1], [0, 0, 1, 1], [], []>} : vector<1x82xf32>, vector<82x300xf32>, vector<1x300xf32> -> vector<1x300xf32>
    %120 = vector.extract_strided_slice %115 {offsets = [1, 0], sizes = [1, 82], strides = [1, 1]} : vector<15x82xf32> to vector<1x82xf32>
    %c1_86 = arith.constant 1 : index
    %c0_87 = arith.constant 0 : index
    %c0_88 = arith.constant 0 : index
    %121 = vector.load %arg6[%c1_86, %c0_87, %c0_88] : memref<15x82x300xf32, #tpu.memory_space<vmem>>, vector<1x82x300xf32>
    %122 = vector.shape_cast %121 : vector<1x82x300xf32> to vector<82x300xf32>
    %cst_89 = arith.constant dense<0.000000e+00> : vector<1x300xf32>
    %123 = tpu.matmul %120, %122, %cst_89 {dimension_numbers = #tpu.dot_dimension_numbers<[1], [0], [0], [1], [0, 0, 1, 1], [], []>} : vector<1x82xf32>, vector<82x300xf32>, vector<1x300xf32> -> vector<1x300xf32>
    %124 = arith.addf %119, %123 : vector<1x300xf32>
    %125 = vector.extract_strided_slice %115 {offsets = [2, 0], sizes = [1, 82], strides = [1, 1]} : vector<15x82xf32> to vector<1x82xf32>
    %c2_90 = arith.constant 2 : index
    %c0_91 = arith.constant 0 : index
    %c0_92 = arith.constant 0 : index
    %126 = vector.load %arg6[%c2_90, %c0_91, %c0_92] : memref<15x82x300xf32, #tpu.memory_space<vmem>>, vector<1x82x300xf32>
    %127 = vector.shape_cast %126 : vector<1x82x300xf32> to vector<82x300xf32>
    %cst_93 = arith.constant dense<0.000000e+00> : vector<1x300xf32>
    %128 = tpu.matmul %125, %127, %cst_93 {dimension_numbers = #tpu.dot_dimension_numbers<[1], [0], [0], [1], [0, 0, 1, 1], [], []>} : vector<1x82xf32>, vector<82x300xf32>, vector<1x300xf32> -> vector<1x300xf32>
    %129 = arith.addf %124, %128 : vector<1x300xf32>
    %130 = vector.extract_strided_slice %115 {offsets = [3, 0], sizes = [1, 82], strides = [1, 1]} : vector<15x82xf32> to vector<1x82xf32>
    %c3_94 = arith.constant 3 : index
    %c0_95 = arith.constant 0 : index
    %c0_96 = arith.constant 0 : index
    %131 = vector.load %arg6[%c3_94, %c0_95, %c0_96] : memref<15x82x300xf32, #tpu.memory_space<vmem>>, vector<1x82x300xf32>
    %132 = vector.shape_cast %131 : vector<1x82x300xf32> to vector<82x300xf32>
    %cst_97 = arith.constant dense<0.000000e+00> : vector<1x300xf32>
    %133 = tpu.matmul %130, %132, %cst_97 {dimension_numbers = #tpu.dot_dimension_numbers<[1], [0], [0], [1], [0, 0, 1, 1], [], []>} : vector<1x82xf32>, vector<82x300xf32>, vector<1x300xf32> -> vector<1x300xf32>
    %134 = arith.addf %129, %133 : vector<1x300xf32>
    %135 = vector.extract_strided_slice %115 {offsets = [4, 0], sizes = [1, 82], strides = [1, 1]} : vector<15x82xf32> to vector<1x82xf32>
    %c4_98 = arith.constant 4 : index
    %c0_99 = arith.constant 0 : index
    %c0_100 = arith.constant 0 : index
    %136 = vector.load %arg6[%c4_98, %c0_99, %c0_100] : memref<15x82x300xf32, #tpu.memory_space<vmem>>, vector<1x82x300xf32>
    %137 = vector.shape_cast %136 : vector<1x82x300xf32> to vector<82x300xf32>
    %cst_101 = arith.constant dense<0.000000e+00> : vector<1x300xf32>
    %138 = tpu.matmul %135, %137, %cst_101 {dimension_numbers = #tpu.dot_dimension_numbers<[1], [0], [0], [1], [0, 0, 1, 1], [], []>} : vector<1x82xf32>, vector<82x300xf32>, vector<1x300xf32> -> vector<1x300xf32>
    %139 = arith.addf %134, %138 : vector<1x300xf32>
    %140 = vector.extract_strided_slice %115 {offsets = [5, 0], sizes = [1, 82], strides = [1, 1]} : vector<15x82xf32> to vector<1x82xf32>
    %c5_102 = arith.constant 5 : index
    %c0_103 = arith.constant 0 : index
    %c0_104 = arith.constant 0 : index
    %141 = vector.load %arg6[%c5_102, %c0_103, %c0_104] : memref<15x82x300xf32, #tpu.memory_space<vmem>>, vector<1x82x300xf32>
    %142 = vector.shape_cast %141 : vector<1x82x300xf32> to vector<82x300xf32>
    %cst_105 = arith.constant dense<0.000000e+00> : vector<1x300xf32>
    %143 = tpu.matmul %140, %142, %cst_105 {dimension_numbers = #tpu.dot_dimension_numbers<[1], [0], [0], [1], [0, 0, 1, 1], [], []>} : vector<1x82xf32>, vector<82x300xf32>, vector<1x300xf32> -> vector<1x300xf32>
    %144 = arith.addf %139, %143 : vector<1x300xf32>
    %145 = vector.extract_strided_slice %115 {offsets = [6, 0], sizes = [1, 82], strides = [1, 1]} : vector<15x82xf32> to vector<1x82xf32>
    %c6_106 = arith.constant 6 : index
    %c0_107 = arith.constant 0 : index
    %c0_108 = arith.constant 0 : index
    %146 = vector.load %arg6[%c6_106, %c0_107, %c0_108] : memref<15x82x300xf32, #tpu.memory_space<vmem>>, vector<1x82x300xf32>
    %147 = vector.shape_cast %146 : vector<1x82x300xf32> to vector<82x300xf32>
    %cst_109 = arith.constant dense<0.000000e+00> : vector<1x300xf32>
    %148 = tpu.matmul %145, %147, %cst_109 {dimension_numbers = #tpu.dot_dimension_numbers<[1], [0], [0], [1], [0, 0, 1, 1], [], []>} : vector<1x82xf32>, vector<82x300xf32>, vector<1x300xf32> -> vector<1x300xf32>
    %149 = arith.addf %144, %148 : vector<1x300xf32>
    %150 = vector.extract_strided_slice %115 {offsets = [7, 0], sizes = [1, 82], strides = [1, 1]} : vector<15x82xf32> to vector<1x82xf32>
    %c7_110 = arith.constant 7 : index
    %c0_111 = arith.constant 0 : index
    %c0_112 = arith.constant 0 : index
    %151 = vector.load %arg6[%c7_110, %c0_111, %c0_112] : memref<15x82x300xf32, #tpu.memory_space<vmem>>, vector<1x82x300xf32>
    %152 = vector.shape_cast %151 : vector<1x82x300xf32> to vector<82x300xf32>
    %cst_113 = arith.constant dense<0.000000e+00> : vector<1x300xf32>
    %153 = tpu.matmul %150, %152, %cst_113 {dimension_numbers = #tpu.dot_dimension_numbers<[1], [0], [0], [1], [0, 0, 1, 1], [], []>} : vector<1x82xf32>, vector<82x300xf32>, vector<1x300xf32> -> vector<1x300xf32>
    %154 = arith.addf %149, %153 : vector<1x300xf32>
    %155 = vector.extract_strided_slice %115 {offsets = [8, 0], sizes = [1, 82], strides = [1, 1]} : vector<15x82xf32> to vector<1x82xf32>
    %c8_114 = arith.constant 8 : index
    %c0_115 = arith.constant 0 : index
    %c0_116 = arith.constant 0 : index
    %156 = vector.load %arg6[%c8_114, %c0_115, %c0_116] : memref<15x82x300xf32, #tpu.memory_space<vmem>>, vector<1x82x300xf32>
    %157 = vector.shape_cast %156 : vector<1x82x300xf32> to vector<82x300xf32>
    %cst_117 = arith.constant dense<0.000000e+00> : vector<1x300xf32>
    %158 = tpu.matmul %155, %157, %cst_117 {dimension_numbers = #tpu.dot_dimension_numbers<[1], [0], [0], [1], [0, 0, 1, 1], [], []>} : vector<1x82xf32>, vector<82x300xf32>, vector<1x300xf32> -> vector<1x300xf32>
    %159 = arith.addf %154, %158 : vector<1x300xf32>
    %160 = vector.extract_strided_slice %115 {offsets = [9, 0], sizes = [1, 82], strides = [1, 1]} : vector<15x82xf32> to vector<1x82xf32>
    %c9_118 = arith.constant 9 : index
    %c0_119 = arith.constant 0 : index
    %c0_120 = arith.constant 0 : index
    %161 = vector.load %arg6[%c9_118, %c0_119, %c0_120] : memref<15x82x300xf32, #tpu.memory_space<vmem>>, vector<1x82x300xf32>
    %162 = vector.shape_cast %161 : vector<1x82x300xf32> to vector<82x300xf32>
    %cst_121 = arith.constant dense<0.000000e+00> : vector<1x300xf32>
    %163 = tpu.matmul %160, %162, %cst_121 {dimension_numbers = #tpu.dot_dimension_numbers<[1], [0], [0], [1], [0, 0, 1, 1], [], []>} : vector<1x82xf32>, vector<82x300xf32>, vector<1x300xf32> -> vector<1x300xf32>
    %164 = arith.addf %159, %163 : vector<1x300xf32>
    %165 = vector.extract_strided_slice %115 {offsets = [10, 0], sizes = [1, 82], strides = [1, 1]} : vector<15x82xf32> to vector<1x82xf32>
    %c10_122 = arith.constant 10 : index
    %c0_123 = arith.constant 0 : index
    %c0_124 = arith.constant 0 : index
    %166 = vector.load %arg6[%c10_122, %c0_123, %c0_124] : memref<15x82x300xf32, #tpu.memory_space<vmem>>, vector<1x82x300xf32>
    %167 = vector.shape_cast %166 : vector<1x82x300xf32> to vector<82x300xf32>
    %cst_125 = arith.constant dense<0.000000e+00> : vector<1x300xf32>
    %168 = tpu.matmul %165, %167, %cst_125 {dimension_numbers = #tpu.dot_dimension_numbers<[1], [0], [0], [1], [0, 0, 1, 1], [], []>} : vector<1x82xf32>, vector<82x300xf32>, vector<1x300xf32> -> vector<1x300xf32>
    %169 = arith.addf %164, %168 : vector<1x300xf32>
    %170 = vector.extract_strided_slice %115 {offsets = [11, 0], sizes = [1, 82], strides = [1, 1]} : vector<15x82xf32> to vector<1x82xf32>
    %c11_126 = arith.constant 11 : index
    %c0_127 = arith.constant 0 : index
    %c0_128 = arith.constant 0 : index
    %171 = vector.load %arg6[%c11_126, %c0_127, %c0_128] : memref<15x82x300xf32, #tpu.memory_space<vmem>>, vector<1x82x300xf32>
    %172 = vector.shape_cast %171 : vector<1x82x300xf32> to vector<82x300xf32>
    %cst_129 = arith.constant dense<0.000000e+00> : vector<1x300xf32>
    %173 = tpu.matmul %170, %172, %cst_129 {dimension_numbers = #tpu.dot_dimension_numbers<[1], [0], [0], [1], [0, 0, 1, 1], [], []>} : vector<1x82xf32>, vector<82x300xf32>, vector<1x300xf32> -> vector<1x300xf32>
    %174 = arith.addf %169, %173 : vector<1x300xf32>
    %175 = vector.extract_strided_slice %115 {offsets = [12, 0], sizes = [1, 82], strides = [1, 1]} : vector<15x82xf32> to vector<1x82xf32>
    %c12_130 = arith.constant 12 : index
    %c0_131 = arith.constant 0 : index
    %c0_132 = arith.constant 0 : index
    %176 = vector.load %arg6[%c12_130, %c0_131, %c0_132] : memref<15x82x300xf32, #tpu.memory_space<vmem>>, vector<1x82x300xf32>
    %177 = vector.shape_cast %176 : vector<1x82x300xf32> to vector<82x300xf32>
    %cst_133 = arith.constant dense<0.000000e+00> : vector<1x300xf32>
    %178 = tpu.matmul %175, %177, %cst_133 {dimension_numbers = #tpu.dot_dimension_numbers<[1], [0], [0], [1], [0, 0, 1, 1], [], []>} : vector<1x82xf32>, vector<82x300xf32>, vector<1x300xf32> -> vector<1x300xf32>
    %179 = arith.addf %174, %178 : vector<1x300xf32>
    %180 = vector.extract_strided_slice %115 {offsets = [13, 0], sizes = [1, 82], strides = [1, 1]} : vector<15x82xf32> to vector<1x82xf32>
    %c13_134 = arith.constant 13 : index
    %c0_135 = arith.constant 0 : index
    %c0_136 = arith.constant 0 : index
    %181 = vector.load %arg6[%c13_134, %c0_135, %c0_136] : memref<15x82x300xf32, #tpu.memory_space<vmem>>, vector<1x82x300xf32>
    %182 = vector.shape_cast %181 : vector<1x82x300xf32> to vector<82x300xf32>
    %cst_137 = arith.constant dense<0.000000e+00> : vector<1x300xf32>
    %183 = tpu.matmul %180, %182, %cst_137 {dimension_numbers = #tpu.dot_dimension_numbers<[1], [0], [0], [1], [0, 0, 1, 1], [], []>} : vector<1x82xf32>, vector<82x300xf32>, vector<1x300xf32> -> vector<1x300xf32>
    %184 = arith.addf %179, %183 : vector<1x300xf32>
    %185 = vector.extract_strided_slice %115 {offsets = [14, 0], sizes = [1, 82], strides = [1, 1]} : vector<15x82xf32> to vector<1x82xf32>
    %c14_138 = arith.constant 14 : index
    %c0_139 = arith.constant 0 : index
    %c0_140 = arith.constant 0 : index
    %186 = vector.load %arg6[%c14_138, %c0_139, %c0_140] : memref<15x82x300xf32, #tpu.memory_space<vmem>>, vector<1x82x300xf32>
    %187 = vector.shape_cast %186 : vector<1x82x300xf32> to vector<82x300xf32>
    %cst_141 = arith.constant dense<0.000000e+00> : vector<1x300xf32>
    %188 = tpu.matmul %185, %187, %cst_141 {dimension_numbers = #tpu.dot_dimension_numbers<[1], [0], [0], [1], [0, 0, 1, 1], [], []>} : vector<1x82xf32>, vector<82x300xf32>, vector<1x300xf32> -> vector<1x300xf32>
    %189 = arith.addf %184, %188 : vector<1x300xf32>
    %190 = arith.addf %189, %5 : vector<1x300xf32>
    %cst_142 = arith.constant 0.000000e+00 : f32
    %191 = vector.broadcast %cst_142 : f32 to vector<1x300xf32>
    %192 = arith.maximumf %190, %191 : vector<1x300xf32>
    %cst_143 = arith.constant dense<0.000000e+00> : vector<1x29xf32>
    %193 = tpu.matmul %192, %6, %cst_143 {dimension_numbers = #tpu.dot_dimension_numbers<[1], [0], [0], [1], [0, 0, 1, 1], [], []>} : vector<1x300xf32>, vector<300x29xf32>, vector<1x29xf32> -> vector<1x29xf32>
    %194 = arith.addf %193, %7 : vector<1x29xf32>
    %c1_144 = arith.constant 1 : index
    %c0_145 = arith.constant 0 : index
    %195 = vector.load %arg10[%c1_144, %c0_145] : memref<2x29xf32, #tpu.memory_space<vmem>>, vector<1x29xf32>
    tpu.vector_store %arg10[%c1_144, %c0_145], %194 {strides = array<i32>} : memref<2x29xf32, #tpu.memory_space<vmem>>, vector<1x29xf32>,
    return
  }
}

</mosaic_0001>

<bundles_post_ra>
// kernel: gcn_forward.1
= control target key start
LH: loop header
LB: loop body
LE: loop exit
PB: predicated region body
PF: predicated region fallthrough
CT: control target
= control target key end

     0   :  { %vm104_vm0 = vcmask 1041408   ;;  %vm97_vm1 = vcmask 80896   ;;  %s8884_s0 = inlined_call_operand.vmem [shape: f32[2,10,82], index: 0, kind: input, shape index: {}]   ;;  %s8885_s1 = inlined_call_operand.vmem [shape: f32[82,82], index: 1, kind: input, shape index: {}]   ;;  %s8886_s2 = inlined_call_operand.vmem [shape: f32[15,10], index: 2, kind: input, shape index: {}]   ;;  %s8887_s3 = inlined_call_operand.vmem [shape: f32[15,1], index: 3, kind: input, shape index: {}]   ;;  %s8888_s4 = inlined_call_operand.vmem [shape: f32[15,15], index: 4, kind: input, shape index: {}]   ;;  %s8889_s5 = inlined_call_operand.vmem [shape: f32[15,1], index: 5, kind: input, shape index: {}]   ;;  %s8890_s6 = inlined_call_operand.vmem [shape: f32[15,82,300], index: 6, kind: input, shape index: {}]   ;;  %s8891_s7 = inlined_call_operand.vmem [shape: f32[1,300], index: 7, kind: input, shape index: {}]   ;;  %s8892_s8 = inlined_call_operand.vmem [shape: f32[300,29], index: 8, kind: input, shape index: {}]   ;;  %s8893_s9 = inlined_call_operand.vmem [shape: f32[1,29], index: 9, kind: input, shape index: {}]   ;;  %s8894_s10 = inlined_call_operand.hbm [shape: f32[2,29], index: 10, kind: output, shape index: {}]  }
   0x1   :  { %v96_v0 = vld [vmem:[%s8884_s0 + $0x8] sm:$0x3]  ;;  %v95_v1 = vld [vmem:[%s8884_s0] sm:$0xff]  ;;  %v46_v3 = vld [vmem:[%s8885_s1 + $0x50] sm:$0x3] }
   0x2   :  { %3779 = vmatpush.msk.msra.mxu0 %vm104_vm0, %v96_v0  ;;  %v47_v2 = vld [vmem:[%s8886_s2] sm:$0xff]  ;;  %v45_v4 = vld [vmem:[%s8885_s1 + $0x48] sm:$0xff]  ;;  %3782 = vmatpush.msk.msra.mxu1 %vm104_vm0, %v46_v3 }
   0x3   :  { %3788 = vmatpush.msk.msra.mxu3 %vm104_vm0, %v46_v3  ;;  %v44_v5 = vld [vmem:[%s8885_s1 + $0x40] sm:$0xff] }
   0x4   :  { %123 = vmatpush.msra.mxu0 %v95_v1  ;;  %157 = vmatpush.msra.mxu1 %v45_v4 }
   0x5   :  { %3780 = vmatmul.msk.f32.vlgmr.msra.gmra.mxu0 %vm97_vm1, %v47_v2 }
   0x6   :  { %15 = vsyncpa [#allocation3], 0  ;;  %v43_v6 = vld [vmem:[%s8885_s1 + $0x38] sm:$0xff]  ;;  %232 = vmatpush.msra.mxu3 %v45_v4  ;;  %158 = vmatpush.msra.mxu1 %v44_v5  ;;  %v42_v7 = vld [vmem:[%s8885_s1 + $0x30] sm:$0xff]  ;;  %v4997_v16 = vmov 0   ;;  %vm141_vm2 = vcmask 670720  }
   0x7   :  { %v48_v8 = vld [vmem:[%s8886_s2 + $0x8] sm:$0x7f]  ;;  %v40_v10 = vld [vmem:[%s8885_s1 + $0x20] sm:$0xff]  ;;  %v39_v11 = vld [vmem:[%s8885_s1 + $0x18] sm:$0xff]  ;;  %4915 = vset.pattern.permute.xlu0 %v4997_v16  ;;  %4916 = vset.pattern.permute.xlu1 %v4997_v16  ;;  %vm183_vm3 = vcmask 1046528   ;;  %vm176_vm4 = vcmask 121856  }
   0x8   :  { %233 = vmatpush.msra.mxu3 %v44_v5  ;;  %159 = vmatpush.msra.mxu1 %v43_v6  ;;  %v41_v9 = vld [vmem:[%s8885_s1 + $0x28] sm:$0xff]  ;;  %v38_v12 = vld [vmem:[%s8885_s1 + $0x10] sm:$0xff]  ;;  %v36_v14 = vld [vmem:[%s8885_s1] sm:$0xff]  ;;  %vm1896_vm5 = vcmask 1043456   ;;  %vm1892_vm6 = vcmask 359424   ;;  %vm1960_vm7 = vcmask 229376  }
   0x9   :  { %v37_v13 = vld [vmem:[%s8885_s1 + $0x8] sm:$0xff]  ;;  %v51_v17 = vld [vmem:[%s8887_s3] sm:$0xff]  ;;  %v281_v31 = vld [vmem:[%s8890_s6 + $0xf0] sm:$0x3]  ;;  %s4998_s23 = smov [#allocation2]  }
   0xa   :  { %234 = vmatpush.msra.mxu3 %v43_v6  ;;  %160 = vmatpush.msra.mxu1 %v42_v7  ;;  %v52_v15 = vld [vmem:[%s8887_s3 + $0x8] sm:$0x7f]  ;;  %v49_v28 = vld [vmem:[%s8888_s4] sm:$0xff]  ;;  %v3821_v32 = vld [vmem:[%s8890_s6 + $0x1f8] sm:$0x3]  ;;  %s3768_s24 = sshll.u32 %s4998_s23, 4  ;;  %s3769_s24 = int_to_ptr.vmem [resolvable:$true] %s3768_s24 }
   0xb   :  { %138 = vperm.xlu0 %4915, %v52_v15   ;;  %v50_v29 = vld [vmem:[%s8888_s4 + $0x8] sm:$0x7f]  ;;  %v53_v30 = vld [vmem:[%s8889_s5] sm:$0xff]  ;;  %3824 = vmatpush.msk.msrb.mxu0 %vm104_vm0, %v3821_v32  ;;  %v278_v35 = vld [vmem:[%s8890_s6 + $0xd8] sm:$0xff] }
   0xc   :  { %235 = vmatpush.msra.mxu3 %v42_v7  ;;  %161 = vmatpush.msra.mxu1 %v41_v9  ;;  %v3822_v33 = vld [vmem:[%s8890_s6 + $0x200] sm:$0x3]  ;;  %v3823_v34 = vld [vmem:[%s8890_s6 + $0x208] sm:$0x3]  ;;  %v3820_v38 = vld [vmem:[%s8890_s6 + $0x1f0] sm:$0xff] }
   0xd   :  { %3781 = vmatmul.msk.f32.gmra.mxu0 %vm97_vm1, %v48_v8  ;;  %212 = vperm.xlu1 %4916, %v53_v30   ;;  %v3818_v36 = vld [vmem:[%s8890_s6 + $0x1e0] sm:$0xff]  ;;  %v3819_v37 = vld [vmem:[%s8890_s6 + $0x1e8] sm:$0xff]  ;;  %v3816_v41 = vld [vmem:[%s8890_s6 + $0x1d0] sm:$0xff] }
   0xe   :  { %236 = vmatpush.msra.mxu3 %v41_v9  ;;  %162 = vmatpush.msra.mxu1 %v40_v10  ;;  %v275_v39 = vld [vmem:[%s8890_s6 + $0xc0] sm:$0xff]  ;;  %v3815_v40 = vld [vmem:[%s8890_s6 + $0x1c8] sm:$0xff]  ;;  %v3817_v42 = vld [vmem:[%s8890_s6 + $0x1d8] sm:$0xff] }
   0xf   :  { %337 = vmatpush.msrb.mxu0 %v3818_v36  ;;  %v272_v43 = vld [vmem:[%s8890_s6 + $0xa8] sm:$0xff]  ;;  %v3812_v44 = vld [vmem:[%s8890_s6 + $0x1b0] sm:$0xff]  ;;  %v3813_v45 = vld [vmem:[%s8890_s6 + $0x1b8] sm:$0xff] }
  0x10   :  { %237 = vmatpush.msra.mxu3 %v40_v10  ;;  %163 = vmatpush.msra.mxu1 %v39_v11  ;;  %v54_v46 = vld [vmem:[%s8889_s5 + $0x8] sm:$0x7f]  ;;  %v3814_v47 = vld [vmem:[%s8890_s6 + $0x1c0] sm:$0xff]  ;;  %v269_v48 = vld [vmem:[%s8890_s6 + $0x90] sm:$0xff] }
  0x11   :  { %338 = vmatpush.msrb.mxu0 %v3815_v40  ;;  %v3809_v49 = vld [vmem:[%s8890_s6 + $0x198] sm:$0xff]  ;;  %v3810_v50 = vld [vmem:[%s8890_s6 + $0x1a0] sm:$0xff]  ;;  %v3811_v51 = vld [vmem:[%s8890_s6 + $0x1a8] sm:$0xff] }
  0x12   :  { %238 = vmatpush.msra.mxu3 %v39_v11  ;;  %164 = vmatpush.msra.mxu1 %v38_v12  ;;  %v266_v52 = vld [vmem:[%s8890_s6 + $0x78] sm:$0xff]  ;;  %v3806_v53 = vld [vmem:[%s8890_s6 + $0x180] sm:$0xff]  ;;  %v3807_v54 = vld [vmem:[%s8890_s6 + $0x188] sm:$0xff] }
  0x13   :  { %133 = vperm.xlu0 %4915, %v51_v17   ;;  %339 = vmatpush.msrb.mxu0 %v3812_v44  ;;  %v3808_v55 = vld [vmem:[%s8890_s6 + $0x190] sm:$0xff]  ;;  %v263_v56 = vld [vmem:[%s8890_s6 + $0x60] sm:$0xff]  ;;  %v3803_v57 = vld [vmem:[%s8890_s6 + $0x168] sm:$0xff] }
  0x14   :  { %239 = vmatpush.msra.mxu3 %v38_v12  ;;  %165 = vmatpush.msra.mxu1 %v37_v13  ;;  %v3804_v58 = vld [vmem:[%s8890_s6 + $0x170] sm:$0xff]  ;;  %v3805_v59 = vld [vmem:[%s8890_s6 + $0x178] sm:$0xff]  ;;  %v260_v60 = vld [vmem:[%s8890_s6 + $0x48] sm:$0xff] }
  0x15   :  { %217 = vperm.xlu1 %4916, %v54_v46   ;;  %340 = vmatpush.msrb.mxu0 %v3809_v49  ;;  %v3800_v61 = vld [vmem:[%s8890_s6 + $0x150] sm:$0xff]  ;;  %v3801_v62 = vld [vmem:[%s8890_s6 + $0x158] sm:$0xff]  ;;  %v3802_v63 = vld [vmem:[%s8890_s6 + $0x160] sm:$0xff] }
  0x16   :  { %240 = vmatpush.msra.mxu3 %v37_v13  ;;  %166 = vmatpush.msra.mxu1 %v36_v14  ;;  %v257_v0 = vld [vmem:[%s8890_s6 + $0x30] sm:$0xff]  ;;  %v3797_v1 = vld [vmem:[%s8890_s6 + $0x138] sm:$0xff]  ;;  %v3798_v2 = vld [vmem:[%s8890_s6 + $0x140] sm:$0xff] }
  0x17   :  { %341 = vmatpush.msrb.mxu0 %v3806_v53  ;;  %v3799_v3 = vld [vmem:[%s8890_s6 + $0x148] sm:$0xff]  ;;  %v254_v4 = vld [vmem:[%s8890_s6 + $0x18] sm:$0xff]  ;;  %v3794_v5 = vld [vmem:[%s8890_s6 + $0x120] sm:$0xff] }
  0x18   :  { %241 = vmatpush.msra.mxu3 %v36_v14  ;;  %3828 = vmatpush.msk.msrb.mxu1 %vm104_vm0, %v3823_v34  ;;  %v3795_v6 = vld [vmem:[%s8890_s6 + $0x128] sm:$0xff]  ;;  %v3796_v7 = vld [vmem:[%s8890_s6 + $0x130] sm:$0xff]  ;;  %v251_v8 = vld [vmem:[%s8890_s6] sm:$0xff] }
  0x19   :  { %342 = vmatpush.msrb.mxu0 %v3803_v57  ;;  %v3791_v9 = vld [vmem:[%s8890_s6 + $0x108] sm:$0xff]  ;;  %v3792_v10 = vld [vmem:[%s8890_s6 + $0x110] sm:$0xff]  ;;  %v3793_v11 = vld [vmem:[%s8890_s6 + $0x118] sm:$0xff] }
  0x1a   :  { %3830 = vmatpush.msk.msrb.mxu3 %vm104_vm0, %v281_v31  ;;  %377 = vmatpush.msrb.mxu1 %v3820_v38  ;;  %v282_v12 = vld [vmem:[%s8890_s6 + $0xf8] sm:$0x3]  ;;  %v3867_v13 = vld [vmem:[%s8890_s6 + $0x308] sm:$0x3]  ;;  %v283_v14 = vld [vmem:[%s8890_s6 + $0x100] sm:$0x3] }
  0x1b   :  { %343 = vmatpush.msrb.mxu0 %v3800_v61  ;;  %v3866_v16 = vld [vmem:[%s8890_s6 + $0x300] sm:$0x3]  ;;  %v274_v30 = vld [vmem:[%s8890_s6 + $0xb8] sm:$0xff]  ;;  %v3855_v32 = vld [vmem:[%s8890_s6 + $0x2a8] sm:$0xff] }
  0x1c   :  { %408 = vmatpush.msrb.mxu3 %v278_v35  ;;  %378 = vmatpush.msrb.mxu1 %v3817_v42  ;;  %v279_v17 = vld [vmem:[%s8890_s6 + $0xe0] sm:$0xff]  ;;  %v3857_v31 = vld [vmem:[%s8890_s6 + $0x2b8] sm:$0xff]  ;;  %v3852_v36 = vld [vmem:[%s8890_s6 + $0x290] sm:$0xff] }
  0x1d   :  { %344 = vmatpush.msrb.mxu0 %v3797_v1  ;;  %v271_v34 = vld [vmem:[%s8890_s6 + $0xa0] sm:$0xff]  ;;  %v268_v38 = vld [vmem:[%s8890_s6 + $0x88] sm:$0xff]  ;;  %v3849_v40 = vld [vmem:[%s8890_s6 + $0x278] sm:$0xff] }
  0x1e   :  { %409 = vmatpush.msrb.mxu3 %v275_v39  ;;  %379 = vmatpush.msrb.mxu1 %v3814_v47  ;;  %v3854_v35 = vld [vmem:[%s8890_s6 + $0x2a0] sm:$0xff]  ;;  %v3851_v39 = vld [vmem:[%s8890_s6 + $0x288] sm:$0xff]  ;;  %v265_v42 = vld [vmem:[%s8890_s6 + $0x70] sm:$0xff] }
  0x1f   :  { %345 = vmatpush.msrb.mxu0 %v3794_v5  ;;  %v3846_v44 = vld [vmem:[%s8890_s6 + $0x260] sm:$0xff]  ;;  %v262_v46 = vld [vmem:[%s8890_s6 + $0x58] sm:$0xff]  ;;  %v252_v57 = vld [vmem:[%s8890_s6 + $0x8] sm:$0xff] }
  0x20   :  { %410 = vmatpush.msrb.mxu3 %v272_v43  ;;  %380 = vmatpush.msrb.mxu1 %v3811_v51  ;;  %v3848_v43 = vld [vmem:[%s8890_s6 + $0x270] sm:$0xff]  ;;  %v3845_v47 = vld [vmem:[%s8890_s6 + $0x258] sm:$0xff]  ;;  %v3842_v51 = vld [vmem:[%s8890_s6 + $0x240] sm:$0xff] }
  0x21   :  { %346 = vmatpush.msrb.mxu0 %v3791_v9  ;;  %v258_v49 = vld [vmem:[%s8890_s6 + $0x38] sm:$0xff]  ;;  %v255_v53 = vld [vmem:[%s8890_s6 + $0x20] sm:$0xff]  ;;  %v3901_v9 = vld [vmem:[%s8890_s6 + $0x3e8] sm:$0xff] }
  0x22   :  { %411 = vmatpush.msrb.mxu3 %v269_v48  ;;  %381 = vmatpush.msrb.mxu1 %v3808_v55  ;;  %v3843_v48 = vld [vmem:[%s8890_s6 + $0x248] sm:$0xff]  ;;  %v3904_v5 = vld [vmem:[%s8890_s6 + $0x400] sm:$0xff] }
  0x23   :  { %3832 = vmatpush.msk.msra.mxu0 %vm104_vm0, %v282_v12  ;;  %v3839_v55 = vld [vmem:[%s8890_s6 + $0x228] sm:$0xff]  ;;  %v3900_v12 = vld [vmem:[%s8890_s6 + $0x3e0] sm:$0xff] }
  0x24   :  { %412 = vmatpush.msrb.mxu3 %v266_v52  ;;  %382 = vmatpush.msrb.mxu1 %v3805_v59  ;;  %v3840_v52 = vld [vmem:[%s8890_s6 + $0x230] sm:$0xff] }
  0x25   :  { %428 = vmatpush.msra.mxu0 %v279_v17  ;;  %v3836_v59 = vld [vmem:[%s8890_s6 + $0x210] sm:$0xff]  ;;  %v3897_v17 = vld [vmem:[%s8890_s6 + $0x3c8] sm:$0xff] }
  0x26   :  { %413 = vmatpush.msrb.mxu3 %v263_v56  ;;  %383 = vmatpush.msrb.mxu1 %v3802_v63  ;;  %v3837_v56 = vld [vmem:[%s8890_s6 + $0x218] sm:$0xff] }
  0x28   :  { %414 = vmatpush.msrb.mxu3 %v260_v60  ;;  %384 = vmatpush.msrb.mxu1 %v3799_v3  ;;  %v3905_v3 = vld [vmem:[%s8890_s6 + $0x408] sm:$0x3] }
  0x2a   :  { %415 = vmatpush.msrb.mxu3 %v257_v0  ;;  %385 = vmatpush.msrb.mxu1 %v3796_v7  ;;  %v3907_v0 = vld [vmem:[%s8890_s6 + $0x418] sm:$0x3]  ;;  %v3902_v7 = vld [vmem:[%s8890_s6 + $0x3f0] sm:$0xff] }
  0x2c   :  { %416 = vmatpush.msrb.mxu3 %v254_v4  ;;  %386 = vmatpush.msrb.mxu1 %v3793_v11  ;;  %v3906_v4 = vld [vmem:[%s8890_s6 + $0x410] sm:$0x3]  ;;  %v3899_v11 = vld [vmem:[%s8890_s6 + $0x3d8] sm:$0xff] }
  0x2e   :  { %417 = vmatpush.msrb.mxu3 %v251_v8  ;;  %v3903_v8 = vld [vmem:[%s8890_s6 + $0x3f8] sm:$0xff] }
  0x7d   :  { %v5112_v20 = vpop.permute.xlu0 %138 }
  0x7f   :  { %v5407_v60 = vpop.permute.xlu1 %212 }
  0x82   :  { %v125_v18 = vpop.f32.mrf.mxu0 }
  0x83   :  { %3783 = vmatmul.msk.f32.vlgmr.msra.gmra.mxu1 %vm141_vm2, %v125_v18  ;;  %v3864_v18 = vld [vmem:[%s8890_s6 + $0x2f0] sm:$0xff] }
  0x84   :  { %3869 = vmatpush.msk.msra.mxu1 %vm104_vm0, %v3866_v16 }
  0x85   :  { %v5114_v22 = vpop.permute.xlu0 %133 }
  0x8a   :  { %v128_v19 = vpop.f32.mrf.mxu0 }
  0x8b   :  { %3784 = vmatmul.msk.f32.gmra.mxu1 %vm141_vm2, %v128_v19  ;;  %v280_v19 = vld [vmem:[%s8890_s6 + $0xe8] sm:$0xff] }
 0x100   :  { %v168_v21 = vpop.f32.mrf.mxu1 }
 0x101   :  { %v169_v24 = vadd.f32 %v168_v21, %v5114_v22  ;;  %v3863_v21 = vld [vmem:[%s8890_s6 + $0x2e8] sm:$0xff] }
 0x102   :  { %514 = vmatpush.msra.mxu1 %v3863_v21  ;;  %v3893_v21 = vld [vmem:[%s8890_s6 + $0x3a8] sm:$0xff] }
 0x103   :  { %v174_v27 = vmax.f32 %v169_v24, 0.0  ;;  %v3861_v24 = vld [vmem:[%s8890_s6 + $0x2d8] sm:$0xff] }
 0x108   :  { %v171_v23 = vpop.f32.mrf.mxu1 }
 0x109   :  { %v172_v25 = vadd.f32 %v171_v23, %v5112_v20  ;;  %v276_v23 = vld [vmem:[%s8890_s6 + $0xc8] sm:$0xff] }
 0x10a   :  { %429 = vmatpush.msra.mxu0 %v276_v23  ;;  %v3894_v23 = vld [vmem:[%s8890_s6 + $0x3b0] sm:$0xff] }
 0x10b   :  { %v175_v26 = vmax.f32 %v172_v25, 0.0  ;;  %v277_v25 = vld [vmem:[%s8890_s6 + $0xd0] sm:$0xff] }
 0x10d   :  { %3785 = vmatpush.msk.msra.mxu2 %vm183_vm3, %v175_v26  ;;  %v3860_v26 = vld [vmem:[%s8890_s6 + $0x2d0] sm:$0xff] }
 0x10e   :  { %515 = vmatpush.msra.mxu1 %v3860_v26  ;;  %v3890_v26 = vld [vmem:[%s8890_s6 + $0x390] sm:$0xff] }
 0x10f   :  { %202 = vmatpush.msra.mxu2 %v174_v27  ;;  %v3858_v27 = vld [vmem:[%s8890_s6 + $0x2c0] sm:$0xff] }
 0x110   :  { %3786 = vmatmul.msk.f32.vlgmr.msra.gmra.mxu2 %vm176_vm4, %v49_v28  ;;  %516 = vmatpush.msra.mxu1 %v3857_v31  ;;  %v3888_v31 = vld [vmem:[%s8890_s6 + $0x380] sm:$0xff] }
 0x111   :  { %3826 = vmatpush.msk.msrb.mxu2 %vm104_vm0, %v3822_v33  ;;  %v270_v33 = vld [vmem:[%s8890_s6 + $0x98] sm:$0xff] }
 0x112   :  { %517 = vmatpush.msra.mxu1 %v3854_v35  ;;  %v3885_v35 = vld [vmem:[%s8890_s6 + $0x368] sm:$0xff] }
 0x113   :  { %357 = vmatpush.msrb.mxu2 %v3819_v37  ;;  %v267_v37 = vld [vmem:[%s8890_s6 + $0x80] sm:$0xff] }
 0x114   :  { %518 = vmatpush.msra.mxu1 %v3851_v39  ;;  %v3882_v39 = vld [vmem:[%s8890_s6 + $0x350] sm:$0xff] }
 0x115   :  { %358 = vmatpush.msrb.mxu2 %v3816_v41  ;;  %v264_v41 = vld [vmem:[%s8890_s6 + $0x68] sm:$0xff] }
 0x116   :  { %519 = vmatpush.msra.mxu1 %v3848_v43  ;;  %v3879_v43 = vld [vmem:[%s8890_s6 + $0x338] sm:$0xff] }
 0x117   :  { %359 = vmatpush.msrb.mxu2 %v3813_v45  ;;  %v261_v45 = vld [vmem:[%s8890_s6 + $0x50] sm:$0xff] }
 0x118   :  { %3787 = vmatmul.msk.f32.gmra.mxu2 %vm176_vm4, %v50_v29  ;;  %v273_v29 = vld [vmem:[%s8890_s6 + $0xb0] sm:$0xff]  ;;  %520 = vmatpush.msra.mxu1 %v3845_v47 }
 0x119   :  { %360 = vmatpush.msrb.mxu2 %v3810_v50  ;;  %430 = vmatpush.msra.mxu0 %v273_v29  ;;  %v259_v50 = vld [vmem:[%s8890_s6 + $0x40] sm:$0xff] }
 0x11a   :  { %521 = vmatpush.msra.mxu1 %v3842_v51  ;;  %v3850_v29 = vld [vmem:[%s8890_s6 + $0x280] sm:$0xff]  ;;  %v3945_v51 = vld [vmem:[%s8890_s6 + $0x518] sm:$0x3] }
 0x11b   :  { %361 = vmatpush.msrb.mxu2 %v3807_v54  ;;  %431 = vmatpush.msra.mxu0 %v270_v33  ;;  %v256_v54 = vld [vmem:[%s8890_s6 + $0x28] sm:$0xff] }
 0x11c   :  { %522 = vmatpush.msra.mxu1 %v3839_v55  ;;  %v3847_v33 = vld [vmem:[%s8890_s6 + $0x268] sm:$0xff]  ;;  %v3942_v55 = vld [vmem:[%s8890_s6 + $0x500] sm:$0xff] }
 0x11d   :  { %362 = vmatpush.msrb.mxu2 %v3804_v58  ;;  %432 = vmatpush.msra.mxu0 %v267_v37  ;;  %v253_v58 = vld [vmem:[%s8890_s6 + $0x10] sm:$0xff] }
 0x11e   :  { %523 = vmatpush.msra.mxu1 %v3836_v59  ;;  %v3844_v37 = vld [vmem:[%s8890_s6 + $0x250] sm:$0xff]  ;;  %v3939_v59 = vld [vmem:[%s8890_s6 + $0x4e8] sm:$0xff] }
 0x11f   :  { %363 = vmatpush.msrb.mxu2 %v3801_v62  ;;  %433 = vmatpush.msra.mxu0 %v264_v41  ;;  %v3841_v41 = vld [vmem:[%s8890_s6 + $0x238] sm:$0xff] }
 0x121   :  { %364 = vmatpush.msrb.mxu2 %v3798_v2  ;;  %434 = vmatpush.msra.mxu0 %v261_v45  ;;  %v3868_v2 = vld [vmem:[%s8890_s6 + $0x310] sm:$0x3]  ;;  %v3838_v45 = vld [vmem:[%s8890_s6 + $0x220] sm:$0xff] }
 0x123   :  { %365 = vmatpush.msrb.mxu2 %v3795_v6  ;;  %435 = vmatpush.msra.mxu0 %v258_v49  ;;  %v3865_v6 = vld [vmem:[%s8890_s6 + $0x2f8] sm:$0xff]  ;;  %v3876_v49 = vld [vmem:[%s8890_s6 + $0x320] sm:$0xff] }
 0x125   :  { %366 = vmatpush.msrb.mxu2 %v3792_v10  ;;  %436 = vmatpush.msra.mxu0 %v255_v53  ;;  %v3862_v10 = vld [vmem:[%s8890_s6 + $0x2e0] sm:$0xff] }
 0x126   :  { %v3980_v53 = vld [vmem:[%s8890_s6 + $0x600] sm:$0xff] }
 0x127   :  { %3834 = vmatpush.msk.msra.mxu2 %vm104_vm0, %v283_v14  ;;  %437 = vmatpush.msra.mxu0 %v252_v57  ;;  %v3859_v14 = vld [vmem:[%s8890_s6 + $0x2c8] sm:$0xff] }
 0x128   :  { %v3977_v57 = vld [vmem:[%s8890_s6 + $0x5e8] sm:$0xff] }
 0x129   :  { %448 = vmatpush.msra.mxu2 %v280_v19  ;;  %v3856_v19 = vld [vmem:[%s8890_s6 + $0x2b0] sm:$0xff] }
 0x12b   :  { %449 = vmatpush.msra.mxu2 %v277_v25  ;;  %v3853_v25 = vld [vmem:[%s8890_s6 + $0x298] sm:$0xff] }
 0x12d   :  { %450 = vmatpush.msra.mxu2 %v274_v30  ;;  %v3887_v30 = vld [vmem:[%s8890_s6 + $0x378] sm:$0xff] }
 0x12f   :  { %451 = vmatpush.msra.mxu2 %v271_v34  ;;  %v3884_v34 = vld [vmem:[%s8890_s6 + $0x360] sm:$0xff] }
 0x131   :  { %452 = vmatpush.msra.mxu2 %v268_v38  ;;  %v3881_v38 = vld [vmem:[%s8890_s6 + $0x348] sm:$0xff] }
 0x133   :  { %453 = vmatpush.msra.mxu2 %v265_v42  ;;  %v3878_v42 = vld [vmem:[%s8890_s6 + $0x330] sm:$0xff] }
 0x135   :  { %454 = vmatpush.msra.mxu2 %v262_v46  ;;  %v3875_v46 = vld [vmem:[%s8890_s6 + $0x318] sm:$0xff] }
 0x137   :  { %455 = vmatpush.msra.mxu2 %v259_v50  ;;  %v3944_v50 = vld [vmem:[%s8890_s6 + $0x510] sm:$0x3] }
 0x139   :  { %456 = vmatpush.msra.mxu2 %v256_v54  ;;  %v3941_v54 = vld [vmem:[%s8890_s6 + $0x4f8] sm:$0xff] }
 0x13b   :  { %457 = vmatpush.msra.mxu2 %v253_v58  ;;  %v3938_v58 = vld [vmem:[%s8890_s6 + $0x4e0] sm:$0xff] }
 0x193   :  { %v204_v15 = vpop.f32.mrf.mxu2 }
 0x194   :  { %3789 = vmatmul.msk.f32.vlgmr.msra.gmra.mxu3 %vm141_vm2, %v204_v15  ;;  %v3896_v15 = vld [vmem:[%s8890_s6 + $0x3c0] sm:$0xff] }
 0x195   :  { %3871 = vmatpush.msk.msra.mxu3 %vm104_vm0, %v3867_v13  ;;  %v3898_v13 = vld [vmem:[%s8890_s6 + $0x3d0] sm:$0xff] }
 0x197   :  { %534 = vmatpush.msra.mxu3 %v3864_v18  ;;  %v3895_v18 = vld [vmem:[%s8890_s6 + $0x3b8] sm:$0xff] }
 0x199   :  { %535 = vmatpush.msra.mxu3 %v3861_v24  ;;  %v3892_v24 = vld [vmem:[%s8890_s6 + $0x3a0] sm:$0xff] }
 0x19b   :  { %v207_v28 = vpop.f32.mrf.mxu2  ;;  %536 = vmatpush.msra.mxu3 %v3858_v27  ;;  %v3891_v27 = vld [vmem:[%s8890_s6 + $0x398] sm:$0xff] }
 0x19c   :  { %3790 = vmatmul.msk.f32.gmra.mxu3 %vm141_vm2, %v207_v28  ;;  %v3889_v28 = vld [vmem:[%s8890_s6 + $0x388] sm:$0xff] }
 0x19d   :  { %537 = vmatpush.msra.mxu3 %v3855_v32  ;;  %v3886_v32 = vld [vmem:[%s8890_s6 + $0x370] sm:$0xff] }
 0x19f   :  { %538 = vmatpush.msra.mxu3 %v3852_v36  ;;  %v3883_v36 = vld [vmem:[%s8890_s6 + $0x358] sm:$0xff] }
 0x1a1   :  { %539 = vmatpush.msra.mxu3 %v3849_v40  ;;  %v3880_v40 = vld [vmem:[%s8890_s6 + $0x340] sm:$0xff] }
 0x1a3   :  { %540 = vmatpush.msra.mxu3 %v3846_v44  ;;  %v3877_v44 = vld [vmem:[%s8890_s6 + $0x328] sm:$0xff] }
 0x1a5   :  { %541 = vmatpush.msra.mxu3 %v3843_v48  ;;  %v3983_v48 = vld [vmem:[%s8890_s6 + $0x618] sm:$0x3] }
 0x1a7   :  { %542 = vmatpush.msra.mxu3 %v3840_v52  ;;  %v3946_v52 = vld [vmem:[%s8890_s6 + $0x520] sm:$0x3] }
 0x1a9   :  { %543 = vmatpush.msra.mxu3 %v3837_v56  ;;  %v3943_v56 = vld [vmem:[%s8890_s6 + $0x508] sm:$0xff] }
 0x217   :  { %v243_v61 = vpop.f32.mrf.mxu3 }
 0x218   :  { %v244_v62 = vadd.f32 %v243_v61, %v5407_v60  ;;  %v3940_v61 = vld [vmem:[%s8890_s6 + $0x4f0] sm:$0xff] }
 0x21a   :  { %v5410_v63 = vmax.f32 %v244_v62, 0.0  ;;  %v3974_v62 = vld [vmem:[%s8890_s6 + $0x5d0] sm:$0xff] }
 0x21c   :  { %3831 = vmatmul.msk.f32.vlgmr.msrb.gmra.mxu3 %vm141_vm2, %v5410_v63  ;;  %v319_v1 = vrot.slane %v5410_v63, 1  ;;  %v5468_v16 = vrot.slane %v5410_v63, 2  ;;  %v605_v47 = vrot.slane %v5410_v63, 3 }
 0x21d   :  { %3912 = vmatpush.msk.msrb.mxu3 %vm104_vm0, %v3907_v0  ;;  %v3935_v0 = vld [vmem:[%s8890_s6 + $0x4c8] sm:$0xff] }
 0x21e   :  { %3825 = vmatmul.msk.f32.vlgmr.msrb.gmra.mxu0 %vm141_vm2, %v319_v1  ;;  %3827 = vmatmul.msk.f32.vlgmr.msrb.gmra.mxu2 %vm141_vm2, %v319_v1 }
 0x21f   :  { %3829 = vmatmul.msk.f32.vlgmr.msrb.gmra.mxu1 %vm141_vm2, %v319_v1  ;;  %3873 = vmatpush.msk.msrb.mxu0 %vm104_vm0, %v3868_v2  ;;  %v3936_v1 = vld [vmem:[%s8890_s6 + $0x4d0] sm:$0xff]  ;;  %v3937_v2 = vld [vmem:[%s8890_s6 + $0x4d8] sm:$0xff] }
 0x220   :  { %3908 = vmatpush.msk.msrb.mxu2 %vm104_vm0, %v3905_v3  ;;  %3910 = vmatpush.msk.msrb.mxu1 %vm104_vm0, %v3906_v4  ;;  %v3971_v3 = vld [vmem:[%s8890_s6 + $0x5b8] sm:$0xff]  ;;  %v3932_v4 = vld [vmem:[%s8890_s6 + $0x4b0] sm:$0xff] }
 0x221   :  { %663 = vmatpush.msrb.mxu3 %v3904_v5  ;;  %554 = vmatpush.msrb.mxu0 %v3865_v6  ;;  %v3933_v5 = vld [vmem:[%s8890_s6 + $0x4b8] sm:$0xff]  ;;  %v3934_v6 = vld [vmem:[%s8890_s6 + $0x4c0] sm:$0xff] }
 0x222   :  { %623 = vmatpush.msrb.mxu2 %v3902_v7  ;;  %643 = vmatpush.msrb.mxu1 %v3903_v8  ;;  %v3968_v7 = vld [vmem:[%s8890_s6 + $0x5a0] sm:$0xff]  ;;  %v3929_v8 = vld [vmem:[%s8890_s6 + $0x498] sm:$0xff] }
 0x223   :  { %664 = vmatpush.msrb.mxu3 %v3901_v9  ;;  %555 = vmatpush.msrb.mxu0 %v3862_v10  ;;  %v3930_v9 = vld [vmem:[%s8890_s6 + $0x4a0] sm:$0xff]  ;;  %v3931_v10 = vld [vmem:[%s8890_s6 + $0x4a8] sm:$0xff] }
 0x224   :  { %624 = vmatpush.msrb.mxu2 %v3899_v11  ;;  %644 = vmatpush.msrb.mxu1 %v3900_v12  ;;  %v3965_v11 = vld [vmem:[%s8890_s6 + $0x588] sm:$0xff]  ;;  %v3926_v12 = vld [vmem:[%s8890_s6 + $0x480] sm:$0xff] }
 0x225   :  { %665 = vmatpush.msrb.mxu3 %v3898_v13  ;;  %556 = vmatpush.msrb.mxu0 %v3859_v14  ;;  %v3927_v13 = vld [vmem:[%s8890_s6 + $0x488] sm:$0xff]  ;;  %v3928_v14 = vld [vmem:[%s8890_s6 + $0x490] sm:$0xff] }
 0x226   :  { %3872 = vmatmul.msk.f32.vlgmr.msra.gmra.mxu3 %vm141_vm2, %v5468_v16  ;;  %625 = vmatpush.msrb.mxu2 %v3896_v15  ;;  %v3962_v15 = vld [vmem:[%s8890_s6 + $0x570] sm:$0xff] }
 0x227   :  { %645 = vmatpush.msrb.mxu1 %v3897_v17  ;;  %666 = vmatpush.msrb.mxu3 %v3895_v18  ;;  %v3924_v17 = vld [vmem:[%s8890_s6 + $0x470] sm:$0xff]  ;;  %v3925_v18 = vld [vmem:[%s8890_s6 + $0x478] sm:$0xff] }
 0x228   :  { %3833 = vmatmul.msk.f32.vlgmr.msra.gmra.mxu0 %vm141_vm2, %v5410_v63  ;;  %3835 = vmatmul.msk.f32.vlgmr.msra.gmra.mxu2 %vm141_vm2, %v5410_v63 }
 0x229   :  { %3870 = vmatmul.msk.f32.vlgmr.msra.gmra.mxu1 %vm141_vm2, %v5468_v16  ;;  %557 = vmatpush.msrb.mxu0 %v3856_v19  ;;  %v3959_v19 = vld [vmem:[%s8890_s6 + $0x558] sm:$0xff] }
 0x22a   :  { %626 = vmatpush.msrb.mxu2 %v3893_v21  ;;  %646 = vmatpush.msrb.mxu1 %v3894_v23  ;;  %v3920_v21 = vld [vmem:[%s8890_s6 + $0x450] sm:$0xff]  ;;  %v3921_v23 = vld [vmem:[%s8890_s6 + $0x458] sm:$0xff] }
 0x22b   :  { %667 = vmatpush.msrb.mxu3 %v3892_v24  ;;  %558 = vmatpush.msrb.mxu0 %v3853_v25  ;;  %v3922_v24 = vld [vmem:[%s8890_s6 + $0x460] sm:$0xff] }
 0x22c   :  { %627 = vmatpush.msrb.mxu2 %v3890_v26  ;;  %647 = vmatpush.msrb.mxu1 %v3891_v27  ;;  %v3956_v25 = vld [vmem:[%s8890_s6 + $0x540] sm:$0xff]  ;;  %v3917_v26 = vld [vmem:[%s8890_s6 + $0x438] sm:$0xff] }
 0x22d   :  { %668 = vmatpush.msrb.mxu3 %v3889_v28  ;;  %559 = vmatpush.msrb.mxu0 %v3850_v29  ;;  %v3918_v27 = vld [vmem:[%s8890_s6 + $0x440] sm:$0xff]  ;;  %v3919_v28 = vld [vmem:[%s8890_s6 + $0x448] sm:$0xff] }
 0x22e   :  { %628 = vmatpush.msrb.mxu2 %v3887_v30  ;;  %648 = vmatpush.msrb.mxu1 %v3888_v31  ;;  %v3953_v29 = vld [vmem:[%s8890_s6 + $0x528] sm:$0xff]  ;;  %v3914_v30 = vld [vmem:[%s8890_s6 + $0x420] sm:$0xff] }
 0x22f   :  { %669 = vmatpush.msrb.mxu3 %v3886_v32  ;;  %560 = vmatpush.msrb.mxu0 %v3847_v33  ;;  %v3915_v31 = vld [vmem:[%s8890_s6 + $0x428] sm:$0xff]  ;;  %v5705_v32 = vrot.slane %v5410_v63, 5 }
 0x230   :  { %629 = vmatpush.msrb.mxu2 %v3884_v34  ;;  %649 = vmatpush.msrb.mxu1 %v3885_v35  ;;  %v4023_v33 = vld [vmem:[%s8890_s6 + $0x728] sm:$0x3]  ;;  %v3916_v34 = vld [vmem:[%s8890_s6 + $0x430] sm:$0xff]  ;;  %v714_v35 = vrot.slane %v5410_v63, 4 }
 0x231   :  { %670 = vmatpush.msrb.mxu3 %v3883_v36  ;;  %561 = vmatpush.msrb.mxu0 %v3844_v37  ;;  %v3984_v36 = vld [vmem:[%s8890_s6 + $0x620] sm:$0x3]  ;;  %v3985_v37 = vld [vmem:[%s8890_s6 + $0x628] sm:$0x3] }
 0x232   :  { %630 = vmatpush.msrb.mxu2 %v3881_v38  ;;  %650 = vmatpush.msrb.mxu1 %v3882_v39  ;;  %v4022_v38 = vld [vmem:[%s8890_s6 + $0x720] sm:$0x3]  ;;  %v4020_v39 = vld [vmem:[%s8890_s6 + $0x710] sm:$0xff] }
 0x233   :  { %671 = vmatpush.msrb.mxu3 %v3880_v40  ;;  %562 = vmatpush.msrb.mxu0 %v3841_v41  ;;  %v3981_v40 = vld [vmem:[%s8890_s6 + $0x608] sm:$0xff]  ;;  %v3982_v41 = vld [vmem:[%s8890_s6 + $0x610] sm:$0xff] }
 0x234   :  { %631 = vmatpush.msrb.mxu2 %v3878_v42  ;;  %651 = vmatpush.msrb.mxu1 %v3879_v43  ;;  %v4019_v42 = vld [vmem:[%s8890_s6 + $0x708] sm:$0xff]  ;;  %v4017_v43 = vld [vmem:[%s8890_s6 + $0x6f8] sm:$0xff] }
 0x235   :  { %672 = vmatpush.msrb.mxu3 %v3877_v44  ;;  %563 = vmatpush.msrb.mxu0 %v3838_v45  ;;  %v3978_v44 = vld [vmem:[%s8890_s6 + $0x5f0] sm:$0xff]  ;;  %v3979_v45 = vld [vmem:[%s8890_s6 + $0x5f8] sm:$0xff] }
 0x236   :  { %3913 = vmatmul.msk.f32.vlgmr.msrb.gmra.mxu3 %vm141_vm2, %v605_v47  ;;  %632 = vmatpush.msrb.mxu2 %v3875_v46  ;;  %v4016_v46 = vld [vmem:[%s8890_s6 + $0x6f0] sm:$0xff] }
 0x237   :  { %3986 = vmatpush.msk.msra.mxu3 %vm104_vm0, %v3983_v48  ;;  %652 = vmatpush.msrb.mxu1 %v3876_v49  ;;  %v3975_v48 = vld [vmem:[%s8890_s6 + $0x5d8] sm:$0xff]  ;;  %v3976_v49 = vld [vmem:[%s8890_s6 + $0x5e0] sm:$0xff] }
 0x238   :  { %3874 = vmatmul.msk.f32.vlgmr.msrb.gmra.mxu0 %vm141_vm2, %v5468_v16  ;;  %3909 = vmatmul.msk.f32.vlgmr.msrb.gmra.mxu2 %vm141_vm2, %v605_v47  ;;  %v3923_v16 = vld [vmem:[%s8890_s6 + $0x468] sm:$0xff] }
 0x239   :  { %3911 = vmatmul.msk.f32.vlgmr.msrb.gmra.mxu1 %vm141_vm2, %v605_v47  ;;  %3947 = vmatpush.msk.msra.mxu0 %vm104_vm0, %v3944_v50  ;;  %v4014_v47 = vld [vmem:[%s8890_s6 + $0x6e0] sm:$0xff]  ;;  %v4013_v50 = vld [vmem:[%s8890_s6 + $0x6d8] sm:$0xff] }
 0x23a   :  { %3949 = vmatpush.msk.msra.mxu2 %vm104_vm0, %v3945_v51  ;;  %3951 = vmatpush.msk.msra.mxu1 %vm104_vm0, %v3946_v52  ;;  %v4011_v51 = vld [vmem:[%s8890_s6 + $0x6c8] sm:$0xff]  ;;  %v3972_v52 = vld [vmem:[%s8890_s6 + $0x5c0] sm:$0xff] }
 0x23b   :  { %841 = vmatpush.msra.mxu3 %v3980_v53  ;;  %732 = vmatpush.msra.mxu0 %v3941_v54  ;;  %v3973_v53 = vld [vmem:[%s8890_s6 + $0x5c8] sm:$0xff]  ;;  %v4010_v54 = vld [vmem:[%s8890_s6 + $0x6c0] sm:$0xff] }
 0x23c   :  { %752 = vmatpush.msra.mxu2 %v3942_v55  ;;  %772 = vmatpush.msra.mxu1 %v3943_v56  ;;  %v4008_v55 = vld [vmem:[%s8890_s6 + $0x6b0] sm:$0xff]  ;;  %v3969_v56 = vld [vmem:[%s8890_s6 + $0x5a8] sm:$0xff] }
 0x23d   :  { %842 = vmatpush.msra.mxu3 %v3977_v57  ;;  %733 = vmatpush.msra.mxu0 %v3938_v58  ;;  %v3970_v57 = vld [vmem:[%s8890_s6 + $0x5b0] sm:$0xff]  ;;  %v4007_v58 = vld [vmem:[%s8890_s6 + $0x6a8] sm:$0xff] }
 0x23e   :  { %753 = vmatpush.msra.mxu2 %v3939_v59  ;;  %773 = vmatpush.msra.mxu1 %v3940_v61  ;;  %v4005_v59 = vld [vmem:[%s8890_s6 + $0x698] sm:$0xff]  ;;  %v3966_v61 = vld [vmem:[%s8890_s6 + $0x590] sm:$0xff] }
 0x23f   :  { %843 = vmatpush.msra.mxu3 %v3974_v62  ;;  %734 = vmatpush.msra.mxu0 %v3935_v0  ;;  %v3967_v62 = vld [vmem:[%s8890_s6 + $0x598] sm:$0xff]  ;;  %v4004_v0 = vld [vmem:[%s8890_s6 + $0x690] sm:$0xff] }
 0x240   :  { %754 = vmatpush.msra.mxu2 %v3936_v1  ;;  %774 = vmatpush.msra.mxu1 %v3937_v2  ;;  %v4002_v1 = vld [vmem:[%s8890_s6 + $0x680] sm:$0xff]  ;;  %v3963_v2 = vld [vmem:[%s8890_s6 + $0x578] sm:$0xff] }
 0x241   :  { %844 = vmatpush.msra.mxu3 %v3971_v3  ;;  %735 = vmatpush.msra.mxu0 %v3932_v4  ;;  %v3964_v3 = vld [vmem:[%s8890_s6 + $0x580] sm:$0xff]  ;;  %v4001_v4 = vld [vmem:[%s8890_s6 + $0x678] sm:$0xff] }
 0x242   :  { %755 = vmatpush.msra.mxu2 %v3933_v5  ;;  %775 = vmatpush.msra.mxu1 %v3934_v6  ;;  %v3999_v5 = vld [vmem:[%s8890_s6 + $0x668] sm:$0xff]  ;;  %v3960_v6 = vld [vmem:[%s8890_s6 + $0x560] sm:$0xff] }
 0x243   :  { %845 = vmatpush.msra.mxu3 %v3968_v7  ;;  %736 = vmatpush.msra.mxu0 %v3929_v8  ;;  %v3961_v7 = vld [vmem:[%s8890_s6 + $0x568] sm:$0xff]  ;;  %v3998_v8 = vld [vmem:[%s8890_s6 + $0x660] sm:$0xff] }
 0x244   :  { %756 = vmatpush.msra.mxu2 %v3930_v9  ;;  %776 = vmatpush.msra.mxu1 %v3931_v10  ;;  %v3996_v9 = vld [vmem:[%s8890_s6 + $0x650] sm:$0xff]  ;;  %v3957_v10 = vld [vmem:[%s8890_s6 + $0x548] sm:$0xff] }
 0x245   :  { %846 = vmatpush.msra.mxu3 %v3965_v11  ;;  %737 = vmatpush.msra.mxu0 %v3926_v12  ;;  %v3958_v11 = vld [vmem:[%s8890_s6 + $0x550] sm:$0xff]  ;;  %v3995_v12 = vld [vmem:[%s8890_s6 + $0x648] sm:$0xff] }
 0x246   :  { %757 = vmatpush.msra.mxu2 %v3927_v13  ;;  %777 = vmatpush.msra.mxu1 %v3928_v14  ;;  %v3993_v13 = vld [vmem:[%s8890_s6 + $0x638] sm:$0xff]  ;;  %v3954_v14 = vld [vmem:[%s8890_s6 + $0x530] sm:$0xff] }
 0x247   :  { %847 = vmatpush.msra.mxu3 %v3962_v15  ;;  %738 = vmatpush.msra.mxu0 %v3923_v16  ;;  %v3955_v15 = vld [vmem:[%s8890_s6 + $0x538] sm:$0xff]  ;;  %v5850_v16 = vrot.slane %v5410_v63, 6 }
 0x248   :  { %758 = vmatpush.msra.mxu2 %v3924_v17  ;;  %778 = vmatpush.msra.mxu1 %v3925_v18  ;;  %v4063_v17 = vld [vmem:[%s8890_s6 + $0x838] sm:$0x3]  ;;  %v3992_v18 = vld [vmem:[%s8890_s6 + $0x630] sm:$0xff] }
 0x249   :  { %848 = vmatpush.msra.mxu3 %v3959_v19  ;;  %739 = vmatpush.msra.mxu0 %v3920_v21  ;;  %v4024_v19 = vld [vmem:[%s8890_s6 + $0x730] sm:$0x3]  ;;  %v4061_v21 = vld [vmem:[%s8890_s6 + $0x828] sm:$0x3] }
 0x24a   :  { %759 = vmatpush.msra.mxu2 %v3921_v23  ;;  %779 = vmatpush.msra.mxu1 %v3922_v24  ;;  %v4062_v23 = vld [vmem:[%s8890_s6 + $0x830] sm:$0x3]  ;;  %v4060_v24 = vld [vmem:[%s8890_s6 + $0x820] sm:$0xff] }
 0x24b   :  { %849 = vmatpush.msra.mxu3 %v3956_v25  ;;  %740 = vmatpush.msra.mxu0 %v3917_v26  ;;  %v4021_v25 = vld [vmem:[%s8890_s6 + $0x718] sm:$0xff]  ;;  %v4058_v26 = vld [vmem:[%s8890_s6 + $0x810] sm:$0xff] }
 0x24c   :  { %760 = vmatpush.msra.mxu2 %v3918_v27  ;;  %780 = vmatpush.msra.mxu1 %v3919_v28  ;;  %v4059_v27 = vld [vmem:[%s8890_s6 + $0x818] sm:$0xff]  ;;  %v4057_v28 = vld [vmem:[%s8890_s6 + $0x808] sm:$0xff] }
 0x24d   :  { %850 = vmatpush.msra.mxu3 %v3953_v29  ;;  %741 = vmatpush.msra.mxu0 %v3914_v30  ;;  %v4018_v29 = vld [vmem:[%s8890_s6 + $0x700] sm:$0xff]  ;;  %v4055_v30 = vld [vmem:[%s8890_s6 + $0x7f8] sm:$0xff] }
 0x24e   :  { %3987 = vmatmul.msk.f32.vlgmr.msra.gmra.mxu3 %vm141_vm2, %v5705_v32  ;;  %761 = vmatpush.msra.mxu2 %v3915_v31  ;;  %v4056_v31 = vld [vmem:[%s8890_s6 + $0x800] sm:$0xff] }
 0x24f   :  { %4027 = vmatpush.msk.msrb.mxu3 %vm104_vm0, %v4023_v33  ;;  %781 = vmatpush.msra.mxu1 %v3916_v34  ;;  %v4015_v33 = vld [vmem:[%s8890_s6 + $0x6e8] sm:$0xff]  ;;  %v4052_v34 = vld [vmem:[%s8890_s6 + $0x7e0] sm:$0xff] }
 0x250   :  { %3948 = vmatmul.msk.f32.vlgmr.msra.gmra.mxu0 %vm141_vm2, %v714_v35  ;;  %3950 = vmatmul.msk.f32.vlgmr.msra.gmra.mxu2 %vm141_vm2, %v714_v35 }
 0x251   :  { %3952 = vmatmul.msk.f32.vlgmr.msra.gmra.mxu1 %vm141_vm2, %v714_v35  ;;  %3988 = vmatpush.msk.msrb.mxu0 %vm104_vm0, %v3984_v36  ;;  %v4053_v35 = vld [vmem:[%s8890_s6 + $0x7e8] sm:$0xff]  ;;  %v4051_v36 = vld [vmem:[%s8890_s6 + $0x7d8] sm:$0xff] }
 0x252   :  { %3990 = vmatpush.msk.msrb.mxu2 %vm104_vm0, %v3985_v37  ;;  %4025 = vmatpush.msk.msrb.mxu1 %vm104_vm0, %v4022_v38  ;;  %v4012_v37 = vld [vmem:[%s8890_s6 + $0x6d0] sm:$0xff]  ;;  %v4049_v38 = vld [vmem:[%s8890_s6 + $0x7c8] sm:$0xff] }
 0x253   :  { %970 = vmatpush.msrb.mxu3 %v4020_v39  ;;  %861 = vmatpush.msrb.mxu0 %v3981_v40  ;;  %v4050_v39 = vld [vmem:[%s8890_s6 + $0x7d0] sm:$0xff]  ;;  %v4048_v40 = vld [vmem:[%s8890_s6 + $0x7c0] sm:$0xff] }
 0x254   :  { %881 = vmatpush.msrb.mxu2 %v3982_v41  ;;  %950 = vmatpush.msrb.mxu1 %v4019_v42  ;;  %v4009_v41 = vld [vmem:[%s8890_s6 + $0x6b8] sm:$0xff]  ;;  %v4046_v42 = vld [vmem:[%s8890_s6 + $0x7b0] sm:$0xff] }
 0x255   :  { %971 = vmatpush.msrb.mxu3 %v4017_v43  ;;  %862 = vmatpush.msrb.mxu0 %v3978_v44  ;;  %v4047_v43 = vld [vmem:[%s8890_s6 + $0x7b8] sm:$0xff]  ;;  %v4045_v44 = vld [vmem:[%s8890_s6 + $0x7a8] sm:$0xff] }
 0x256   :  { %882 = vmatpush.msrb.mxu2 %v3979_v45  ;;  %951 = vmatpush.msrb.mxu1 %v4016_v46  ;;  %v4006_v45 = vld [vmem:[%s8890_s6 + $0x6a0] sm:$0xff]  ;;  %v4043_v46 = vld [vmem:[%s8890_s6 + $0x798] sm:$0xff] }
 0x257   :  { %972 = vmatpush.msrb.mxu3 %v4014_v47  ;;  %863 = vmatpush.msrb.mxu0 %v3975_v48  ;;  %v4044_v47 = vld [vmem:[%s8890_s6 + $0x7a0] sm:$0xff]  ;;  %v4042_v48 = vld [vmem:[%s8890_s6 + $0x790] sm:$0xff] }
 0x258   :  { %883 = vmatpush.msrb.mxu2 %v3976_v49  ;;  %952 = vmatpush.msrb.mxu1 %v4013_v50  ;;  %v4003_v49 = vld [vmem:[%s8890_s6 + $0x688] sm:$0xff]  ;;  %v4040_v50 = vld [vmem:[%s8890_s6 + $0x780] sm:$0xff] }
 0x259   :  { %973 = vmatpush.msrb.mxu3 %v4011_v51  ;;  %864 = vmatpush.msrb.mxu0 %v3972_v52  ;;  %v4041_v51 = vld [vmem:[%s8890_s6 + $0x788] sm:$0xff]  ;;  %v4039_v52 = vld [vmem:[%s8890_s6 + $0x778] sm:$0xff] }
 0x25a   :  { %884 = vmatpush.msrb.mxu2 %v3973_v53  ;;  %953 = vmatpush.msrb.mxu1 %v4010_v54  ;;  %v4000_v53 = vld [vmem:[%s8890_s6 + $0x670] sm:$0xff]  ;;  %v4037_v54 = vld [vmem:[%s8890_s6 + $0x768] sm:$0xff] }
 0x25b   :  { %974 = vmatpush.msrb.mxu3 %v4008_v55  ;;  %865 = vmatpush.msrb.mxu0 %v3969_v56  ;;  %v4038_v55 = vld [vmem:[%s8890_s6 + $0x770] sm:$0xff]  ;;  %v4036_v56 = vld [vmem:[%s8890_s6 + $0x760] sm:$0xff] }
 0x25c   :  { %885 = vmatpush.msrb.mxu2 %v3970_v57  ;;  %954 = vmatpush.msrb.mxu1 %v4007_v58  ;;  %v3997_v57 = vld [vmem:[%s8890_s6 + $0x658] sm:$0xff]  ;;  %v4034_v58 = vld [vmem:[%s8890_s6 + $0x750] sm:$0xff] }
 0x25d   :  { %975 = vmatpush.msrb.mxu3 %v4005_v59  ;;  %866 = vmatpush.msrb.mxu0 %v3966_v61  ;;  %v4035_v59 = vld [vmem:[%s8890_s6 + $0x758] sm:$0xff]  ;;  %v4033_v61 = vld [vmem:[%s8890_s6 + $0x748] sm:$0xff] }
 0x25e   :  { %886 = vmatpush.msrb.mxu2 %v3967_v62  ;;  %955 = vmatpush.msrb.mxu1 %v4004_v0  ;;  %v3994_v62 = vld [vmem:[%s8890_s6 + $0x640] sm:$0xff]  ;;  %v4031_v0 = vld [vmem:[%s8890_s6 + $0x738] sm:$0xff] }
 0x25f   :  { %976 = vmatpush.msrb.mxu3 %v4002_v1  ;;  %867 = vmatpush.msrb.mxu0 %v3963_v2  ;;  %v1041_v1 = vrot.slane %v5410_v63, 7  ;;  %v4139_v2 = vld [vmem:[%s8890_s6 + $0xa38] sm:$0x3] }
 0x260   :  { %887 = vmatpush.msrb.mxu2 %v3964_v3  ;;  %956 = vmatpush.msrb.mxu1 %v4001_v4  ;;  %v4032_v3 = vld [vmem:[%s8890_s6 + $0x740] sm:$0xff]  ;;  %v4100_v4 = vld [vmem:[%s8890_s6 + $0x930] sm:$0x3]  ;;  %v4101_v63 = vld [vmem:[%s8890_s6 + $0x938] sm:$0x3] }
 0x261   :  { %977 = vmatpush.msrb.mxu3 %v3999_v5  ;;  %868 = vmatpush.msrb.mxu0 %v3960_v6  ;;  %v4102_v5 = vld [vmem:[%s8890_s6 + $0x940] sm:$0x3] }
 0x262   :  { %888 = vmatpush.msrb.mxu2 %v3961_v7  ;;  %957 = vmatpush.msrb.mxu1 %v3998_v8  ;;  %v4136_v6 = vld [vmem:[%s8890_s6 + $0xa20] sm:$0xff]  ;;  %v4097_v7 = vld [vmem:[%s8890_s6 + $0x918] sm:$0xff] }
 0x263   :  { %978 = vmatpush.msrb.mxu3 %v3996_v9  ;;  %869 = vmatpush.msrb.mxu0 %v3957_v10  ;;  %v4098_v8 = vld [vmem:[%s8890_s6 + $0x920] sm:$0xff]  ;;  %v4099_v9 = vld [vmem:[%s8890_s6 + $0x928] sm:$0xff] }
 0x264   :  { %889 = vmatpush.msrb.mxu2 %v3958_v11  ;;  %958 = vmatpush.msrb.mxu1 %v3995_v12  ;;  %v4133_v10 = vld [vmem:[%s8890_s6 + $0xa08] sm:$0xff]  ;;  %v4094_v11 = vld [vmem:[%s8890_s6 + $0x900] sm:$0xff] }
 0x265   :  { %979 = vmatpush.msrb.mxu3 %v3993_v13  ;;  %870 = vmatpush.msrb.mxu0 %v3954_v14  ;;  %v4095_v12 = vld [vmem:[%s8890_s6 + $0x908] sm:$0xff]  ;;  %v4096_v13 = vld [vmem:[%s8890_s6 + $0x910] sm:$0xff] }
 0x266   :  { %4028 = vmatmul.msk.f32.vlgmr.msrb.gmra.mxu3 %vm141_vm2, %v5850_v16  ;;  %890 = vmatpush.msrb.mxu2 %v3955_v15  ;;  %v4130_v14 = vld [vmem:[%s8890_s6 + $0x9f0] sm:$0xff]  ;;  %v4091_v15 = vld [vmem:[%s8890_s6 + $0x8e8] sm:$0xff] }
 0x267   :  { %4068 = vmatpush.msk.msra.mxu3 %vm104_vm0, %v4063_v17  ;;  %959 = vmatpush.msrb.mxu1 %v3992_v18  ;;  %v4093_v17 = vld [vmem:[%s8890_s6 + $0x8f8] sm:$0xff] }
 0x268   :  { %3989 = vmatmul.msk.f32.vlgmr.msrb.gmra.mxu0 %vm141_vm2, %v5705_v32  ;;  %3991 = vmatmul.msk.f32.vlgmr.msrb.gmra.mxu2 %vm141_vm2, %v5705_v32  ;;  %v4054_v32 = vld [vmem:[%s8890_s6 + $0x7f0] sm:$0xff]  ;;  %v4127_v18 = vld [vmem:[%s8890_s6 + $0x9d8] sm:$0xff] }
 0x269   :  { %4026 = vmatmul.msk.f32.vlgmr.msrb.gmra.mxu1 %vm141_vm2, %v5850_v16  ;;  %4029 = vmatpush.msk.msra.mxu0 %vm104_vm0, %v4024_v19  ;;  %v4088_v19 = vld [vmem:[%s8890_s6 + $0x8d0] sm:$0xff] }
 0x26a   :  { %4064 = vmatpush.msk.msra.mxu2 %vm104_vm0, %v4061_v21  ;;  %4066 = vmatpush.msk.msra.mxu1 %vm104_vm0, %v4062_v23  ;;  %v4089_v21 = vld [vmem:[%s8890_s6 + $0x8d8] sm:$0xff]  ;;  %v4090_v23 = vld [vmem:[%s8890_s6 + $0x8e0] sm:$0xff] }
 0x26b   :  { %1099 = vmatpush.msra.mxu3 %v4060_v24  ;;  %990 = vmatpush.msra.mxu0 %v4021_v25  ;;  %v4124_v24 = vld [vmem:[%s8890_s6 + $0x9c0] sm:$0xff]  ;;  %v4085_v25 = vld [vmem:[%s8890_s6 + $0x8b8] sm:$0xff] }
 0x26c   :  { %1059 = vmatpush.msra.mxu2 %v4058_v26  ;;  %1079 = vmatpush.msra.mxu1 %v4059_v27  ;;  %v246_v26 = vpop.f32.mrf.mxu3  ;;  %v4086_v27 = vld [vmem:[%s8890_s6 + $0x8c0] sm:$0xff] }
 0x26d   :  { %1100 = vmatpush.msra.mxu3 %v4057_v28  ;;  %991 = vmatpush.msra.mxu0 %v4018_v29  ;;  %v4087_v28 = vld [vmem:[%s8890_s6 + $0x8c8] sm:$0xff] }
 0x26e   :  { %1060 = vmatpush.msra.mxu2 %v4055_v30  ;;  %1080 = vmatpush.msra.mxu1 %v4056_v31  ;;  %v4121_v29 = vld [vmem:[%s8890_s6 + $0x9a8] sm:$0xff]  ;;  %v4082_v30 = vld [vmem:[%s8890_s6 + $0x8a0] sm:$0xff]  ;;  %v6087_v31 = vpop.permute.xlu1 %217 }
 0x26f   :  { %1101 = vmatpush.msra.mxu3 %v4054_v32  ;;  %992 = vmatpush.msra.mxu0 %v4015_v33  ;;  %v4083_v32 = vld [vmem:[%s8890_s6 + $0x8a8] sm:$0xff]  ;;  %v4084_v33 = vld [vmem:[%s8890_s6 + $0x8b0] sm:$0xff] }
 0x270   :  { %1061 = vmatpush.msra.mxu2 %v4052_v34  ;;  %1081 = vmatpush.msra.mxu1 %v4053_v35  ;;  %v247_v34 = vadd.f32 %v246_v26, %v6087_v31  ;;  %v4118_v35 = vld [vmem:[%s8890_s6 + $0x990] sm:$0xff]  ;;  %v4117_v26 = vld [vmem:[%s8890_s6 + $0x988] sm:$0xff] }
 0x271   :  { %1102 = vmatpush.msra.mxu3 %v4051_v36  ;;  %993 = vmatpush.msra.mxu0 %v4012_v37  ;;  %v4079_v36 = vld [vmem:[%s8890_s6 + $0x888] sm:$0xff]  ;;  %v4080_v37 = vld [vmem:[%s8890_s6 + $0x890] sm:$0xff] }
 0x272   :  { %1062 = vmatpush.msra.mxu2 %v4049_v38  ;;  %1082 = vmatpush.msra.mxu1 %v4050_v39  ;;  %v4081_v38 = vld [vmem:[%s8890_s6 + $0x898] sm:$0xff] }
 0x273   :  { %1103 = vmatpush.msra.mxu3 %v4048_v40  ;;  %994 = vmatpush.msra.mxu0 %v4009_v41  ;;  %v4115_v39 = vld [vmem:[%s8890_s6 + $0x978] sm:$0xff]  ;;  %v4076_v40 = vld [vmem:[%s8890_s6 + $0x870] sm:$0xff] }
 0x274   :  { %1063 = vmatpush.msra.mxu2 %v4046_v42  ;;  %1083 = vmatpush.msra.mxu1 %v4047_v43  ;;  %v4077_v41 = vld [vmem:[%s8890_s6 + $0x878] sm:$0xff]  ;;  %v4078_v42 = vld [vmem:[%s8890_s6 + $0x880] sm:$0xff]  ;;  %v6120_v43 = vmax.f32 %v247_v34, 0.0  ;;  %v4110_v34 = vld [vmem:[%s8890_s6 + $0x950] sm:$0xff] }
 0x275   :  { %1104 = vmatpush.msra.mxu3 %v4045_v44  ;;  %995 = vmatpush.msra.mxu0 %v4006_v45  ;;  %v4112_v44 = vld [vmem:[%s8890_s6 + $0x960] sm:$0xff]  ;;  %v4073_v45 = vld [vmem:[%s8890_s6 + $0x858] sm:$0xff] }
 0x276   :  { %1064 = vmatpush.msra.mxu2 %v4043_v46  ;;  %1084 = vmatpush.msra.mxu1 %v4044_v47  ;;  %v4074_v46 = vld [vmem:[%s8890_s6 + $0x860] sm:$0xff]  ;;  %v4075_v47 = vld [vmem:[%s8890_s6 + $0x868] sm:$0xff] }
 0x277   :  { %1105 = vmatpush.msra.mxu3 %v4042_v48  ;;  %996 = vmatpush.msra.mxu0 %v4003_v49  ;;  %v4109_v48 = vld [vmem:[%s8890_s6 + $0x948] sm:$0xff]  ;;  %v4070_v49 = vld [vmem:[%s8890_s6 + $0x840] sm:$0xff] }
 0x278   :  { %1065 = vmatpush.msra.mxu2 %v4040_v50  ;;  %1085 = vmatpush.msra.mxu1 %v4041_v51  ;;  %v4071_v50 = vld [vmem:[%s8890_s6 + $0x848] sm:$0xff]  ;;  %v6144_v51 = vrot.slane %v6120_v43, 1 }
 0x279   :  { %1106 = vmatpush.msra.mxu3 %v4039_v52  ;;  %997 = vmatpush.msra.mxu0 %v4000_v53  ;;  %v4179_v52 = vld [vmem:[%s8890_s6 + $0xb48] sm:$0x3]  ;;  %v4072_v53 = vld [vmem:[%s8890_s6 + $0x850] sm:$0xff] }
 0x27a   :  { %1066 = vmatpush.msra.mxu2 %v4037_v54  ;;  %1086 = vmatpush.msra.mxu1 %v4038_v55  ;;  %v4140_v54 = vld [vmem:[%s8890_s6 + $0xa40] sm:$0x3]  ;;  %v4141_v55 = vld [vmem:[%s8890_s6 + $0xa48] sm:$0x3] }
 0x27b   :  { %1107 = vmatpush.msra.mxu3 %v4036_v56  ;;  %998 = vmatpush.msra.mxu0 %v3997_v57  ;;  %v4178_v56 = vld [vmem:[%s8890_s6 + $0xb40] sm:$0x3]  ;;  %v4176_v57 = vld [vmem:[%s8890_s6 + $0xb30] sm:$0xff] }
 0x27c   :  { %1067 = vmatpush.msra.mxu2 %v4034_v58  ;;  %1087 = vmatpush.msra.mxu1 %v4035_v59  ;;  %v4137_v58 = vld [vmem:[%s8890_s6 + $0xa28] sm:$0xff]  ;;  %v4138_v59 = vld [vmem:[%s8890_s6 + $0xa30] sm:$0xff] }
 0x27d   :  { %1108 = vmatpush.msra.mxu3 %v4033_v61  ;;  %999 = vmatpush.msra.mxu0 %v3994_v62  ;;  %v4175_v61 = vld [vmem:[%s8890_s6 + $0xb28] sm:$0xff]  ;;  %v4173_v62 = vld [vmem:[%s8890_s6 + $0xb18] sm:$0xff] }
 0x27e   :  { %4069 = vmatmul.msk.f32.vlgmr.msra.gmra.mxu3 %vm141_vm2, %v1041_v1  ;;  %1068 = vmatpush.msra.mxu2 %v4031_v0  ;;  %v4134_v0 = vld [vmem:[%s8890_s6 + $0xa10] sm:$0xff] }
 0x27f   :  { %4142 = vmatpush.msk.msrb.mxu3 %vm104_vm0, %v4139_v2  ;;  %1088 = vmatpush.msra.mxu1 %v4032_v3  ;;  %v4172_v2 = vld [vmem:[%s8890_s6 + $0xb10] sm:$0xff]  ;;  %v4170_v3 = vld [vmem:[%s8890_s6 + $0xb00] sm:$0xff] }
 0x280   :  { %4030 = vmatmul.msk.f32.vlgmr.msra.gmra.mxu0 %vm141_vm2, %v5850_v16  ;;  %4065 = vmatmul.msk.f32.vlgmr.msra.gmra.mxu2 %vm141_vm2, %v1041_v1  ;;  %v4092_v16 = vld [vmem:[%s8890_s6 + $0x8f0] sm:$0xff] }
 0x281   :  { %4067 = vmatmul.msk.f32.vlgmr.msra.gmra.mxu1 %vm141_vm2, %v1041_v1  ;;  %4103 = vmatpush.msk.msrb.mxu0 %vm104_vm0, %v4100_v4  ;;  %v4135_v1 = vld [vmem:[%s8890_s6 + $0xa18] sm:$0xff] }
 0x282   :  { %4105 = vmatpush.msk.msrb.mxu2 %vm104_vm0, %v4101_v63  ;;  %4107 = vmatpush.msk.msrb.mxu1 %vm104_vm0, %v4102_v5  ;;  %v4131_v4 = vld [vmem:[%s8890_s6 + $0x9f8] sm:$0xff]  ;;  %v4132_v63 = vld [vmem:[%s8890_s6 + $0xa00] sm:$0xff] }
 0x283   :  { %1277 = vmatpush.msrb.mxu3 %v4136_v6  ;;  %1168 = vmatpush.msrb.mxu0 %v4097_v7  ;;  %v4169_v5 = vld [vmem:[%s8890_s6 + $0xaf8] sm:$0xff]  ;;  %v4167_v6 = vld [vmem:[%s8890_s6 + $0xae8] sm:$0xff]  ;;  %v4128_v7 = vld [vmem:[%s8890_s6 + $0x9e0] sm:$0xff] }
 0x284   :  { %1188 = vmatpush.msrb.mxu2 %v4098_v8  ;;  %1208 = vmatpush.msrb.mxu1 %v4099_v9  ;;  %v4129_v8 = vld [vmem:[%s8890_s6 + $0x9e8] sm:$0xff]  ;;  %v4166_v9 = vld [vmem:[%s8890_s6 + $0xae0] sm:$0xff] }
 0x285   :  { %1278 = vmatpush.msrb.mxu3 %v4133_v10  ;;  %1169 = vmatpush.msrb.mxu0 %v4094_v11  ;;  %v4164_v10 = vld [vmem:[%s8890_s6 + $0xad0] sm:$0xff]  ;;  %v4125_v11 = vld [vmem:[%s8890_s6 + $0x9c8] sm:$0xff] }
 0x286   :  { %1189 = vmatpush.msrb.mxu2 %v4095_v12  ;;  %1209 = vmatpush.msrb.mxu1 %v4096_v13  ;;  %v4126_v12 = vld [vmem:[%s8890_s6 + $0x9d0] sm:$0xff]  ;;  %v4163_v13 = vld [vmem:[%s8890_s6 + $0xac8] sm:$0xff] }
 0x287   :  { %1279 = vmatpush.msrb.mxu3 %v4130_v14  ;;  %1170 = vmatpush.msrb.mxu0 %v4091_v15  ;;  %v4161_v14 = vld [vmem:[%s8890_s6 + $0xab8] sm:$0xff]  ;;  %v4122_v15 = vld [vmem:[%s8890_s6 + $0x9b0] sm:$0xff] }
 0x288   :  { %1190 = vmatpush.msrb.mxu2 %v4092_v16  ;;  %1210 = vmatpush.msrb.mxu1 %v4093_v17  ;;  %v4123_v16 = vld [vmem:[%s8890_s6 + $0x9b8] sm:$0xff]  ;;  %v4160_v17 = vld [vmem:[%s8890_s6 + $0xab0] sm:$0xff] }
 0x289   :  { %1280 = vmatpush.msrb.mxu3 %v4127_v18  ;;  %1171 = vmatpush.msrb.mxu0 %v4088_v19  ;;  %v4158_v18 = vld [vmem:[%s8890_s6 + $0xaa0] sm:$0xff]  ;;  %v4119_v19 = vld [vmem:[%s8890_s6 + $0x998] sm:$0xff] }
 0x28a   :  { %1191 = vmatpush.msrb.mxu2 %v4089_v21  ;;  %1211 = vmatpush.msrb.mxu1 %v4090_v23  ;;  %v4120_v21 = vld [vmem:[%s8890_s6 + $0x9a0] sm:$0xff]  ;;  %v4157_v23 = vld [vmem:[%s8890_s6 + $0xa98] sm:$0xff] }
 0x28b   :  { %1281 = vmatpush.msrb.mxu3 %v4124_v24  ;;  %1172 = vmatpush.msrb.mxu0 %v4085_v25  ;;  %v4155_v24 = vld [vmem:[%s8890_s6 + $0xa88] sm:$0xff]  ;;  %v4116_v25 = vld [vmem:[%s8890_s6 + $0x980] sm:$0xff] }
 0x28c   :  { %1192 = vmatpush.msrb.mxu2 %v4086_v27  ;;  %1212 = vmatpush.msrb.mxu1 %v4087_v28  ;;  %v4154_v27 = vld [vmem:[%s8890_s6 + $0xa80] sm:$0xff]  ;;  %v4152_v28 = vld [vmem:[%s8890_s6 + $0xa70] sm:$0xff] }
 0x28d   :  { %1282 = vmatpush.msrb.mxu3 %v4121_v29  ;;  %1173 = vmatpush.msrb.mxu0 %v4082_v30  ;;  %v4113_v29 = vld [vmem:[%s8890_s6 + $0x968] sm:$0xff]  ;;  %v4114_v30 = vld [vmem:[%s8890_s6 + $0x970] sm:$0xff] }
 0x28e   :  { %1193 = vmatpush.msrb.mxu2 %v4083_v32  ;;  %1213 = vmatpush.msrb.mxu1 %v4084_v33  ;;  %v4151_v32 = vld [vmem:[%s8890_s6 + $0xa68] sm:$0xff]  ;;  %v4149_v33 = vld [vmem:[%s8890_s6 + $0xa58] sm:$0xff] }
 0x28f   :  { %1283 = vmatpush.msrb.mxu3 %v4118_v35  ;;  %1174 = vmatpush.msrb.mxu0 %v4079_v36  ;;  %v4111_v35 = vld [vmem:[%s8890_s6 + $0x958] sm:$0xff]  ;;  %v6291_v36 = vrot.slane %v6120_v43, 2 }
 0x290   :  { %1194 = vmatpush.msrb.mxu2 %v4080_v37  ;;  %1214 = vmatpush.msrb.mxu1 %v4081_v38  ;;  %v4219_v37 = vld [vmem:[%s8890_s6 + $0xc58] sm:$0x3]  ;;  %v4148_v38 = vld [vmem:[%s8890_s6 + $0xa50] sm:$0xff] }
 0x291   :  { %1284 = vmatpush.msrb.mxu3 %v4115_v39  ;;  %1175 = vmatpush.msrb.mxu0 %v4076_v40  ;;  %v4180_v39 = vld [vmem:[%s8890_s6 + $0xb50] sm:$0x3]  ;;  %v4217_v40 = vld [vmem:[%s8890_s6 + $0xc48] sm:$0x3] }
 0x292   :  { %1195 = vmatpush.msrb.mxu2 %v4077_v41  ;;  %1215 = vmatpush.msrb.mxu1 %v4078_v42  ;;  %v4218_v41 = vld [vmem:[%s8890_s6 + $0xc50] sm:$0x3]  ;;  %v4216_v42 = vld [vmem:[%s8890_s6 + $0xc40] sm:$0xff] }
 0x293   :  { %1285 = vmatpush.msrb.mxu3 %v4112_v44  ;;  %1176 = vmatpush.msrb.mxu0 %v4073_v45  ;;  %v4177_v44 = vld [vmem:[%s8890_s6 + $0xb38] sm:$0xff]  ;;  %v4214_v45 = vld [vmem:[%s8890_s6 + $0xc30] sm:$0xff] }
 0x294   :  { %1196 = vmatpush.msrb.mxu2 %v4074_v46  ;;  %1216 = vmatpush.msrb.mxu1 %v4075_v47  ;;  %v4215_v46 = vld [vmem:[%s8890_s6 + $0xc38] sm:$0xff]  ;;  %v4213_v47 = vld [vmem:[%s8890_s6 + $0xc28] sm:$0xff] }
 0x295   :  { %1286 = vmatpush.msrb.mxu3 %v4109_v48  ;;  %1177 = vmatpush.msrb.mxu0 %v4070_v49  ;;  %v4174_v48 = vld [vmem:[%s8890_s6 + $0xb20] sm:$0xff]  ;;  %v4211_v49 = vld [vmem:[%s8890_s6 + $0xc18] sm:$0xff] }
 0x296   :  { %4143 = vmatmul.msk.f32.vlgmr.msrb.gmra.mxu3 %vm141_vm2, %v6144_v51  ;;  %1197 = vmatpush.msrb.mxu2 %v4071_v50  ;;  %v4212_v50 = vld [vmem:[%s8890_s6 + $0xc20] sm:$0xff] }
 0x297   :  { %4183 = vmatpush.msk.msra.mxu3 %vm104_vm0, %v4179_v52  ;;  %1217 = vmatpush.msrb.mxu1 %v4072_v53  ;;  %v4171_v52 = vld [vmem:[%s8890_s6 + $0xb08] sm:$0xff]  ;;  %v4208_v53 = vld [vmem:[%s8890_s6 + $0xc00] sm:$0xff] }
 0x298   :  { %4104 = vmatmul.msk.f32.vlgmr.msrb.gmra.mxu0 %vm141_vm2, %v6120_v43  ;;  %4106 = vmatmul.msk.f32.vlgmr.msrb.gmra.mxu2 %vm141_vm2, %v6120_v43 }
 0x299   :  { %4108 = vmatmul.msk.f32.vlgmr.msrb.gmra.mxu1 %vm141_vm2, %v6120_v43  ;;  %4144 = vmatpush.msk.msra.mxu0 %vm104_vm0, %v4140_v54  ;;  %v4209_v54 = vld [vmem:[%s8890_s6 + $0xc08] sm:$0xff] }
 0x29a   :  { %4146 = vmatpush.msk.msra.mxu2 %vm104_vm0, %v4141_v55  ;;  %4181 = vmatpush.msk.msra.mxu1 %vm104_vm0, %v4178_v56  ;;  %v4207_v55 = vld [vmem:[%s8890_s6 + $0xbf8] sm:$0xff]  ;;  %v4168_v56 = vld [vmem:[%s8890_s6 + $0xaf0] sm:$0xff] }
 0x29b   :  { %1406 = vmatpush.msra.mxu3 %v4176_v57  ;;  %1297 = vmatpush.msra.mxu0 %v4137_v58  ;;  %v4205_v57 = vld [vmem:[%s8890_s6 + $0xbe8] sm:$0xff]  ;;  %v4206_v58 = vld [vmem:[%s8890_s6 + $0xbf0] sm:$0xff] }
 0x29c   :  { %1317 = vmatpush.msra.mxu2 %v4138_v59  ;;  %1386 = vmatpush.msra.mxu1 %v4175_v61  ;;  %v4204_v59 = vld [vmem:[%s8890_s6 + $0xbe0] sm:$0xff]  ;;  %v4165_v61 = vld [vmem:[%s8890_s6 + $0xad8] sm:$0xff] }
 0x29d   :  { %1407 = vmatpush.msra.mxu3 %v4173_v62  ;;  %1298 = vmatpush.msra.mxu0 %v4134_v0  ;;  %v4202_v62 = vld [vmem:[%s8890_s6 + $0xbd0] sm:$0xff]  ;;  %v4203_v0 = vld [vmem:[%s8890_s6 + $0xbd8] sm:$0xff] }
 0x29e   :  { %1318 = vmatpush.msra.mxu2 %v4135_v1  ;;  %1387 = vmatpush.msra.mxu1 %v4172_v2  ;;  %v4201_v1 = vld [vmem:[%s8890_s6 + $0xbc8] sm:$0xff]  ;;  %v4162_v2 = vld [vmem:[%s8890_s6 + $0xac0] sm:$0xff] }
 0x29f   :  { %1408 = vmatpush.msra.mxu3 %v4170_v3  ;;  %1299 = vmatpush.msra.mxu0 %v4131_v4  ;;  %v4199_v3 = vld [vmem:[%s8890_s6 + $0xbb8] sm:$0xff]  ;;  %v4200_v4 = vld [vmem:[%s8890_s6 + $0xbc0] sm:$0xff] }
 0x2a0   :  { %1319 = vmatpush.msra.mxu2 %v4132_v63  ;;  %1388 = vmatpush.msra.mxu1 %v4169_v5  ;;  %v4198_v63 = vld [vmem:[%s8890_s6 + $0xbb0] sm:$0xff]  ;;  %v4159_v5 = vld [vmem:[%s8890_s6 + $0xaa8] sm:$0xff] }
 0x2a1   :  { %1409 = vmatpush.msra.mxu3 %v4167_v6  ;;  %1300 = vmatpush.msra.mxu0 %v4128_v7  ;;  %v4196_v6 = vld [vmem:[%s8890_s6 + $0xba0] sm:$0xff]  ;;  %v4197_v7 = vld [vmem:[%s8890_s6 + $0xba8] sm:$0xff] }
 0x2a2   :  { %1320 = vmatpush.msra.mxu2 %v4129_v8  ;;  %1389 = vmatpush.msra.mxu1 %v4166_v9  ;;  %v4195_v8 = vld [vmem:[%s8890_s6 + $0xb98] sm:$0xff]  ;;  %v4156_v9 = vld [vmem:[%s8890_s6 + $0xa90] sm:$0xff] }
 0x2a3   :  { %1410 = vmatpush.msra.mxu3 %v4164_v10  ;;  %1301 = vmatpush.msra.mxu0 %v4125_v11  ;;  %v4193_v10 = vld [vmem:[%s8890_s6 + $0xb88] sm:$0xff]  ;;  %v4194_v11 = vld [vmem:[%s8890_s6 + $0xb90] sm:$0xff] }
 0x2a4   :  { %1321 = vmatpush.msra.mxu2 %v4126_v12  ;;  %1390 = vmatpush.msra.mxu1 %v4163_v13  ;;  %v4192_v12 = vld [vmem:[%s8890_s6 + $0xb80] sm:$0xff]  ;;  %v4153_v13 = vld [vmem:[%s8890_s6 + $0xa78] sm:$0xff] }
 0x2a5   :  { %1411 = vmatpush.msra.mxu3 %v4161_v14  ;;  %1302 = vmatpush.msra.mxu0 %v4122_v15  ;;  %v4190_v14 = vld [vmem:[%s8890_s6 + $0xb70] sm:$0xff]  ;;  %v4191_v15 = vld [vmem:[%s8890_s6 + $0xb78] sm:$0xff] }
 0x2a6   :  { %1322 = vmatpush.msra.mxu2 %v4123_v16  ;;  %1391 = vmatpush.msra.mxu1 %v4160_v17  ;;  %v4189_v16 = vld [vmem:[%s8890_s6 + $0xb68] sm:$0xff]  ;;  %v4150_v17 = vld [vmem:[%s8890_s6 + $0xa60] sm:$0xff] }
 0x2a7   :  { %1412 = vmatpush.msra.mxu3 %v4158_v18  ;;  %1303 = vmatpush.msra.mxu0 %v4119_v19  ;;  %v4187_v18 = vld [vmem:[%s8890_s6 + $0xb58] sm:$0xff]  ;;  %v1477_v19 = vrot.slane %v6120_v43, 3 }
 0x2a8   :  { %1323 = vmatpush.msra.mxu2 %v4120_v21  ;;  %1392 = vmatpush.msra.mxu1 %v4157_v23  ;;  %v4295_v21 = vld [vmem:[%s8890_s6 + $0xe58] sm:$0x3]  ;;  %v4188_v23 = vld [vmem:[%s8890_s6 + $0xb60] sm:$0xff] }
 0x2a9   :  { %1413 = vmatpush.msra.mxu3 %v4155_v24  ;;  %1304 = vmatpush.msra.mxu0 %v4116_v25  ;;  %v4256_v24 = vld [vmem:[%s8890_s6 + $0xd50] sm:$0x3]  ;;  %v4257_v25 = vld [vmem:[%s8890_s6 + $0xd58] sm:$0x3] }
 0x2aa   :  { %1324 = vmatpush.msra.mxu2 %v4117_v26  ;;  %1393 = vmatpush.msra.mxu1 %v4154_v27  ;;  %v4258_v26 = vld [vmem:[%s8890_s6 + $0xd60] sm:$0x3] }
 0x2ab   :  { %1414 = vmatpush.msra.mxu3 %v4152_v28  ;;  %1305 = vmatpush.msra.mxu0 %v4113_v29  ;;  %v4292_v27 = vld [vmem:[%s8890_s6 + $0xe40] sm:$0xff]  ;;  %v4253_v28 = vld [vmem:[%s8890_s6 + $0xd38] sm:$0xff] }
 0x2ac   :  { %1325 = vmatpush.msra.mxu2 %v4114_v30  ;;  %1394 = vmatpush.msra.mxu1 %v4151_v32  ;;  %v4254_v29 = vld [vmem:[%s8890_s6 + $0xd40] sm:$0xff]  ;;  %v4255_v30 = vld [vmem:[%s8890_s6 + $0xd48] sm:$0xff] }
 0x2ad   :  { %1415 = vmatpush.msra.mxu3 %v4149_v33  ;;  %1306 = vmatpush.msra.mxu0 %v4110_v34  ;;  %v4289_v32 = vld [vmem:[%s8890_s6 + $0xe28] sm:$0xff]  ;;  %v4250_v33 = vld [vmem:[%s8890_s6 + $0xd20] sm:$0xff] }
 0x2ae   :  { %4184 = vmatmul.msk.f32.vlgmr.msra.gmra.mxu3 %vm141_vm2, %v6291_v36  ;;  %1326 = vmatpush.msra.mxu2 %v4111_v35  ;;  %v4251_v34 = vld [vmem:[%s8890_s6 + $0xd28] sm:$0xff]  ;;  %v4252_v35 = vld [vmem:[%s8890_s6 + $0xd30] sm:$0xff] }
 0x2af   :  { %4224 = vmatpush.msk.msrb.mxu3 %vm104_vm0, %v4219_v37  ;;  %1395 = vmatpush.msra.mxu1 %v4148_v38  ;;  %v4247_v37 = vld [vmem:[%s8890_s6 + $0xd08] sm:$0xff]  ;;  %v4248_v38 = vld [vmem:[%s8890_s6 + $0xd10] sm:$0xff] }
 0x2b0   :  { %4145 = vmatmul.msk.f32.vlgmr.msra.gmra.mxu0 %vm141_vm2, %v6144_v51  ;;  %4147 = vmatmul.msk.f32.vlgmr.msra.gmra.mxu2 %vm141_vm2, %v6144_v51  ;;  %v4210_v51 = vld [vmem:[%s8890_s6 + $0xc10] sm:$0xff] }
 0x2b1   :  { %4182 = vmatmul.msk.f32.vlgmr.msra.gmra.mxu1 %vm141_vm2, %v6291_v36  ;;  %4185 = vmatpush.msk.msrb.mxu0 %vm104_vm0, %v4180_v39  ;;  %v4249_v39 = vld [vmem:[%s8890_s6 + $0xd18] sm:$0xff] }
 0x2b2   :  { %4220 = vmatpush.msk.msrb.mxu2 %vm104_vm0, %v4217_v40  ;;  %4222 = vmatpush.msk.msrb.mxu1 %vm104_vm0, %v4218_v41  ;;  %v4283_v40 = vld [vmem:[%s8890_s6 + $0xdf8] sm:$0xff]  ;;  %v4244_v41 = vld [vmem:[%s8890_s6 + $0xcf0] sm:$0xff] }
 0x2b3   :  { %1535 = vmatpush.msrb.mxu3 %v4216_v42  ;;  %1426 = vmatpush.msrb.mxu0 %v4177_v44  ;;  %v4245_v42 = vld [vmem:[%s8890_s6 + $0xcf8] sm:$0xff]  ;;  %v4246_v44 = vld [vmem:[%s8890_s6 + $0xd00] sm:$0xff] }
 0x2b4   :  { %1495 = vmatpush.msrb.mxu2 %v4214_v45  ;;  %1515 = vmatpush.msrb.mxu1 %v4215_v46  ;;  %v4280_v45 = vld [vmem:[%s8890_s6 + $0xde0] sm:$0xff]  ;;  %v4241_v46 = vld [vmem:[%s8890_s6 + $0xcd8] sm:$0xff] }
 0x2b5   :  { %1536 = vmatpush.msrb.mxu3 %v4213_v47  ;;  %1427 = vmatpush.msrb.mxu0 %v4174_v48  ;;  %v4242_v47 = vld [vmem:[%s8890_s6 + $0xce0] sm:$0xff]  ;;  %v4243_v48 = vld [vmem:[%s8890_s6 + $0xce8] sm:$0xff] }
 0x2b6   :  { %1496 = vmatpush.msrb.mxu2 %v4211_v49  ;;  %1516 = vmatpush.msrb.mxu1 %v4212_v50  ;;  %v4277_v49 = vld [vmem:[%s8890_s6 + $0xdc8] sm:$0xff]  ;;  %v4238_v50 = vld [vmem:[%s8890_s6 + $0xcc0] sm:$0xff] }
 0x2b7   :  { %1537 = vmatpush.msrb.mxu3 %v4210_v51  ;;  %1428 = vmatpush.msrb.mxu0 %v4171_v52  ;;  %v4239_v51 = vld [vmem:[%s8890_s6 + $0xcc8] sm:$0xff]  ;;  %v4240_v52 = vld [vmem:[%s8890_s6 + $0xcd0] sm:$0xff] }
 0x2b8   :  { %1497 = vmatpush.msrb.mxu2 %v4208_v53  ;;  %1517 = vmatpush.msrb.mxu1 %v4209_v54  ;;  %v4274_v53 = vld [vmem:[%s8890_s6 + $0xdb0] sm:$0xff]  ;;  %v4235_v54 = vld [vmem:[%s8890_s6 + $0xca8] sm:$0xff] }
 0x2b9   :  { %1538 = vmatpush.msrb.mxu3 %v4207_v55  ;;  %1429 = vmatpush.msrb.mxu0 %v4168_v56  ;;  %v4236_v55 = vld [vmem:[%s8890_s6 + $0xcb0] sm:$0xff]  ;;  %v4237_v56 = vld [vmem:[%s8890_s6 + $0xcb8] sm:$0xff] }
 0x2ba   :  { %1498 = vmatpush.msrb.mxu2 %v4205_v57  ;;  %1518 = vmatpush.msrb.mxu1 %v4206_v58  ;;  %v4271_v57 = vld [vmem:[%s8890_s6 + $0xd98] sm:$0xff]  ;;  %v4232_v58 = vld [vmem:[%s8890_s6 + $0xc90] sm:$0xff] }
 0x2bb   :  { %1539 = vmatpush.msrb.mxu3 %v4204_v59  ;;  %1430 = vmatpush.msrb.mxu0 %v4165_v61  ;;  %v4233_v59 = vld [vmem:[%s8890_s6 + $0xc98] sm:$0xff]  ;;  %v4234_v61 = vld [vmem:[%s8890_s6 + $0xca0] sm:$0xff] }
 0x2bc   :  { %1499 = vmatpush.msrb.mxu2 %v4202_v62  ;;  %1519 = vmatpush.msrb.mxu1 %v4203_v0  ;;  %v4268_v62 = vld [vmem:[%s8890_s6 + $0xd80] sm:$0xff]  ;;  %v4229_v0 = vld [vmem:[%s8890_s6 + $0xc78] sm:$0xff] }
 0x2bd   :  { %1540 = vmatpush.msrb.mxu3 %v4201_v1  ;;  %1431 = vmatpush.msrb.mxu0 %v4162_v2  ;;  %v4230_v1 = vld [vmem:[%s8890_s6 + $0xc80] sm:$0xff]  ;;  %v4231_v2 = vld [vmem:[%s8890_s6 + $0xc88] sm:$0xff] }
 0x2be   :  { %1500 = vmatpush.msrb.mxu2 %v4199_v3  ;;  %1520 = vmatpush.msrb.mxu1 %v4200_v4  ;;  %v4265_v3 = vld [vmem:[%s8890_s6 + $0xd68] sm:$0xff]  ;;  %v4226_v4 = vld [vmem:[%s8890_s6 + $0xc60] sm:$0xff] }
 0x2bf   :  { %1541 = vmatpush.msrb.mxu3 %v4198_v63  ;;  %1432 = vmatpush.msrb.mxu0 %v4159_v5  ;;  %v4227_v63 = vld [vmem:[%s8890_s6 + $0xc68] sm:$0xff]  ;;  %v6580_v5 = vrot.slane %v6120_v43, 5 }
 0x2c0   :  { %1501 = vmatpush.msrb.mxu2 %v4196_v6  ;;  %1521 = vmatpush.msrb.mxu1 %v4197_v7  ;;  %v4335_v6 = vld [vmem:[%s8890_s6 + $0xf68] sm:$0x3]  ;;  %v4228_v7 = vld [vmem:[%s8890_s6 + $0xc70] sm:$0xff] }
 0x2c1   :  { %1542 = vmatpush.msrb.mxu3 %v4195_v8  ;;  %1433 = vmatpush.msrb.mxu0 %v4156_v9  ;;  %v1586_v8 = vrot.slane %v6120_v43, 4  ;;  %v4296_v9 = vld [vmem:[%s8890_s6 + $0xe60] sm:$0x3] }
 0x2c2   :  { %1502 = vmatpush.msrb.mxu2 %v4193_v10  ;;  %1522 = vmatpush.msrb.mxu1 %v4194_v11  ;;  %v4297_v10 = vld [vmem:[%s8890_s6 + $0xe68] sm:$0x3]  ;;  %v4334_v11 = vld [vmem:[%s8890_s6 + $0xf60] sm:$0x3] }
 0x2c3   :  { %1543 = vmatpush.msrb.mxu3 %v4192_v12  ;;  %1434 = vmatpush.msrb.mxu0 %v4153_v13  ;;  %v4332_v12 = vld [vmem:[%s8890_s6 + $0xf50] sm:$0xff]  ;;  %v4293_v13 = vld [vmem:[%s8890_s6 + $0xe48] sm:$0xff] }
 0x2c4   :  { %1503 = vmatpush.msrb.mxu2 %v4190_v14  ;;  %1523 = vmatpush.msrb.mxu1 %v4191_v15  ;;  %v4294_v14 = vld [vmem:[%s8890_s6 + $0xe50] sm:$0xff]  ;;  %v4331_v15 = vld [vmem:[%s8890_s6 + $0xf48] sm:$0xff] }
 0x2c5   :  { %1544 = vmatpush.msrb.mxu3 %v4189_v16  ;;  %1435 = vmatpush.msrb.mxu0 %v4150_v17  ;;  %v4329_v16 = vld [vmem:[%s8890_s6 + $0xf38] sm:$0xff]  ;;  %v4290_v17 = vld [vmem:[%s8890_s6 + $0xe30] sm:$0xff] }
 0x2c6   :  { %4225 = vmatmul.msk.f32.vlgmr.msrb.gmra.mxu3 %vm141_vm2, %v1477_v19  ;;  %1504 = vmatpush.msrb.mxu2 %v4187_v18  ;;  %v4291_v18 = vld [vmem:[%s8890_s6 + $0xe38] sm:$0xff] }
 0x2c7   :  { %4298 = vmatpush.msk.msra.mxu3 %vm104_vm0, %v4295_v21  ;;  %1524 = vmatpush.msrb.mxu1 %v4188_v23  ;;  %v4326_v21 = vld [vmem:[%s8890_s6 + $0xf20] sm:$0xff]  ;;  %v4287_v23 = vld [vmem:[%s8890_s6 + $0xe18] sm:$0xff] }
 0x2c8   :  { %4186 = vmatmul.msk.f32.vlgmr.msrb.gmra.mxu0 %vm141_vm2, %v6291_v36  ;;  %4221 = vmatmul.msk.f32.vlgmr.msrb.gmra.mxu2 %vm141_vm2, %v1477_v19  ;;  %v4286_v36 = vld [vmem:[%s8890_s6 + $0xe10] sm:$0xff] }
 0x2c9   :  { %4223 = vmatmul.msk.f32.vlgmr.msrb.gmra.mxu1 %vm141_vm2, %v1477_v19  ;;  %4259 = vmatpush.msk.msra.mxu0 %vm104_vm0, %v4256_v24  ;;  %v4328_v19 = vld [vmem:[%s8890_s6 + $0xf30] sm:$0xff]  ;;  %v4288_v24 = vld [vmem:[%s8890_s6 + $0xe20] sm:$0xff] }
 0x2ca   :  { %4261 = vmatpush.msk.msra.mxu2 %vm104_vm0, %v4257_v25  ;;  %4263 = vmatpush.msk.msra.mxu1 %vm104_vm0, %v4258_v26  ;;  %v4325_v25 = vld [vmem:[%s8890_s6 + $0xf18] sm:$0xff]  ;;  %v4323_v26 = vld [vmem:[%s8890_s6 + $0xf08] sm:$0xff] }
 0x2cb   :  { %1713 = vmatpush.msra.mxu3 %v4292_v27  ;;  %1604 = vmatpush.msra.mxu0 %v4253_v28  ;;  %v4284_v27 = vld [vmem:[%s8890_s6 + $0xe00] sm:$0xff]  ;;  %v4285_v28 = vld [vmem:[%s8890_s6 + $0xe08] sm:$0xff] }
 0x2cc   :  { %1624 = vmatpush.msra.mxu2 %v4254_v29  ;;  %1644 = vmatpush.msra.mxu1 %v4255_v30  ;;  %v4322_v29 = vld [vmem:[%s8890_s6 + $0xf00] sm:$0xff]  ;;  %v4320_v30 = vld [vmem:[%s8890_s6 + $0xef0] sm:$0xff] }
 0x2cd   :  { %1714 = vmatpush.msra.mxu3 %v4289_v32  ;;  %1605 = vmatpush.msra.mxu0 %v4250_v33  ;;  %v4281_v32 = vld [vmem:[%s8890_s6 + $0xde8] sm:$0xff]  ;;  %v4282_v33 = vld [vmem:[%s8890_s6 + $0xdf0] sm:$0xff] }
 0x2ce   :  { %1625 = vmatpush.msra.mxu2 %v4251_v34  ;;  %1645 = vmatpush.msra.mxu1 %v4252_v35  ;;  %v4319_v34 = vld [vmem:[%s8890_s6 + $0xee8] sm:$0xff]  ;;  %v4317_v35 = vld [vmem:[%s8890_s6 + $0xed8] sm:$0xff] }
 0x2cf   :  { %1715 = vmatpush.msra.mxu3 %v4286_v36  ;;  %1606 = vmatpush.msra.mxu0 %v4247_v37  ;;  %v4278_v36 = vld [vmem:[%s8890_s6 + $0xdd0] sm:$0xff]  ;;  %v4279_v37 = vld [vmem:[%s8890_s6 + $0xdd8] sm:$0xff] }
 0x2d0   :  { %1626 = vmatpush.msra.mxu2 %v4248_v38  ;;  %1646 = vmatpush.msra.mxu1 %v4249_v39  ;;  %v4316_v38 = vld [vmem:[%s8890_s6 + $0xed0] sm:$0xff]  ;;  %v4314_v39 = vld [vmem:[%s8890_s6 + $0xec0] sm:$0xff] }
 0x2d1   :  { %1716 = vmatpush.msra.mxu3 %v4283_v40  ;;  %1607 = vmatpush.msra.mxu0 %v4244_v41  ;;  %v4275_v40 = vld [vmem:[%s8890_s6 + $0xdb8] sm:$0xff]  ;;  %v4276_v41 = vld [vmem:[%s8890_s6 + $0xdc0] sm:$0xff] }
 0x2d2   :  { %1627 = vmatpush.msra.mxu2 %v4245_v42  ;;  %1647 = vmatpush.msra.mxu1 %v4246_v44  ;;  %v4313_v42 = vld [vmem:[%s8890_s6 + $0xeb8] sm:$0xff]  ;;  %v4311_v44 = vld [vmem:[%s8890_s6 + $0xea8] sm:$0xff] }
 0x2d3   :  { %1717 = vmatpush.msra.mxu3 %v4280_v45  ;;  %1608 = vmatpush.msra.mxu0 %v4241_v46  ;;  %v4272_v45 = vld [vmem:[%s8890_s6 + $0xda0] sm:$0xff]  ;;  %v4273_v46 = vld [vmem:[%s8890_s6 + $0xda8] sm:$0xff] }
 0x2d4   :  { %1628 = vmatpush.msra.mxu2 %v4242_v47  ;;  %1648 = vmatpush.msra.mxu1 %v4243_v48  ;;  %v4310_v47 = vld [vmem:[%s8890_s6 + $0xea0] sm:$0xff]  ;;  %v4308_v48 = vld [vmem:[%s8890_s6 + $0xe90] sm:$0xff] }
 0x2d5   :  { %1718 = vmatpush.msra.mxu3 %v4277_v49  ;;  %1609 = vmatpush.msra.mxu0 %v4238_v50  ;;  %v4269_v49 = vld [vmem:[%s8890_s6 + $0xd88] sm:$0xff]  ;;  %v4270_v50 = vld [vmem:[%s8890_s6 + $0xd90] sm:$0xff] }
 0x2d6   :  { %1629 = vmatpush.msra.mxu2 %v4239_v51  ;;  %1649 = vmatpush.msra.mxu1 %v4240_v52  ;;  %v4307_v51 = vld [vmem:[%s8890_s6 + $0xe88] sm:$0xff]  ;;  %v4305_v52 = vld [vmem:[%s8890_s6 + $0xe78] sm:$0xff] }
 0x2d7   :  { %1719 = vmatpush.msra.mxu3 %v4274_v53  ;;  %1610 = vmatpush.msra.mxu0 %v4235_v54  ;;  %v4266_v53 = vld [vmem:[%s8890_s6 + $0xd70] sm:$0xff]  ;;  %v4267_v54 = vld [vmem:[%s8890_s6 + $0xd78] sm:$0xff] }
 0x2d8   :  { %1630 = vmatpush.msra.mxu2 %v4236_v55  ;;  %1650 = vmatpush.msra.mxu1 %v4237_v56  ;;  %v1804_v55 = vrot.slane %v6120_v43, 6  ;;  %v4304_v56 = vld [vmem:[%s8890_s6 + $0xe70] sm:$0xff]  ;;  %v4333_v43 = vld [vmem:[%s8890_s6 + $0xf58] sm:$0xff] }
 0x2d9   :  { %1720 = vmatpush.msra.mxu3 %v4271_v57  ;;  %1611 = vmatpush.msra.mxu0 %v4232_v58  ;;  %v4336_v57 = vld [vmem:[%s8890_s6 + $0xf70] sm:$0x3]  ;;  %v4330_v58 = vld [vmem:[%s8890_s6 + $0xf40] sm:$0xff] }
 0x2da   :  { %1631 = vmatpush.msra.mxu2 %v4233_v59  ;;  %1651 = vmatpush.msra.mxu1 %v4234_v61  ;;  %v4327_v59 = vld [vmem:[%s8890_s6 + $0xf28] sm:$0xff]  ;;  %v4324_v61 = vld [vmem:[%s8890_s6 + $0xf10] sm:$0xff] }
 0x2db   :  { %1721 = vmatpush.msra.mxu3 %v4268_v62  ;;  %1612 = vmatpush.msra.mxu0 %v4229_v0  ;;  %v4321_v62 = vld [vmem:[%s8890_s6 + $0xef8] sm:$0xff]  ;;  %v4318_v0 = vld [vmem:[%s8890_s6 + $0xee0] sm:$0xff] }
 0x2dc   :  { %1632 = vmatpush.msra.mxu2 %v4230_v1  ;;  %1652 = vmatpush.msra.mxu1 %v4231_v2  ;;  %v4315_v1 = vld [vmem:[%s8890_s6 + $0xec8] sm:$0xff]  ;;  %v4312_v2 = vld [vmem:[%s8890_s6 + $0xeb0] sm:$0xff] }
 0x2dd   :  { %1722 = vmatpush.msra.mxu3 %v4265_v3  ;;  %1613 = vmatpush.msra.mxu0 %v4226_v4  ;;  %v4309_v3 = vld [vmem:[%s8890_s6 + $0xe98] sm:$0xff]  ;;  %v4306_v4 = vld [vmem:[%s8890_s6 + $0xe80] sm:$0xff] }
 0x2de   :  { %4299 = vmatmul.msk.f32.vlgmr.msra.gmra.mxu3 %vm141_vm2, %v6580_v5  ;;  %1633 = vmatpush.msra.mxu2 %v4227_v63  ;;  %v6772_v63 = vld [vmem:[%s8885_s1 + $0x50] sm:$0x3] }
 0x2df   :  { %4339 = vmatpush.msk.msrb.mxu3 %vm104_vm0, %v4335_v6  ;;  %1653 = vmatpush.msra.mxu1 %v4228_v7  ;;  %v6785_v6 = vld [vmem:[%s8885_s1 + $0x40] sm:$0xff]  ;;  %v6791_v7 = vld [vmem:[%s8885_s1 + $0x38] sm:$0xff] }
 0x2e0   :  { %4260 = vmatmul.msk.f32.vlgmr.msra.gmra.mxu0 %vm141_vm2, %v1586_v8  ;;  %4262 = vmatmul.msk.f32.vlgmr.msra.gmra.mxu2 %vm141_vm2, %v1586_v8 }
 0x2e1   :  { %4264 = vmatmul.msk.f32.vlgmr.msra.gmra.mxu1 %vm141_vm2, %v1586_v8  ;;  %4300 = vmatpush.msk.msrb.mxu0 %vm104_vm0, %v4296_v9  ;;  %v6797_v8 = vld [vmem:[%s8885_s1 + $0x30] sm:$0xff]  ;;  %v6803_v9 = vld [vmem:[%s8885_s1 + $0x28] sm:$0xff] }
 0x2e2   :  { %4302 = vmatpush.msk.msrb.mxu2 %vm104_vm0, %v4297_v10  ;;  %4337 = vmatpush.msk.msrb.mxu1 %vm104_vm0, %v4334_v11  ;;  %v6809_v10 = vld [vmem:[%s8885_s1 + $0x20] sm:$0xff]  ;;  %v6815_v11 = vld [vmem:[%s8885_s1 + $0x18] sm:$0xff] }
 0x2e3   :  { %1842 = vmatpush.msrb.mxu3 %v4332_v12  ;;  %1733 = vmatpush.msrb.mxu0 %v4293_v13  ;;  %v6821_v12 = vld [vmem:[%s8885_s1 + $0x10] sm:$0xff]  ;;  %v6827_v13 = vld [vmem:[%s8885_s1 + $0x8] sm:$0xff] }
 0x2e4   :  { %1753 = vmatpush.msrb.mxu2 %v4294_v14  ;;  %1822 = vmatpush.msrb.mxu1 %v4331_v15  ;;  %v6830_v14 = vpop.f32.mrf.mxu0  ;;  %v6832_v15 = vpop.f32.mrf.mxu1 }
 0x2e5   :  { %1843 = vmatpush.msrb.mxu3 %v4329_v16  ;;  %1734 = vmatpush.msrb.mxu0 %v4290_v17  ;;  %v6837_v16 = vld [vmem:[%s8885_s1] sm:$0xff]  ;;  %v6840_v17 = vpop.f32.mrf.mxu3 }
 0x2e6   :  { %1754 = vmatpush.msrb.mxu2 %v4291_v18  ;;  %1823 = vmatpush.msrb.mxu1 %v4328_v19  ;;  %v6842_v18 = vpop.f32.mrf.mxu2  ;;  %v71_v19 = vld [vmem:[%s8892_s8 + $0x78] sm:$0xff] }
 0x2e7   :  { %1844 = vmatpush.msrb.mxu3 %v4326_v21  ;;  %1735 = vmatpush.msrb.mxu0 %v4287_v23  ;;  %v70_v21 = vld [vmem:[%s8892_s8 + $0x70] sm:$0xff] }
 0x2e8   :  { %1755 = vmatpush.msrb.mxu2 %v4288_v24  ;;  %1824 = vmatpush.msrb.mxu1 %v4325_v25 }
 0x2e9   :  { %1845 = vmatpush.msrb.mxu3 %v4323_v26  ;;  %1736 = vmatpush.msrb.mxu0 %v4284_v27 }
 0x2ea   :  { %1756 = vmatpush.msrb.mxu2 %v4285_v28  ;;  %1825 = vmatpush.msrb.mxu1 %v4322_v29 }
 0x2eb   :  { %1846 = vmatpush.msrb.mxu3 %v4320_v30  ;;  %1737 = vmatpush.msrb.mxu0 %v4281_v32 }
 0x2ec   :  { %1757 = vmatpush.msrb.mxu2 %v4282_v33  ;;  %1826 = vmatpush.msrb.mxu1 %v4319_v34  ;;  %v6850_v23 = vpop.f32.mrf.mxu0  ;;  %v6852_v24 = vpop.f32.mrf.mxu1  ;;  %v69_v34 = vld [vmem:[%s8892_s8 + $0x68] sm:$0xff] }
 0x2ed   :  { %1847 = vmatpush.msrb.mxu3 %v4317_v35  ;;  %1738 = vmatpush.msrb.mxu0 %v4278_v36  ;;  %v6854_v25 = vpop.f32.mrf.mxu3  ;;  %v87_v35 = vld [vmem:[%s8892_s8 + $0xf8] sm:$0xff]  ;;  %v68_v36 = vld [vmem:[%s8892_s8 + $0x60] sm:$0xff] }
 0x2ee   :  { %1758 = vmatpush.msrb.mxu2 %v4279_v37  ;;  %1827 = vmatpush.msrb.mxu1 %v4316_v38  ;;  %v6856_v26 = vpop.f32.mrf.mxu2  ;;  %v86_v37 = vld [vmem:[%s8892_s8 + $0xf0] sm:$0xff] }
 0x2ef   :  { %1848 = vmatpush.msrb.mxu3 %v4314_v39  ;;  %1739 = vmatpush.msrb.mxu0 %v4275_v40  ;;  %v67_v39 = vld [vmem:[%s8892_s8 + $0x58] sm:$0xff]  ;;  %v85_v40 = vld [vmem:[%s8892_s8 + $0xe8] sm:$0xff] }
 0x2f0   :  { %1759 = vmatpush.msrb.mxu2 %v4276_v41  ;;  %1828 = vmatpush.msrb.mxu1 %v4313_v42  ;;  %v66_v42 = vld [vmem:[%s8892_s8 + $0x50] sm:$0xff] }
 0x2f1   :  { %1849 = vmatpush.msrb.mxu3 %v4311_v44  ;;  %1740 = vmatpush.msrb.mxu0 %v4272_v45  ;;  %v84_v44 = vld [vmem:[%s8892_s8 + $0xe0] sm:$0xff] }
 0x2f2   :  { %1760 = vmatpush.msrb.mxu2 %v4273_v46  ;;  %1829 = vmatpush.msrb.mxu1 %v4310_v47  ;;  %v65_v47 = vld [vmem:[%s8892_s8 + $0x48] sm:$0xff] }
 0x2f3   :  { %1850 = vmatpush.msrb.mxu3 %v4308_v48  ;;  %1741 = vmatpush.msrb.mxu0 %v4269_v49  ;;  %v83_v48 = vld [vmem:[%s8892_s8 + $0xd8] sm:$0xff]  ;;  %v64_v49 = vld [vmem:[%s8892_s8 + $0x40] sm:$0xff] }
 0x2f4   :  { %1761 = vmatpush.msrb.mxu2 %v4270_v50  ;;  %1830 = vmatpush.msrb.mxu1 %v4307_v51  ;;  %v6858_v27 = vpop.f32.mrf.mxu0  ;;  %v6860_v28 = vpop.f32.mrf.mxu1  ;;  %v82_v50 = vld [vmem:[%s8892_s8 + $0xd0] sm:$0xff] }
 0x2f5   :  { %1851 = vmatpush.msrb.mxu3 %v4305_v52  ;;  %1742 = vmatpush.msrb.mxu0 %v4266_v53  ;;  %v6862_v29 = vpop.f32.mrf.mxu3  ;;  %v63_v52 = vld [vmem:[%s8892_s8 + $0x38] sm:$0xff]  ;;  %v81_v53 = vld [vmem:[%s8892_s8 + $0xc8] sm:$0xff] }
 0x2f6   :  { %4340 = vmatmul.msk.f32.vlgmr.msrb.gmra.mxu3 %vm141_vm2, %v1804_v55  ;;  %1762 = vmatpush.msrb.mxu2 %v4267_v54  ;;  %v6864_v30 = vpop.f32.mrf.mxu2 }
 0x2f7   :  { %1831 = vmatpush.msrb.mxu1 %v4304_v56  ;;  %4301 = vmatmul.msk.f32.vlgmr.msrb.gmra.mxu0 %vm141_vm2, %v6580_v5  ;;  %v80_v56 = vld [vmem:[%s8892_s8 + $0xc0] sm:$0xff] }
 0x2f8   :  { %4303 = vmatmul.msk.f32.vlgmr.msrb.gmra.mxu2 %vm141_vm2, %v6580_v5  ;;  %4338 = vmatmul.msk.f32.vlgmr.msrb.gmra.mxu1 %vm141_vm2, %v1804_v55  ;;  %v6779_v5 = vld [vmem:[%s8885_s1 + $0x48] sm:$0xff] }
 0x2f9   :  { %4341 = vmatpush.msk.msra.mxu0 %vm104_vm0, %v4336_v57  ;;  %1900 = vmatpush.msra.mxu2 %v71_v19  ;;  %v77_v19 = vld [vmem:[%s8892_s8 + $0xa8] sm:$0xff] }
 0x2fa   :  { %1920 = vmatpush.msra.mxu1 %v87_v35 }
 0x2fb   :  { %1862 = vmatpush.msra.mxu0 %v4333_v43  ;;  %1901 = vmatpush.msra.mxu2 %v70_v21  ;;  %v58_v21 = vld [vmem:[%s8892_s8 + $0x10] sm:$0xff] }
 0x2fc   :  { %v6866_v32 = vpop.f32.mrf.mxu0  ;;  %v6868_v33 = vpop.f32.mrf.mxu1  ;;  %1921 = vmatpush.msra.mxu1 %v86_v37  ;;  %v75_v37 = vld [vmem:[%s8892_s8 + $0x98] sm:$0xff] }
 0x2fd   :  { %1863 = vmatpush.msra.mxu0 %v4330_v58  ;;  %1902 = vmatpush.msra.mxu2 %v69_v34  ;;  %v6882_v38 = vpop.f32.mrf.mxu3  ;;  %v61_v58 = vld [vmem:[%s8892_s8 + $0x28] sm:$0xff]  ;;  %v76_v34 = vld [vmem:[%s8892_s8 + $0xa0] sm:$0xff] }
 0x2fe   :  { %v6890_v41 = vpop.f32.mrf.mxu2  ;;  %1922 = vmatpush.msra.mxu1 %v85_v40  ;;  %v56_v40 = vld [vmem:[%s8892_s8] sm:$0xff] }
 0x2ff   :  { %1864 = vmatpush.msra.mxu0 %v4327_v59  ;;  %1903 = vmatpush.msra.mxu2 %v68_v36  ;;  %v79_v59 = vld [vmem:[%s8892_s8 + $0xb8] sm:$0xff]  ;;  %v57_v36 = vld [vmem:[%s8892_s8 + $0x8] sm:$0xff] }
 0x300   :  { %1923 = vmatpush.msra.mxu1 %v84_v44  ;;  %v420_v44 = vadd.f32 %v6840_v17, %v6830_v14  ;;  %v440_v14 = vadd.f32 %v6850_v23, %v6842_v18 }
 0x301   :  { %1865 = vmatpush.msra.mxu0 %v4324_v61  ;;  %1904 = vmatpush.msra.mxu2 %v67_v39  ;;  %v60_v61 = vld [vmem:[%s8892_s8 + $0x20] sm:$0xff] }
 0x302   :  { %1924 = vmatpush.msra.mxu1 %v83_v48 }
 0x303   :  { %1866 = vmatpush.msra.mxu0 %v4321_v62  ;;  %1905 = vmatpush.msra.mxu2 %v66_v42  ;;  %v78_v62 = vld [vmem:[%s8892_s8 + $0xb0] sm:$0xff] }
 0x304   :  { %v6898_v45 = vpop.f32.mrf.mxu0  ;;  %v6900_v46 = vpop.f32.mrf.mxu1  ;;  %1925 = vmatpush.msra.mxu1 %v82_v50  ;;  %v74_v42 = vld [vmem:[%s8892_s8 + $0x90] sm:$0xff]  ;;  %v568_v50 = vadd.f32 %v6852_v24, %v420_v44 }
 0x305   :  { %1867 = vmatpush.msra.mxu0 %v4318_v0  ;;  %1906 = vmatpush.msra.mxu2 %v65_v47  ;;  %v6914_v51 = vpop.f32.mrf.mxu3 }
 0x306   :  { %v6922_v54 = vpop.f32.mrf.mxu2  ;;  %1926 = vmatpush.msra.mxu1 %v81_v53  ;;  %v677_v17 = vadd.f32 %v6864_v30, %v568_v50  ;;  %v93_v53 = vld [vmem:[%s8892_s8 + $0x128] sm:$0xf] }
 0x307   :  { %1868 = vmatpush.msra.mxu0 %v4315_v1  ;;  %1907 = vmatpush.msra.mxu2 %v64_v49  ;;  %v73_v49 = vld [vmem:[%s8892_s8 + $0x88] sm:$0xff] }
 0x308   :  { %1927 = vmatpush.msra.mxu1 %v80_v56  ;;  %4343 = vmatpush.msk.msra.mxu3 %vm1896_vm5, %v93_v53  ;;  %v786_v18 = vadd.f32 %v6866_v32, %v677_v17 }
 0x309   :  { %1869 = vmatpush.msra.mxu0 %v4312_v2  ;;  %1908 = vmatpush.msra.mxu2 %v63_v52  ;;  %v72_v52 = vld [vmem:[%s8892_s8 + $0x80] sm:$0xff] }
 0x30a   :  { %1928 = vmatpush.msra.mxu1 %v79_v59 }
 0x30b   :  { %1870 = vmatpush.msra.mxu0 %v4309_v3 }
 0x30c   :  { %v6930_v57 = vpop.f32.mrf.mxu0  ;;  %v6932_v43 = vpop.f32.mrf.mxu1  ;;  %1929 = vmatpush.msra.mxu1 %v78_v62 }
 0x30d   :  { %1871 = vmatpush.msra.mxu0 %v4306_v4  ;;  %v6946_v0 = vpop.f32.mrf.mxu3  ;;  %v59_v4 = vld [vmem:[%s8892_s8 + $0x18] sm:$0xff] }
 0x30e   :  { %4342 = vmatmul.msk.f32.vlgmr.msra.gmra.mxu0 %vm141_vm2, %v1804_v55  ;;  %v62_v55 = vld [vmem:[%s8892_s8 + $0x30] sm:$0xff]  ;;  %v1070_v1 = vpop.f32.mrf.mxu2  ;;  %1930 = vmatpush.msra.mxu1 %v77_v19  ;;  %v460_v19 = vadd.f32 %v6856_v26, %v6832_v15 }
 0x30f   :  { %4350 = vmatpush.msk.msrb.mxu0 %vm104_vm0, %v6772_v63  ;;  %1909 = vmatpush.msra.mxu2 %v62_v55  ;;  %v895_v55 = vadd.f32 %v6882_v38, %v786_v18  ;;  %v91_v38 = vld [vmem:[%s8892_s8 + $0x118] sm:$0xff] }
 0x310   :  { %1931 = vmatpush.msra.mxu1 %v76_v34  ;;  %v4346_v34 = vld [vmem:[%s8884_s0 + $0x18] sm:$0x3] }
 0x311   :  { %2003 = vmatpush.msrb.mxu0 %v6779_v5  ;;  %1910 = vmatpush.msra.mxu2 %v61_v58 }
 0x312   :  { %1932 = vmatpush.msra.mxu1 %v75_v37  ;;  %v570_v37 = vadd.f32 %v6858_v27, %v460_v19  ;;  %v4391_v19 = vld [vmem:[%s8890_s6 + $0x208] sm:$0x3] }
 0x313   :  { %2004 = vmatpush.msrb.mxu0 %v6785_v6  ;;  %1911 = vmatpush.msra.mxu2 %v60_v61 }
 0x314   :  { %1933 = vmatpush.msra.mxu1 %v74_v42  ;;  %v679_v42 = vadd.f32 %v6862_v29, %v570_v37  ;;  %v4383_v37 = vld [vmem:[%s8890_s6 + $0x1c8] sm:$0xff] }
 0x315   :  { %2005 = vmatpush.msrb.mxu0 %v6791_v7  ;;  %v1179_v2 = vpop.f32.mrf.mxu0  ;;  %1912 = vmatpush.msra.mxu2 %v59_v4 }
 0x316   :  { %v6948_v3 = vpop.f32.mrf.mxu1  ;;  %1934 = vmatpush.msra.mxu1 %v73_v49 }
 0x317   :  { %2006 = vmatpush.msrb.mxu0 %v6797_v8  ;;  %1913 = vmatpush.msra.mxu2 %v58_v21 }
 0x318   :  { %1935 = vmatpush.msra.mxu1 %v72_v52 }
 0x319   :  { %2007 = vmatpush.msrb.mxu0 %v6803_v9  ;;  %v1288_v35 = vpop.f32.mrf.mxu3  ;;  %1914 = vmatpush.msra.mxu2 %v57_v36 }
 0x31b   :  { %2008 = vmatpush.msrb.mxu0 %v6809_v10  ;;  %v1199_v39 = vpop.f32.mrf.mxu2  ;;  %1915 = vmatpush.msra.mxu2 %v56_v40 }
 0x31d   :  { %2009 = vmatpush.msrb.mxu0 %v6815_v11  ;;  %4356 = vmatpush.msk.msrb.mxu2 %vm104_vm0, %v6772_v63  ;;  %v92_v63 = vld [vmem:[%s8892_s8 + $0x120] sm:$0xff] }
 0x31e   :  { %1951 = vmatpush.msra.mxu3 %v92_v63 }
 0x31f   :  { %2010 = vmatpush.msrb.mxu0 %v6821_v12  ;;  %2060 = vmatpush.msrb.mxu2 %v6779_v5  ;;  %v569_v5 = vadd.f32 %v6854_v25, %v440_v14  ;;  %v1004_v25 = vadd.f32 %v6900_v46, %v895_v55 }
 0x320   :  { %1952 = vmatpush.msra.mxu3 %v91_v38 }
 0x321   :  { %2011 = vmatpush.msrb.mxu0 %v6827_v13  ;;  %2061 = vmatpush.msrb.mxu2 %v6785_v6  ;;  %v678_v30 = vadd.f32 %v6860_v28, %v569_v5  ;;  %v1113_v59 = vadd.f32 %v1070_v1, %v1004_v25  ;;  %v89_v1 = vld [vmem:[%s8892_s8 + $0x108] sm:$0xff] }
 0x323   :  { %2012 = vmatpush.msrb.mxu0 %v6837_v16  ;;  %2062 = vmatpush.msrb.mxu2 %v6791_v7  ;;  %v787_v6 = vadd.f32 %v6890_v41, %v678_v30  ;;  %v1222_v28 = vadd.f32 %v1179_v2, %v1113_v59  ;;  %v88_v2 = vld [vmem:[%s8892_s8 + $0x100] sm:$0xff] }
 0x325   :  { %2063 = vmatpush.msrb.mxu2 %v6797_v8  ;;  %v896_v32 = vadd.f32 %v6898_v45, %v787_v6  ;;  %v90_v45 = vld [vmem:[%s8892_s8 + $0x110] sm:$0xff]  ;;  %4396 = vmatpush.msk.msra.mxu0 %vm104_vm0, %v4391_v19  ;;  %v2098_v19 = vld [vmem:[%s8890_s6 + $0x98] sm:$0xff] }
 0x326   :  { %1953 = vmatpush.msra.mxu3 %v90_v45 }
 0x327   :  { %2064 = vmatpush.msrb.mxu2 %v6803_v9  ;;  %v1005_v7 = vadd.f32 %v6914_v51, %v896_v32  ;;  %v1331_v9 = vadd.f32 %v1288_v35, %v1222_v28  ;;  %v4345_v35 = vld [vmem:[%s8884_s0 + $0x10] sm:$0xff]  ;;  %s3770_s0 = sshll.u32 %s8894_s10, 4  ;;  %s3771_s0 = int_to_ptr.hbm [resolvable:$true] %s3770_s0 }
 0x328   :  { %1954 = vmatpush.msra.mxu3 %v89_v1 }
 0x329   :  { %2065 = vmatpush.msrb.mxu2 %v6809_v10  ;;  %v1114_v41 = vadd.f32 %v6932_v43, %v1005_v7 }
 0x32a   :  { %1955 = vmatpush.msra.mxu3 %v88_v2  ;;  %v4931_v2 = vld [vmem:[%s8888_s4 + $0x8] sm:$0x7f] }
 0x32b   :  { %2066 = vmatpush.msrb.mxu2 %v6815_v11  ;;  %v1223_v51 = vadd.f32 %v1199_v39, %v1114_v41 }
 0x32c   :  { %4347 = vmatpush.msk.msrb.mxu3 %vm104_vm0, %v4346_v34  ;;  %v4387_v34 = vld [vmem:[%s8890_s6 + $0x1e8] sm:$0xff] }
 0x32d   :  { %v1308_v47 = vpop.f32.mrf.mxu0  ;;  %2067 = vmatpush.msrb.mxu2 %v6821_v12  ;;  %v7032_v12 = vld [vmem:[%s8891_s7] sm:$0x7] }
 0x32e   :  { %v1397_v48 = vpop.f32.mrf.mxu1  ;;  %v1332_v11 = vadd.f32 %v1308_v47, %v1223_v51  ;;  %v1880_v40 = vperm.slane %v7032_v12, 0  ;;  %1983 = vmatpush.msrb.mxu3 %v4345_v35  ;;  %v1881_v52 = vperm.slane %v7032_v12, 1  ;;  %v4388_v35 = vld [vmem:[%s8890_s6 + $0x1f0] sm:$0xff] }
 0x32f   :  { %v1440_v62 = vadd.f32 %v1397_v48, %v1331_v9  ;;  %2068 = vmatpush.msrb.mxu2 %v6827_v13  ;;  %v788_v48 = vadd.f32 %v6868_v33, %v679_v42  ;;  %2204 = vmatpush.msra.mxu0 %v4388_v35  ;;  %v4381_v42 = vld [vmem:[%s8890_s6 + $0x1b8] sm:$0xff] }
 0x331   :  { %v1417_v24 = vpop.f32.mrf.mxu3  ;;  %2069 = vmatpush.msrb.mxu2 %v6837_v16  ;;  %v897_v14 = vadd.f32 %v6922_v54, %v788_v48  ;;  %v4377_v48 = vld [vmem:[%s8890_s6 + $0x198] sm:$0xff] }
 0x332   :  { %v1441_v21 = vadd.f32 %v1417_v24, %v1332_v11 }
 0x333   :  { %v6999_v23 = vpop.f32.mrf.mxu2  ;;  %v1006_v63 = vadd.f32 %v6930_v57, %v897_v14  ;;  %v1882_v57 = vperm.slane %v7032_v12, 2  ;;  %v4374_v14 = vld [vmem:[%s8890_s6 + $0x180] sm:$0xff] }
 0x335   :  { %v1115_v24 = vadd.f32 %v6946_v0, %v1006_v63  ;;  %v2091_v63 = vld [vmem:[%s8890_s6 + $0x60] sm:$0xff] }
 0x337   :  { %v1224_v5 = vadd.f32 %v6948_v3, %v1115_v24  ;;  %v4928_v3 = vld [vmem:[%s8886_s2] sm:$0xff]  ;;  %v4372_v24 = vld [vmem:[%s8890_s6 + $0x170] sm:$0xff] }
 0x339   :  { %v1333_v18 = vadd.f32 %v6999_v23, %v1224_v5  ;;  %v4929_v23 = vld [vmem:[%s8886_s2 + $0x8] sm:$0x7f] }
 0x33a   :  { %v2088_v5 = vld [vmem:[%s8890_s6 + $0x48] sm:$0xff] }
 0x345   :  { %v7004_v56 = vpop.f32.mrf.mxu0 }
 0x346   :  { %v1526_v58 = vpop.f32.mrf.mxu1  ;;  %v1442_v30 = vadd.f32 %v7004_v56, %v1333_v18  ;;  %v94_v56 = vld [vmem:[%s8893_s9] sm:$0x1]  ;;  %v4368_v18 = vld [vmem:[%s8890_s6 + $0x150] sm:$0xff] }
 0x347   :  { %v1550_v39 = vadd.f32 %v1526_v58, %v1441_v21  ;;  %v2106_v21 = vld [vmem:[%s8890_s6 + $0xd8] sm:$0xff] }
 0x349   :  { %v1546_v61 = vpop.f32.mrf.mxu3 }
 0x34a   :  { %v1551_v55 = vadd.f32 %v1546_v61, %v1442_v30  ;;  %v4369_v30 = vld [vmem:[%s8890_s6 + $0x158] sm:$0xff] }
 0x34b   :  { %v1506_v8 = vpop.f32.mrf.mxu2 }
 0x34c   :  { %v1549_v43 = vadd.f32 %v1506_v8, %v1440_v62 }
 0x35d   :  { %v1615_v46 = vpop.f32.mrf.mxu0 }
 0x35e   :  { %v1655_v10 = vpop.f32.mrf.mxu1  ;;  %v1658_v13 = vadd.f32 %v1615_v46, %v1549_v43  ;;  %v4930_v43 = vld [vmem:[%s8888_s4] sm:$0xff] }
 0x35f   :  { %v1660_v58 = vadd.f32 %v1655_v10, %v1551_v55  ;;  %v4370_v55 = vld [vmem:[%s8890_s6 + $0x160] sm:$0xff] }
 0x361   :  { %v1724_v4 = vpop.f32.mrf.mxu3 }
 0x362   :  { %v1767_v16 = vadd.f32 %v1724_v4, %v1658_v13  ;;  %v4390_v4 = vld [vmem:[%s8890_s6 + $0x200] sm:$0x3] }
 0x363   :  { %v1635_v36 = vpop.f32.mrf.mxu2  ;;  %v4386_v13 = vld [vmem:[%s8890_s6 + $0x1e0] sm:$0xff]  ;;  %4394 = vmatpush.msk.msrb.mxu1 %vm104_vm0, %v4390_v4 }
 0x364   :  { %v1659_v44 = vadd.f32 %v1635_v36, %v1550_v39  ;;  %v2103_v36 = vld [vmem:[%s8890_s6 + $0xc0] sm:$0xff]  ;;  %v4384_v39 = vld [vmem:[%s8890_s6 + $0x1d0] sm:$0xff] }
 0x365   :  { %2184 = vmatpush.msrb.mxu1 %v4387_v34  ;;  %v4426_v4 = vld [vmem:[%s8890_s6 + $0x2c0] sm:$0xff] }
 0x366   :  { %v4422_v34 = vld [vmem:[%s8890_s6 + $0x2a0] sm:$0xff] }
 0x367   :  { %2185 = vmatpush.msrb.mxu1 %v4384_v39  ;;  %v4420_v39 = vld [vmem:[%s8890_s6 + $0x290] sm:$0xff] }
 0x369   :  { %2186 = vmatpush.msrb.mxu1 %v4381_v42  ;;  %v4417_v42 = vld [vmem:[%s8890_s6 + $0x278] sm:$0xff] }
 0x374   :  { %v1744_v15 = vpop.f32.mrf.mxu0 }
 0x375   :  { %v1833_v26 = vpop.f32.mrf.mxu1  ;;  %v1768_v49 = vadd.f32 %v1744_v15, %v1659_v44  ;;  %v2100_v15 = vld [vmem:[%s8890_s6 + $0xa8] sm:$0xff]  ;;  %v4382_v44 = vld [vmem:[%s8890_s6 + $0x1c0] sm:$0xff] }
 0x376   :  { %v1876_v47 = vadd.f32 %v1833_v26, %v1767_v16  ;;  %v4385_v16 = vld [vmem:[%s8890_s6 + $0x1d8] sm:$0xff]  ;;  %v4380_v26 = vld [vmem:[%s8890_s6 + $0x1b0] sm:$0xff] }
 0x377   :  { %2205 = vmatpush.msra.mxu0 %v4385_v16  ;;  %v4419_v16 = vld [vmem:[%s8890_s6 + $0x288] sm:$0xff] }
 0x378   :  { %v1886_v50 = vadd.f32 %v1880_v40, %v1876_v47  ;;  %v2097_v47 = vld [vmem:[%s8890_s6 + $0x90] sm:$0xff] }
 0x379   :  { %v1853_v27 = vpop.f32.mrf.mxu3  ;;  %2206 = vmatpush.msra.mxu0 %v4382_v44  ;;  %v4416_v44 = vld [vmem:[%s8890_s6 + $0x270] sm:$0xff] }
 0x37a   :  { %v1889_v17 = vmax.f32 %v1886_v50, 0.0  ;;  %v1877_v53 = vadd.f32 %v1853_v27, %v1768_v49  ;;  %v4378_v49 = vld [vmem:[%s8890_s6 + $0x1a0] sm:$0xff]  ;;  %v4379_v50 = vld [vmem:[%s8890_s6 + $0x1a8] sm:$0xff]  ;;  %v2094_v27 = vld [vmem:[%s8890_s6 + $0x78] sm:$0xff] }
 0x37b   :  { %v1764_v54 = vpop.f32.mrf.mxu2  ;;  %2187 = vmatpush.msrb.mxu1 %v4378_v49  ;;  %2207 = vmatpush.msra.mxu0 %v4379_v50  ;;  %v2090_v49 = vld [vmem:[%s8890_s6 + $0x58] sm:$0xff] }
 0x37c   :  { %v1887_v29 = vadd.f32 %v1881_v52, %v1877_v53  ;;  %1916 = vmatmul.f32.vlgmr.msra.gmra.mxu2 %v1889_v17  ;;  %v1769_v6 = vadd.f32 %v1764_v54, %v1660_v58  ;;  %v4375_v17 = vld [vmem:[%s8890_s6 + $0x188] sm:$0xff]  ;;  %v4376_v53 = vld [vmem:[%s8890_s6 + $0x190] sm:$0xff]  ;;  %v4365_v58 = vld [vmem:[%s8890_s6 + $0x138] sm:$0xff] }
 0x37d   :  { %2188 = vmatpush.msrb.mxu1 %v4375_v17  ;;  %2208 = vmatpush.msra.mxu0 %v4376_v53  ;;  %v2085_v54 = vld [vmem:[%s8890_s6 + $0x30] sm:$0xff]  ;;  %v4413_v50 = vld [vmem:[%s8890_s6 + $0x258] sm:$0xff]  ;;  %v2087_v17 = vld [vmem:[%s8890_s6 + $0x40] sm:$0xff] }
 0x37e   :  { %v1890_v33 = vmax.f32 %v1887_v29, 0.0  ;;  %v4371_v29 = vld [vmem:[%s8890_s6 + $0x168] sm:$0xff]  ;;  %v4410_v53 = vld [vmem:[%s8890_s6 + $0x240] sm:$0xff] }
 0x37f   :  { %2189 = vmatpush.msrb.mxu1 %v4372_v24  ;;  %v2084_v24 = vld [vmem:[%s8890_s6 + $0x28] sm:$0xff] }
 0x380   :  { %1936 = vmatmul.f32.vlgmr.msra.gmra.mxu1 %v1890_v33  ;;  %v4373_v33 = vld [vmem:[%s8890_s6 + $0x178] sm:$0xff] }
 0x381   :  { %2209 = vmatpush.msra.mxu0 %v4373_v33  ;;  %2190 = vmatpush.msrb.mxu1 %v4369_v30  ;;  %v4407_v33 = vld [vmem:[%s8890_s6 + $0x228] sm:$0xff]  ;;  %v2081_v30 = vld [vmem:[%s8890_s6 + $0x10] sm:$0xff] }
 0x383   :  { %2210 = vmatpush.msra.mxu0 %v4370_v55  ;;  %v4404_v55 = vld [vmem:[%s8890_s6 + $0x210] sm:$0xff] }
 0x38b   :  { %v1873_v25 = vpop.f32.mrf.mxu0 }
 0x38c   :  { %v1878_v32 = vadd.f32 %v1873_v25, %v1769_v6  ;;  %v4366_v6 = vld [vmem:[%s8890_s6 + $0x140] sm:$0xff]  ;;  %v4367_v25 = vld [vmem:[%s8890_s6 + $0x148] sm:$0xff] }
 0x38d   :  { %2191 = vmatpush.msrb.mxu1 %v4366_v6  ;;  %2211 = vmatpush.msra.mxu0 %v4367_v25  ;;  %v4475_v25 = vld [vmem:[%s8890_s6 + $0x418] sm:$0x3] }
 0x38e   :  { %v1888_v59 = vadd.f32 %v1882_v57, %v1878_v32  ;;  %v2082_v32 = vld [vmem:[%s8890_s6 + $0x18] sm:$0xff] }
 0x390   :  { %v1891_v0 = vmax.f32 %v1888_v59, 0.0  ;;  %v4362_v59 = vld [vmem:[%s8890_s6 + $0x120] sm:$0xff] }
 0x392   :  { %4344 = vmatmul.msk.f32.vlgmr.msra.gmra.mxu3 %vm1892_vm6, %v1891_v0  ;;  %v4363_v0 = vld [vmem:[%s8890_s6 + $0x128] sm:$0xff] }
 0x393   :  { %2192 = vmatpush.msrb.mxu1 %v4363_v0  ;;  %v4474_v0 = vld [vmem:[%s8890_s6 + $0x410] sm:$0x3] }
 0x39a   :  { %4348 = vmatmul.msk.f32.vlgmr.msrb.gmra.mxu3 %vm97_vm1, %v4928_v3  ;;  %v4364_v3 = vld [vmem:[%s8890_s6 + $0x130] sm:$0xff] }
 0x39b   :  { %2212 = vmatpush.msra.mxu0 %v4364_v3  ;;  %v4472_v3 = vld [vmem:[%s8890_s6 + $0x400] sm:$0xff] }
 0x3a2   :  { %4349 = vmatmul.msk.f32.gmra.mxu3 %vm97_vm1, %v4929_v23  ;;  %v2079_v23 = vld [vmem:[%s8890_s6] sm:$0xff] }
 0x3fd   :  { %v1937_v28 = vpop.f32.mrf.mxu1 }
 0x3ff   :  { %v1917_v61 = vpop.f32.mrf.mxu2 }
 0x400   :  { %v1918_v7 = vadd.f32 %v1917_v61, %v94_v56  ;;  %v4359_v56 = vld [vmem:[%s8890_s6 + $0x108] sm:$0xff]  ;;  %v4360_v61 = vld [vmem:[%s8890_s6 + $0x110] sm:$0xff] }
 0x401   :  { %2193 = vmatpush.msrb.mxu1 %v4360_v61  ;;  %v4471_v61 = vld [vmem:[%s8890_s6 + $0x3f8] sm:$0xff] }
 0x402   :  { %v1938_v38 = vadd.f32 %v1937_v28, %v1918_v7  ;;  %v4361_v7 = vld [vmem:[%s8890_s6 + $0x118] sm:$0xff] }
 0x403   :  { %v2110_v28 = vld [vmem:[%s8890_s6 + $0xf8] sm:$0x3]  ;;  %2213 = vmatpush.msra.mxu0 %v4361_v7  ;;  %v4469_v7 = vld [vmem:[%s8890_s6 + $0x3e8] sm:$0xff] }
 0x415   :  { %v1957_v8 = vpop.f32.mrf.mxu3 }
 0x416   :  { %v1958_v41 = vadd.f32 %v1957_v8, %v1938_v38  ;;  %v2111_v38 = vld [vmem:[%s8890_s6 + $0x100] sm:$0x3] }
 0x417   :  { %v4434_v8 = vld [vmem:[%s8890_s6 + $0x300] sm:$0x3]  ;;  %4402 = vmatpush.msk.msra.mxu1 %vm104_vm0, %v2111_v38  ;;  %v4467_v38 = vld [vmem:[%s8890_s6 + $0x3d8] sm:$0xff] }
 0x418   :  { %1961 = vst.msk [vmem:[#allocation2] sm:$0x1] %vm1960_vm7, %v1958_v41  ;;  %v4435_v41 = vld [vmem:[%s8890_s6 + $0x308] sm:$0x3] }
 0x41d   :  { %v1985_v9 = vpop.f32.mrf.mxu3 }
 0x41e   :  { %4351 = vmatmul.msk.f32.vlgmr.msrb.gmra.mxu0 %vm141_vm2, %v1985_v9  ;;  %v2107_v9 = vld [vmem:[%s8890_s6 + $0xe0] sm:$0xff] }
 0x41f   :  { %4437 = vmatpush.msk.msrb.mxu0 %vm104_vm0, %v4434_v8  ;;  %v4468_v8 = vld [vmem:[%s8890_s6 + $0x3e0] sm:$0xff] }
 0x425   :  { %v1988_v45 = vpop.f32.mrf.mxu3 }
 0x426   :  { %4352 = vmatmul.msk.f32.gmra.mxu0 %vm141_vm2, %v1988_v45 }
 0x49b   :  { %v2014_v46 = vpop.f32.mrf.mxu0 }
 0x49c   :  { %v2015_v51 = vadd.f32 %v2014_v46, %v5114_v22  ;;  %v4389_v22 = vld [vmem:[%s8890_s6 + $0x1f8] sm:$0x3]  ;;  %v2108_v46 = vld [vmem:[%s8890_s6 + $0xe8] sm:$0xff] }
 0x49d   :  { %2275 = vmatpush.msra.mxu1 %v2108_v46 }
 0x49e   :  { %v2020_v11 = vmax.f32 %v2015_v51, 0.0  ;;  %v4432_v51 = vld [vmem:[%s8890_s6 + $0x2f0] sm:$0xff] }
 0x4a3   :  { %v2017_v10 = vpop.f32.mrf.mxu0 }
 0x4a4   :  { %v2018_v62 = vadd.f32 %v2017_v10, %v5112_v20  ;;  %v2109_v20 = vld [vmem:[%s8890_s6 + $0xf0] sm:$0x3]  ;;  %v4431_v10 = vld [vmem:[%s8890_s6 + $0x2e8] sm:$0xff] }
 0x4a5   :  { %4398 = vmatpush.msk.msra.mxu2 %vm104_vm0, %v2109_v20  ;;  %2340 = vmatpush.msrb.mxu0 %v4431_v10  ;;  %v2102_v20 = vld [vmem:[%s8890_s6 + $0xb8] sm:$0xff]  ;;  %v4465_v10 = vld [vmem:[%s8890_s6 + $0x3c8] sm:$0xff] }
 0x4a6   :  { %v2021_v1 = vmax.f32 %v2018_v62, 0.0  ;;  %v2104_v62 = vld [vmem:[%s8890_s6 + $0xc8] sm:$0xff] }
 0x4a7   :  { %2235 = vmatpush.msra.mxu2 %v2106_v21  ;;  %v2099_v21 = vld [vmem:[%s8890_s6 + $0xa0] sm:$0xff] }
 0x4a8   :  { %4353 = vmatpush.msk.msra.mxu3 %vm183_vm3, %v2021_v1  ;;  %v2105_v1 = vld [vmem:[%s8890_s6 + $0xd0] sm:$0xff] }
 0x4a9   :  { %2236 = vmatpush.msra.mxu2 %v2103_v36  ;;  %2276 = vmatpush.msra.mxu1 %v2105_v1  ;;  %v2095_v36 = vld [vmem:[%s8890_s6 + $0x80] sm:$0xff]  ;;  %v4461_v1 = vld [vmem:[%s8890_s6 + $0x3a8] sm:$0xff] }
 0x4aa   :  { %2040 = vmatpush.msra.mxu3 %v2020_v11  ;;  %v4428_v11 = vld [vmem:[%s8890_s6 + $0x2d0] sm:$0xff] }
 0x4ab   :  { %4354 = vmatmul.msk.f32.vlgmr.msra.gmra.mxu3 %vm176_vm4, %v4930_v43  ;;  %2237 = vmatpush.msra.mxu2 %v2100_v15  ;;  %v4429_v43 = vld [vmem:[%s8890_s6 + $0x2d8] sm:$0xff]  ;;  %v2092_v15 = vld [vmem:[%s8890_s6 + $0x68] sm:$0xff] }
 0x4ac   :  { %4392 = vmatpush.msk.msrb.mxu3 %vm104_vm0, %v4389_v22  ;;  %v4425_v22 = vld [vmem:[%s8890_s6 + $0x2b8] sm:$0xff]  ;;  %2341 = vmatpush.msrb.mxu0 %v4428_v11  ;;  %v4462_v11 = vld [vmem:[%s8890_s6 + $0x3b0] sm:$0xff] }
 0x4ad   :  { %2238 = vmatpush.msra.mxu2 %v2097_v47  ;;  %2277 = vmatpush.msra.mxu1 %v2102_v20  ;;  %v4414_v47 = vld [vmem:[%s8890_s6 + $0x260] sm:$0xff]  ;;  %v4458_v20 = vld [vmem:[%s8890_s6 + $0x390] sm:$0xff] }
 0x4ae   :  { %2164 = vmatpush.msrb.mxu3 %v4386_v13  ;;  %2342 = vmatpush.msrb.mxu0 %v4425_v22  ;;  %v4423_v13 = vld [vmem:[%s8890_s6 + $0x2a8] sm:$0xff]  ;;  %v4459_v22 = vld [vmem:[%s8890_s6 + $0x398] sm:$0xff] }
 0x4af   :  { %2239 = vmatpush.msra.mxu2 %v2094_v27  ;;  %2278 = vmatpush.msra.mxu1 %v2099_v21  ;;  %v4411_v27 = vld [vmem:[%s8890_s6 + $0x248] sm:$0xff]  ;;  %v4455_v21 = vld [vmem:[%s8890_s6 + $0x378] sm:$0xff] }
 0x4b0   :  { %2165 = vmatpush.msrb.mxu3 %v4383_v37  ;;  %v2096_v37 = vld [vmem:[%s8890_s6 + $0x88] sm:$0xff]  ;;  %2343 = vmatpush.msrb.mxu0 %v4422_v34  ;;  %v4454_v34 = vld [vmem:[%s8890_s6 + $0x370] sm:$0xff] }
 0x4b1   :  { %2240 = vmatpush.msra.mxu2 %v2091_v63  ;;  %2279 = vmatpush.msra.mxu1 %v2096_v37  ;;  %v4408_v63 = vld [vmem:[%s8890_s6 + $0x230] sm:$0xff]  ;;  %v4453_v37 = vld [vmem:[%s8890_s6 + $0x368] sm:$0xff] }
 0x4b2   :  { %2166 = vmatpush.msrb.mxu3 %v4380_v26  ;;  %v2093_v26 = vld [vmem:[%s8890_s6 + $0x70] sm:$0xff]  ;;  %2344 = vmatpush.msrb.mxu0 %v4419_v16 }
 0x4b3   :  { %4355 = vmatmul.msk.f32.gmra.mxu3 %vm176_vm4, %v4931_v2  ;;  %2241 = vmatpush.msra.mxu2 %v2088_v5  ;;  %v2101_v2 = vld [vmem:[%s8890_s6 + $0xb0] sm:$0xff]  ;;  %v4405_v5 = vld [vmem:[%s8890_s6 + $0x218] sm:$0xff] }
 0x4b4   :  { %2167 = vmatpush.msrb.mxu3 %v4377_v48  ;;  %2280 = vmatpush.msra.mxu1 %v2093_v26  ;;  %v2089_v48 = vld [vmem:[%s8890_s6 + $0x50] sm:$0xff] }
 0x4b5   :  { %2242 = vmatpush.msra.mxu2 %v2085_v54  ;;  %2345 = vmatpush.msrb.mxu0 %v4416_v44  ;;  %v4412_v16 = vld [vmem:[%s8890_s6 + $0x250] sm:$0xff]  ;;  %v4409_v44 = vld [vmem:[%s8890_s6 + $0x238] sm:$0xff] }
 0x4b6   :  { %2168 = vmatpush.msrb.mxu3 %v4374_v14  ;;  %2281 = vmatpush.msra.mxu1 %v2090_v49  ;;  %v2086_v14 = vld [vmem:[%s8890_s6 + $0x38] sm:$0xff]  ;;  %v4450_v26 = vld [vmem:[%s8890_s6 + $0x350] sm:$0xff]  ;;  %v4445_v49 = vld [vmem:[%s8890_s6 + $0x328] sm:$0xff] }
 0x4b7   :  { %2243 = vmatpush.msra.mxu2 %v2082_v32  ;;  %2346 = vmatpush.msrb.mxu0 %v4413_v50  ;;  %v4406_v50 = vld [vmem:[%s8890_s6 + $0x220] sm:$0xff] }
 0x4b8   :  { %2169 = vmatpush.msrb.mxu3 %v4371_v29  ;;  %2282 = vmatpush.msra.mxu1 %v2087_v17  ;;  %v2083_v29 = vld [vmem:[%s8890_s6 + $0x20] sm:$0xff]  ;;  %v4551_v17 = vld [vmem:[%s8890_s6 + $0x618] sm:$0x3] }
 0x4b9   :  { %2244 = vmatpush.msra.mxu2 %v2079_v23  ;;  %2347 = vmatpush.msrb.mxu0 %v4410_v53  ;;  %v4433_v23 = vld [vmem:[%s8890_s6 + $0x2f8] sm:$0xff]  ;;  %v4444_v53 = vld [vmem:[%s8890_s6 + $0x320] sm:$0xff] }
 0x4ba   :  { %2170 = vmatpush.msrb.mxu3 %v4368_v18  ;;  %2283 = vmatpush.msra.mxu1 %v2084_v24  ;;  %v2080_v18 = vld [vmem:[%s8890_s6 + $0x8] sm:$0xff]  ;;  %v4514_v24 = vld [vmem:[%s8890_s6 + $0x520] sm:$0x3] }
 0x4bb   :  { %2348 = vmatpush.msrb.mxu0 %v4407_v33  ;;  %v4548_v33 = vld [vmem:[%s8890_s6 + $0x600] sm:$0xff] }
 0x4bc   :  { %2171 = vmatpush.msrb.mxu3 %v4365_v58  ;;  %2284 = vmatpush.msra.mxu1 %v2081_v30  ;;  %v4511_v30 = vld [vmem:[%s8890_s6 + $0x508] sm:$0xff] }
 0x4bd   :  { %2349 = vmatpush.msrb.mxu0 %v4404_v55  ;;  %v4545_v55 = vld [vmem:[%s8890_s6 + $0x5e8] sm:$0xff] }
 0x4be   :  { %2172 = vmatpush.msrb.mxu3 %v4362_v59  ;;  %v4436_v59 = vld [vmem:[%s8890_s6 + $0x310] sm:$0x3] }
 0x4c0   :  { %2173 = vmatpush.msrb.mxu3 %v4359_v56  ;;  %v4470_v56 = vld [vmem:[%s8890_s6 + $0x3f0] sm:$0xff] }
 0x4c2   :  { %4400 = vmatpush.msk.msra.mxu3 %vm104_vm0, %v2110_v28  ;;  %v4430_v28 = vld [vmem:[%s8890_s6 + $0x2e0] sm:$0xff] }
 0x4c4   :  { %2255 = vmatpush.msra.mxu3 %v2107_v9  ;;  %v4427_v9 = vld [vmem:[%s8890_s6 + $0x2c8] sm:$0xff] }
 0x4c6   :  { %2256 = vmatpush.msra.mxu3 %v2104_v62  ;;  %v4424_v62 = vld [vmem:[%s8890_s6 + $0x2b0] sm:$0xff] }
 0x4c8   :  { %2257 = vmatpush.msra.mxu3 %v2101_v2  ;;  %v4421_v2 = vld [vmem:[%s8890_s6 + $0x298] sm:$0xff] }
 0x4ca   :  { %2258 = vmatpush.msra.mxu3 %v2098_v19  ;;  %v4418_v19 = vld [vmem:[%s8890_s6 + $0x280] sm:$0xff] }
 0x4cc   :  { %2259 = vmatpush.msra.mxu3 %v2095_v36  ;;  %v4452_v36 = vld [vmem:[%s8890_s6 + $0x360] sm:$0xff] }
 0x4ce   :  { %2260 = vmatpush.msra.mxu3 %v2092_v15  ;;  %v4449_v15 = vld [vmem:[%s8890_s6 + $0x348] sm:$0xff] }
 0x4d0   :  { %2261 = vmatpush.msra.mxu3 %v2089_v48  ;;  %v4447_v48 = vld [vmem:[%s8890_s6 + $0x338] sm:$0xff] }
 0x4d2   :  { %2262 = vmatpush.msra.mxu3 %v2086_v14 }
 0x4d4   :  { %2263 = vmatpush.msra.mxu3 %v2083_v29  ;;  %v4513_v29 = vld [vmem:[%s8890_s6 + $0x518] sm:$0x3] }
 0x4d6   :  { %2264 = vmatpush.msra.mxu3 %v2080_v18  ;;  %v4510_v18 = vld [vmem:[%s8890_s6 + $0x500] sm:$0xff] }
 0x52e   :  { %v2042_v45 = vpop.f32.mrf.mxu3 }
 0x52f   :  { %4357 = vmatmul.msk.f32.vlgmr.msrb.gmra.mxu2 %vm141_vm2, %v2042_v45  ;;  %v4464_v45 = vld [vmem:[%s8890_s6 + $0x3c0] sm:$0xff] }
 0x530   :  { %4439 = vmatpush.msk.msrb.mxu2 %vm104_vm0, %v4435_v41  ;;  %v4466_v41 = vld [vmem:[%s8890_s6 + $0x3d0] sm:$0xff] }
 0x532   :  { %2360 = vmatpush.msrb.mxu2 %v4432_v51  ;;  %v4463_v51 = vld [vmem:[%s8890_s6 + $0x3b8] sm:$0xff] }
 0x534   :  { %2361 = vmatpush.msrb.mxu2 %v4429_v43  ;;  %v4460_v43 = vld [vmem:[%s8890_s6 + $0x3a0] sm:$0xff] }
 0x536   :  { %v2045_v35 = vpop.f32.mrf.mxu3  ;;  %2362 = vmatpush.msrb.mxu2 %v4426_v4  ;;  %v4457_v4 = vld [vmem:[%s8890_s6 + $0x388] sm:$0xff] }
 0x537   :  { %4358 = vmatmul.msk.f32.gmra.mxu2 %vm141_vm2, %v2045_v35  ;;  %v4415_v35 = vld [vmem:[%s8890_s6 + $0x268] sm:$0xff] }
 0x538   :  { %2363 = vmatpush.msrb.mxu2 %v4423_v13  ;;  %v4456_v13 = vld [vmem:[%s8890_s6 + $0x380] sm:$0xff] }
 0x53a   :  { %2364 = vmatpush.msrb.mxu2 %v4420_v39  ;;  %v4451_v39 = vld [vmem:[%s8890_s6 + $0x358] sm:$0xff] }
 0x53c   :  { %2365 = vmatpush.msrb.mxu2 %v4417_v42  ;;  %v4448_v42 = vld [vmem:[%s8890_s6 + $0x340] sm:$0xff] }
 0x53e   :  { %2366 = vmatpush.msrb.mxu2 %v4414_v47  ;;  %v4446_v47 = vld [vmem:[%s8890_s6 + $0x330] sm:$0xff] }
 0x540   :  { %2367 = vmatpush.msrb.mxu2 %v4411_v27  ;;  %v4443_v27 = vld [vmem:[%s8890_s6 + $0x318] sm:$0xff] }
 0x542   :  { %2368 = vmatpush.msrb.mxu2 %v4408_v63  ;;  %v4512_v63 = vld [vmem:[%s8890_s6 + $0x510] sm:$0x3] }
 0x544   :  { %2369 = vmatpush.msrb.mxu2 %v4405_v5  ;;  %v4509_v5 = vld [vmem:[%s8890_s6 + $0x4f8] sm:$0xff] }
 0x5b2   :  { %v2071_v54 = vpop.f32.mrf.mxu2 }
 0x5b3   :  { %v2072_v58 = vadd.f32 %v2071_v54, %v5407_v60  ;;  %v4473_v60 = vld [vmem:[%s8890_s6 + $0x408] sm:$0x3]  ;;  %v4506_v54 = vld [vmem:[%s8890_s6 + $0x4e0] sm:$0xff] }
 0x5b5   :  { %v7363_v6 = vmax.f32 %v2072_v58, 0.0  ;;  %v4507_v58 = vld [vmem:[%s8890_s6 + $0x4e8] sm:$0xff] }
 0x5b7   :  { %4399 = vmatmul.msk.f32.vlgmr.msra.gmra.mxu2 %vm141_vm2, %v7363_v6  ;;  %v2146_v32 = vrot.slane %v7363_v6, 1  ;;  %v7421_v46 = vrot.slane %v7363_v6, 2  ;;  %v2430_v14 = vrot.slane %v7363_v6, 3 }
 0x5b8   :  { %4480 = vmatpush.msk.msra.mxu2 %vm104_vm0, %v4475_v25  ;;  %v4508_v25 = vld [vmem:[%s8890_s6 + $0x4f0] sm:$0xff] }
 0x5b9   :  { %4393 = vmatmul.msk.f32.vlgmr.msrb.gmra.mxu3 %vm141_vm2, %v2146_v32  ;;  %4395 = vmatmul.msk.f32.vlgmr.msrb.gmra.mxu1 %vm141_vm2, %v2146_v32 }
 0x5ba   :  { %4397 = vmatmul.msk.f32.vlgmr.msra.gmra.mxu0 %vm141_vm2, %v2146_v32  ;;  %4441 = vmatpush.msk.msrb.mxu3 %vm104_vm0, %v4436_v59  ;;  %v4542_v32 = vld [vmem:[%s8890_s6 + $0x5d0] sm:$0xff]  ;;  %v4503_v59 = vld [vmem:[%s8890_s6 + $0x4c8] sm:$0xff] }
 0x5bb   :  { %4476 = vmatpush.msk.msrb.mxu1 %vm104_vm0, %v4473_v60  ;;  %4478 = vmatpush.msk.msra.mxu0 %vm104_vm0, %v4474_v0  ;;  %v4504_v60 = vld [vmem:[%s8890_s6 + $0x4d0] sm:$0xff]  ;;  %v4505_v0 = vld [vmem:[%s8890_s6 + $0x4d8] sm:$0xff] }
 0x5bc   :  { %2488 = vmatpush.msra.mxu2 %v4472_v3  ;;  %2380 = vmatpush.msrb.mxu3 %v4433_v23  ;;  %v4539_v3 = vld [vmem:[%s8890_s6 + $0x5b8] sm:$0xff]  ;;  %v4500_v23 = vld [vmem:[%s8890_s6 + $0x4b0] sm:$0xff] }
 0x5bd   :  { %2448 = vmatpush.msrb.mxu1 %v4470_v56  ;;  %2468 = vmatpush.msra.mxu0 %v4471_v61  ;;  %v4501_v56 = vld [vmem:[%s8890_s6 + $0x4b8] sm:$0xff]  ;;  %v4502_v61 = vld [vmem:[%s8890_s6 + $0x4c0] sm:$0xff] }
 0x5be   :  { %2489 = vmatpush.msra.mxu2 %v4469_v7  ;;  %2381 = vmatpush.msrb.mxu3 %v4430_v28  ;;  %v4536_v7 = vld [vmem:[%s8890_s6 + $0x5a0] sm:$0xff]  ;;  %v4497_v28 = vld [vmem:[%s8890_s6 + $0x498] sm:$0xff] }
 0x5bf   :  { %2449 = vmatpush.msrb.mxu1 %v4467_v38  ;;  %2469 = vmatpush.msra.mxu0 %v4468_v8  ;;  %v4498_v38 = vld [vmem:[%s8890_s6 + $0x4a0] sm:$0xff]  ;;  %v4499_v8 = vld [vmem:[%s8890_s6 + $0x4a8] sm:$0xff] }
 0x5c0   :  { %2490 = vmatpush.msra.mxu2 %v4466_v41  ;;  %2382 = vmatpush.msrb.mxu3 %v4427_v9  ;;  %v4533_v41 = vld [vmem:[%s8890_s6 + $0x588] sm:$0xff]  ;;  %v4494_v9 = vld [vmem:[%s8890_s6 + $0x480] sm:$0xff] }
 0x5c1   :  { %4440 = vmatmul.msk.f32.vlgmr.msrb.gmra.mxu2 %vm141_vm2, %v7421_v46  ;;  %2450 = vmatpush.msrb.mxu1 %v4464_v45  ;;  %v4495_v45 = vld [vmem:[%s8890_s6 + $0x488] sm:$0xff] }
 0x5c2   :  { %2470 = vmatpush.msra.mxu0 %v4465_v10  ;;  %2491 = vmatpush.msra.mxu2 %v4463_v51  ;;  %v4530_v10 = vld [vmem:[%s8890_s6 + $0x570] sm:$0xff]  ;;  %v4491_v51 = vld [vmem:[%s8890_s6 + $0x468] sm:$0xff] }
 0x5c3   :  { %4401 = vmatmul.msk.f32.vlgmr.msra.gmra.mxu3 %vm141_vm2, %v7363_v6  ;;  %4403 = vmatmul.msk.f32.vlgmr.msra.gmra.mxu1 %vm141_vm2, %v7363_v6 }
 0x5c4   :  { %4438 = vmatmul.msk.f32.vlgmr.msrb.gmra.mxu0 %vm141_vm2, %v7421_v46  ;;  %2383 = vmatpush.msrb.mxu3 %v4424_v62  ;;  %v4492_v62 = vld [vmem:[%s8890_s6 + $0x470] sm:$0xff] }
 0x5c5   :  { %2451 = vmatpush.msrb.mxu1 %v4461_v1  ;;  %2471 = vmatpush.msra.mxu0 %v4462_v11  ;;  %v4493_v1 = vld [vmem:[%s8890_s6 + $0x478] sm:$0xff] }
 0x5c6   :  { %2492 = vmatpush.msra.mxu2 %v4460_v43  ;;  %2384 = vmatpush.msrb.mxu3 %v4421_v2  ;;  %v4527_v11 = vld [vmem:[%s8890_s6 + $0x558] sm:$0xff]  ;;  %v4488_v43 = vld [vmem:[%s8890_s6 + $0x450] sm:$0xff] }
 0x5c7   :  { %2452 = vmatpush.msrb.mxu1 %v4458_v20  ;;  %2472 = vmatpush.msra.mxu0 %v4459_v22  ;;  %v4489_v2 = vld [vmem:[%s8890_s6 + $0x458] sm:$0xff]  ;;  %v4490_v20 = vld [vmem:[%s8890_s6 + $0x460] sm:$0xff] }
 0x5c8   :  { %2493 = vmatpush.msra.mxu2 %v4457_v4  ;;  %2385 = vmatpush.msrb.mxu3 %v4418_v19  ;;  %v4524_v22 = vld [vmem:[%s8890_s6 + $0x540] sm:$0xff]  ;;  %v4485_v4 = vld [vmem:[%s8890_s6 + $0x438] sm:$0xff] }
 0x5c9   :  { %2453 = vmatpush.msrb.mxu1 %v4455_v21  ;;  %2473 = vmatpush.msra.mxu0 %v4456_v13  ;;  %v4486_v19 = vld [vmem:[%s8890_s6 + $0x440] sm:$0xff]  ;;  %v4487_v21 = vld [vmem:[%s8890_s6 + $0x448] sm:$0xff] }
 0x5ca   :  { %2494 = vmatpush.msra.mxu2 %v4454_v34  ;;  %2386 = vmatpush.msrb.mxu3 %v4415_v35  ;;  %v4521_v13 = vld [vmem:[%s8890_s6 + $0x528] sm:$0xff]  ;;  %v4482_v34 = vld [vmem:[%s8890_s6 + $0x420] sm:$0xff] }
 0x5cb   :  { %2454 = vmatpush.msrb.mxu1 %v4452_v36  ;;  %2474 = vmatpush.msra.mxu0 %v4453_v37  ;;  %v4483_v35 = vld [vmem:[%s8890_s6 + $0x428] sm:$0xff]  ;;  %v7658_v36 = vrot.slane %v7363_v6, 5 }
 0x5cc   :  { %2495 = vmatpush.msra.mxu2 %v4451_v39  ;;  %2387 = vmatpush.msrb.mxu3 %v4412_v16  ;;  %v4591_v37 = vld [vmem:[%s8890_s6 + $0x728] sm:$0x3]  ;;  %v4484_v39 = vld [vmem:[%s8890_s6 + $0x430] sm:$0xff]  ;;  %v2538_v16 = vrot.slane %v7363_v6, 4 }
 0x5cd   :  { %2455 = vmatpush.msrb.mxu1 %v4449_v15  ;;  %2475 = vmatpush.msra.mxu0 %v4450_v26  ;;  %v4552_v15 = vld [vmem:[%s8890_s6 + $0x620] sm:$0x3]  ;;  %v4553_v26 = vld [vmem:[%s8890_s6 + $0x628] sm:$0x3] }
 0x5ce   :  { %2496 = vmatpush.msra.mxu2 %v4448_v42  ;;  %2388 = vmatpush.msrb.mxu3 %v4409_v44  ;;  %v4590_v42 = vld [vmem:[%s8890_s6 + $0x720] sm:$0x3]  ;;  %v4588_v44 = vld [vmem:[%s8890_s6 + $0x710] sm:$0xff] }
 0x5cf   :  { %2456 = vmatpush.msrb.mxu1 %v4446_v47  ;;  %2476 = vmatpush.msra.mxu0 %v4447_v48  ;;  %v4549_v47 = vld [vmem:[%s8890_s6 + $0x608] sm:$0xff]  ;;  %v4550_v48 = vld [vmem:[%s8890_s6 + $0x610] sm:$0xff] }
 0x5d0   :  { %2497 = vmatpush.msra.mxu2 %v4445_v49  ;;  %2389 = vmatpush.msrb.mxu3 %v4406_v50  ;;  %v4587_v49 = vld [vmem:[%s8890_s6 + $0x708] sm:$0xff]  ;;  %v4585_v50 = vld [vmem:[%s8890_s6 + $0x6f8] sm:$0xff] }
 0x5d1   :  { %4481 = vmatmul.msk.f32.vlgmr.msra.gmra.mxu2 %vm141_vm2, %v2430_v14  ;;  %2457 = vmatpush.msrb.mxu1 %v4443_v27  ;;  %v4546_v27 = vld [vmem:[%s8890_s6 + $0x5f0] sm:$0xff] }
 0x5d2   :  { %4554 = vmatpush.msk.msrb.mxu2 %vm104_vm0, %v4551_v17  ;;  %2477 = vmatpush.msra.mxu0 %v4444_v53  ;;  %v4584_v17 = vld [vmem:[%s8890_s6 + $0x6f0] sm:$0xff]  ;;  %v4582_v53 = vld [vmem:[%s8890_s6 + $0x6e0] sm:$0xff] }
 0x5d3   :  { %4442 = vmatmul.msk.f32.vlgmr.msrb.gmra.mxu3 %vm141_vm2, %v7421_v46  ;;  %4477 = vmatmul.msk.f32.vlgmr.msrb.gmra.mxu1 %vm141_vm2, %v2430_v14  ;;  %v4496_v46 = vld [vmem:[%s8890_s6 + $0x490] sm:$0xff] }
 0x5d4   :  { %4479 = vmatmul.msk.f32.vlgmr.msra.gmra.mxu0 %vm141_vm2, %v2430_v14  ;;  %4515 = vmatpush.msk.msra.mxu3 %vm104_vm0, %v4512_v63  ;;  %v4547_v14 = vld [vmem:[%s8890_s6 + $0x5f8] sm:$0xff] }
 0x5d5   :  { %4517 = vmatpush.msk.msra.mxu1 %vm104_vm0, %v4513_v29  ;;  %4519 = vmatpush.msk.msrb.mxu0 %vm104_vm0, %v4514_v24  ;;  %v4543_v63 = vld [vmem:[%s8890_s6 + $0x5d8] sm:$0xff]  ;;  %v4544_v29 = vld [vmem:[%s8890_s6 + $0x5e0] sm:$0xff] }
 0x5d6   :  { %2664 = vmatpush.msrb.mxu2 %v4548_v33  ;;  %2556 = vmatpush.msra.mxu3 %v4509_v5  ;;  %v4581_v24 = vld [vmem:[%s8890_s6 + $0x6d8] sm:$0xff]  ;;  %v4579_v33 = vld [vmem:[%s8890_s6 + $0x6c8] sm:$0xff]  ;;  %v4540_v5 = vld [vmem:[%s8890_s6 + $0x5c0] sm:$0xff] }
 0x5d7   :  { %2576 = vmatpush.msra.mxu1 %v4510_v18  ;;  %2596 = vmatpush.msrb.mxu0 %v4511_v30  ;;  %v4541_v18 = vld [vmem:[%s8890_s6 + $0x5c8] sm:$0xff]  ;;  %v4578_v30 = vld [vmem:[%s8890_s6 + $0x6c0] sm:$0xff] }
 0x5d8   :  { %2665 = vmatpush.msrb.mxu2 %v4545_v55  ;;  %2557 = vmatpush.msra.mxu3 %v4506_v54  ;;  %v4576_v55 = vld [vmem:[%s8890_s6 + $0x6b0] sm:$0xff]  ;;  %v4537_v54 = vld [vmem:[%s8890_s6 + $0x5a8] sm:$0xff] }
 0x5d9   :  { %2577 = vmatpush.msra.mxu1 %v4507_v58  ;;  %2597 = vmatpush.msrb.mxu0 %v4508_v25  ;;  %v4538_v58 = vld [vmem:[%s8890_s6 + $0x5b0] sm:$0xff]  ;;  %v4575_v25 = vld [vmem:[%s8890_s6 + $0x6a8] sm:$0xff] }
 0x5da   :  { %2666 = vmatpush.msrb.mxu2 %v4542_v32  ;;  %2558 = vmatpush.msra.mxu3 %v4503_v59  ;;  %v4573_v32 = vld [vmem:[%s8890_s6 + $0x698] sm:$0xff]  ;;  %v4534_v59 = vld [vmem:[%s8890_s6 + $0x590] sm:$0xff] }
 0x5db   :  { %2578 = vmatpush.msra.mxu1 %v4504_v60  ;;  %2598 = vmatpush.msrb.mxu0 %v4505_v0  ;;  %v4535_v60 = vld [vmem:[%s8890_s6 + $0x598] sm:$0xff]  ;;  %v4572_v0 = vld [vmem:[%s8890_s6 + $0x690] sm:$0xff] }
 0x5dc   :  { %2667 = vmatpush.msrb.mxu2 %v4539_v3  ;;  %2559 = vmatpush.msra.mxu3 %v4500_v23  ;;  %v4570_v3 = vld [vmem:[%s8890_s6 + $0x680] sm:$0xff]  ;;  %v4531_v23 = vld [vmem:[%s8890_s6 + $0x578] sm:$0xff] }
 0x5dd   :  { %2579 = vmatpush.msra.mxu1 %v4501_v56  ;;  %2599 = vmatpush.msrb.mxu0 %v4502_v61  ;;  %v4532_v56 = vld [vmem:[%s8890_s6 + $0x580] sm:$0xff]  ;;  %v4569_v61 = vld [vmem:[%s8890_s6 + $0x678] sm:$0xff] }
 0x5de   :  { %2668 = vmatpush.msrb.mxu2 %v4536_v7  ;;  %2560 = vmatpush.msra.mxu3 %v4497_v28  ;;  %v4567_v7 = vld [vmem:[%s8890_s6 + $0x668] sm:$0xff]  ;;  %v4528_v28 = vld [vmem:[%s8890_s6 + $0x560] sm:$0xff] }
 0x5df   :  { %2580 = vmatpush.msra.mxu1 %v4498_v38  ;;  %2600 = vmatpush.msrb.mxu0 %v4499_v8  ;;  %v4529_v38 = vld [vmem:[%s8890_s6 + $0x568] sm:$0xff]  ;;  %v4566_v8 = vld [vmem:[%s8890_s6 + $0x660] sm:$0xff] }
 0x5e0   :  { %2669 = vmatpush.msrb.mxu2 %v4533_v41  ;;  %2561 = vmatpush.msra.mxu3 %v4494_v9  ;;  %v4564_v41 = vld [vmem:[%s8890_s6 + $0x650] sm:$0xff]  ;;  %v4525_v9 = vld [vmem:[%s8890_s6 + $0x548] sm:$0xff] }
 0x5e1   :  { %2581 = vmatpush.msra.mxu1 %v4495_v45  ;;  %2601 = vmatpush.msrb.mxu0 %v4496_v46  ;;  %v4526_v45 = vld [vmem:[%s8890_s6 + $0x550] sm:$0xff]  ;;  %v4563_v46 = vld [vmem:[%s8890_s6 + $0x648] sm:$0xff] }
 0x5e2   :  { %2670 = vmatpush.msrb.mxu2 %v4530_v10  ;;  %2562 = vmatpush.msra.mxu3 %v4491_v51  ;;  %v4561_v10 = vld [vmem:[%s8890_s6 + $0x638] sm:$0xff]  ;;  %v4522_v51 = vld [vmem:[%s8890_s6 + $0x530] sm:$0xff] }
 0x5e3   :  { %2582 = vmatpush.msra.mxu1 %v4492_v62  ;;  %2602 = vmatpush.msrb.mxu0 %v4493_v1  ;;  %v4523_v62 = vld [vmem:[%s8890_s6 + $0x538] sm:$0xff]  ;;  %v7803_v1 = vrot.slane %v7363_v6, 6 }
 0x5e4   :  { %2671 = vmatpush.msrb.mxu2 %v4527_v11  ;;  %2563 = vmatpush.msra.mxu3 %v4488_v43  ;;  %v4631_v11 = vld [vmem:[%s8890_s6 + $0x838] sm:$0x3]  ;;  %v4560_v43 = vld [vmem:[%s8890_s6 + $0x630] sm:$0xff] }
 0x5e5   :  { %2583 = vmatpush.msra.mxu1 %v4489_v2  ;;  %2603 = vmatpush.msrb.mxu0 %v4490_v20  ;;  %v4592_v2 = vld [vmem:[%s8890_s6 + $0x730] sm:$0x3]  ;;  %v4629_v20 = vld [vmem:[%s8890_s6 + $0x828] sm:$0x3] }
 0x5e6   :  { %2672 = vmatpush.msrb.mxu2 %v4524_v22  ;;  %2564 = vmatpush.msra.mxu3 %v4485_v4  ;;  %v4630_v22 = vld [vmem:[%s8890_s6 + $0x830] sm:$0x3]  ;;  %v4628_v4 = vld [vmem:[%s8890_s6 + $0x820] sm:$0xff] }
 0x5e7   :  { %2584 = vmatpush.msra.mxu1 %v4486_v19  ;;  %2604 = vmatpush.msrb.mxu0 %v4487_v21  ;;  %v4589_v19 = vld [vmem:[%s8890_s6 + $0x718] sm:$0xff]  ;;  %v4626_v21 = vld [vmem:[%s8890_s6 + $0x810] sm:$0xff] }
 0x5e8   :  { %2673 = vmatpush.msrb.mxu2 %v4521_v13  ;;  %2565 = vmatpush.msra.mxu3 %v4482_v34  ;;  %v4627_v13 = vld [vmem:[%s8890_s6 + $0x818] sm:$0xff]  ;;  %v4625_v34 = vld [vmem:[%s8890_s6 + $0x808] sm:$0xff] }
 0x5e9   :  { %4555 = vmatmul.msk.f32.vlgmr.msrb.gmra.mxu2 %vm141_vm2, %v7658_v36  ;;  %2585 = vmatpush.msra.mxu1 %v4483_v35  ;;  %v4586_v35 = vld [vmem:[%s8890_s6 + $0x700] sm:$0xff] }
 0x5ea   :  { %4595 = vmatpush.msk.msra.mxu2 %vm104_vm0, %v4591_v37  ;;  %2605 = vmatpush.msrb.mxu0 %v4484_v39  ;;  %v4624_v37 = vld [vmem:[%s8890_s6 + $0x800] sm:$0xff]  ;;  %v4622_v39 = vld [vmem:[%s8890_s6 + $0x7f0] sm:$0xff] }
 0x5eb   :  { %4516 = vmatmul.msk.f32.vlgmr.msra.gmra.mxu3 %vm141_vm2, %v2538_v16  ;;  %4518 = vmatmul.msk.f32.vlgmr.msra.gmra.mxu1 %vm141_vm2, %v2538_v16 }
 0x5ec   :  { %4520 = vmatmul.msk.f32.vlgmr.msrb.gmra.mxu0 %vm141_vm2, %v2538_v16  ;;  %4556 = vmatpush.msk.msrb.mxu3 %vm104_vm0, %v4552_v15  ;;  %v4583_v16 = vld [vmem:[%s8890_s6 + $0x6e8] sm:$0xff]  ;;  %v4620_v15 = vld [vmem:[%s8890_s6 + $0x7e0] sm:$0xff] }
 0x5ed   :  { %4558 = vmatpush.msk.msrb.mxu1 %vm104_vm0, %v4553_v26  ;;  %4593 = vmatpush.msk.msra.mxu0 %vm104_vm0, %v4590_v42  ;;  %v4621_v26 = vld [vmem:[%s8890_s6 + $0x7e8] sm:$0xff]  ;;  %v4619_v42 = vld [vmem:[%s8890_s6 + $0x7d8] sm:$0xff] }
 0x5ee   :  { %2792 = vmatpush.msra.mxu2 %v4588_v44  ;;  %2684 = vmatpush.msrb.mxu3 %v4549_v47  ;;  %v4580_v44 = vld [vmem:[%s8890_s6 + $0x6d0] sm:$0xff]  ;;  %v4617_v47 = vld [vmem:[%s8890_s6 + $0x7c8] sm:$0xff] }
 0x5ef   :  { %2704 = vmatpush.msrb.mxu1 %v4550_v48  ;;  %2772 = vmatpush.msra.mxu0 %v4587_v49  ;;  %v4618_v48 = vld [vmem:[%s8890_s6 + $0x7d0] sm:$0xff]  ;;  %v4616_v49 = vld [vmem:[%s8890_s6 + $0x7c0] sm:$0xff] }
 0x5f0   :  { %2793 = vmatpush.msra.mxu2 %v4585_v50  ;;  %2685 = vmatpush.msrb.mxu3 %v4546_v27  ;;  %v4577_v50 = vld [vmem:[%s8890_s6 + $0x6b8] sm:$0xff]  ;;  %v4614_v27 = vld [vmem:[%s8890_s6 + $0x7b0] sm:$0xff] }
 0x5f1   :  { %2705 = vmatpush.msrb.mxu1 %v4547_v14  ;;  %2773 = vmatpush.msra.mxu0 %v4584_v17  ;;  %v4615_v14 = vld [vmem:[%s8890_s6 + $0x7b8] sm:$0xff]  ;;  %v4613_v17 = vld [vmem:[%s8890_s6 + $0x7a8] sm:$0xff] }
 0x5f2   :  { %2794 = vmatpush.msra.mxu2 %v4582_v53  ;;  %2686 = vmatpush.msrb.mxu3 %v4543_v63  ;;  %v4574_v53 = vld [vmem:[%s8890_s6 + $0x6a0] sm:$0xff]  ;;  %v4611_v63 = vld [vmem:[%s8890_s6 + $0x798] sm:$0xff] }
 0x5f3   :  { %2706 = vmatpush.msrb.mxu1 %v4544_v29  ;;  %2774 = vmatpush.msra.mxu0 %v4581_v24  ;;  %v4612_v29 = vld [vmem:[%s8890_s6 + $0x7a0] sm:$0xff]  ;;  %v4610_v24 = vld [vmem:[%s8890_s6 + $0x790] sm:$0xff] }
 0x5f4   :  { %2795 = vmatpush.msra.mxu2 %v4579_v33  ;;  %2687 = vmatpush.msrb.mxu3 %v4540_v5  ;;  %v4571_v33 = vld [vmem:[%s8890_s6 + $0x688] sm:$0xff]  ;;  %v4608_v5 = vld [vmem:[%s8890_s6 + $0x780] sm:$0xff] }
 0x5f5   :  { %2707 = vmatpush.msrb.mxu1 %v4541_v18  ;;  %2775 = vmatpush.msra.mxu0 %v4578_v30  ;;  %v4609_v18 = vld [vmem:[%s8890_s6 + $0x788] sm:$0xff]  ;;  %v4607_v30 = vld [vmem:[%s8890_s6 + $0x778] sm:$0xff] }
 0x5f6   :  { %2796 = vmatpush.msra.mxu2 %v4576_v55  ;;  %2688 = vmatpush.msrb.mxu3 %v4537_v54  ;;  %v4568_v55 = vld [vmem:[%s8890_s6 + $0x670] sm:$0xff]  ;;  %v4605_v54 = vld [vmem:[%s8890_s6 + $0x768] sm:$0xff] }
 0x5f7   :  { %2708 = vmatpush.msrb.mxu1 %v4538_v58  ;;  %2776 = vmatpush.msra.mxu0 %v4575_v25  ;;  %v4606_v58 = vld [vmem:[%s8890_s6 + $0x770] sm:$0xff]  ;;  %v4604_v25 = vld [vmem:[%s8890_s6 + $0x760] sm:$0xff] }
 0x5f8   :  { %2797 = vmatpush.msra.mxu2 %v4573_v32  ;;  %2689 = vmatpush.msrb.mxu3 %v4534_v59  ;;  %v4565_v32 = vld [vmem:[%s8890_s6 + $0x658] sm:$0xff]  ;;  %v4602_v59 = vld [vmem:[%s8890_s6 + $0x750] sm:$0xff] }
 0x5f9   :  { %2709 = vmatpush.msrb.mxu1 %v4535_v60  ;;  %2777 = vmatpush.msra.mxu0 %v4572_v0  ;;  %v4603_v60 = vld [vmem:[%s8890_s6 + $0x758] sm:$0xff]  ;;  %v4601_v0 = vld [vmem:[%s8890_s6 + $0x748] sm:$0xff] }
 0x5fa   :  { %2798 = vmatpush.msra.mxu2 %v4570_v3  ;;  %2690 = vmatpush.msrb.mxu3 %v4531_v23  ;;  %v4562_v3 = vld [vmem:[%s8890_s6 + $0x640] sm:$0xff]  ;;  %v4599_v23 = vld [vmem:[%s8890_s6 + $0x738] sm:$0xff] }
 0x5fb   :  { %2710 = vmatpush.msrb.mxu1 %v4532_v56  ;;  %2778 = vmatpush.msra.mxu0 %v4569_v61  ;;  %v2862_v56 = vrot.slane %v7363_v6, 7  ;;  %v4707_v61 = vld [vmem:[%s8890_s6 + $0xa38] sm:$0x3] }
 0x5fc   :  { %2799 = vmatpush.msra.mxu2 %v4567_v7  ;;  %2691 = vmatpush.msrb.mxu3 %v4528_v28  ;;  %v4600_v7 = vld [vmem:[%s8890_s6 + $0x740] sm:$0xff]  ;;  %v4668_v28 = vld [vmem:[%s8890_s6 + $0x930] sm:$0x3]  ;;  %v4669_v6 = vld [vmem:[%s8890_s6 + $0x938] sm:$0x3] }
 0x5fd   :  { %2711 = vmatpush.msrb.mxu1 %v4529_v38  ;;  %2779 = vmatpush.msra.mxu0 %v4566_v8  ;;  %v4670_v38 = vld [vmem:[%s8890_s6 + $0x940] sm:$0x3] }
 0x5fe   :  { %2800 = vmatpush.msra.mxu2 %v4564_v41  ;;  %2692 = vmatpush.msrb.mxu3 %v4525_v9  ;;  %v4704_v8 = vld [vmem:[%s8890_s6 + $0xa20] sm:$0xff]  ;;  %v4665_v41 = vld [vmem:[%s8890_s6 + $0x918] sm:$0xff] }
 0x5ff   :  { %2712 = vmatpush.msrb.mxu1 %v4526_v45  ;;  %2780 = vmatpush.msra.mxu0 %v4563_v46  ;;  %v4666_v9 = vld [vmem:[%s8890_s6 + $0x920] sm:$0xff]  ;;  %v4667_v45 = vld [vmem:[%s8890_s6 + $0x928] sm:$0xff] }
 0x600   :  { %2801 = vmatpush.msra.mxu2 %v4561_v10  ;;  %2693 = vmatpush.msrb.mxu3 %v4522_v51  ;;  %v4701_v46 = vld [vmem:[%s8890_s6 + $0xa08] sm:$0xff]  ;;  %v4662_v10 = vld [vmem:[%s8890_s6 + $0x900] sm:$0xff] }
 0x601   :  { %4596 = vmatmul.msk.f32.vlgmr.msra.gmra.mxu2 %vm141_vm2, %v7803_v1  ;;  %2713 = vmatpush.msrb.mxu1 %v4523_v62  ;;  %v4663_v51 = vld [vmem:[%s8890_s6 + $0x908] sm:$0xff]  ;;  %v4664_v62 = vld [vmem:[%s8890_s6 + $0x910] sm:$0xff] }
 0x602   :  { %4636 = vmatpush.msk.msrb.mxu2 %vm104_vm0, %v4631_v11  ;;  %2781 = vmatpush.msra.mxu0 %v4560_v43  ;;  %v4659_v11 = vld [vmem:[%s8890_s6 + $0x8e8] sm:$0xff]  ;;  %v4660_v43 = vld [vmem:[%s8890_s6 + $0x8f0] sm:$0xff] }
 0x603   :  { %4557 = vmatmul.msk.f32.vlgmr.msrb.gmra.mxu3 %vm141_vm2, %v7658_v36  ;;  %4559 = vmatmul.msk.f32.vlgmr.msrb.gmra.mxu1 %vm141_vm2, %v7658_v36  ;;  %v4623_v36 = vld [vmem:[%s8890_s6 + $0x7f8] sm:$0xff] }
 0x604   :  { %4594 = vmatmul.msk.f32.vlgmr.msra.gmra.mxu0 %vm141_vm2, %v7803_v1  ;;  %4597 = vmatpush.msk.msra.mxu3 %vm104_vm0, %v4592_v2  ;;  %v4661_v2 = vld [vmem:[%s8890_s6 + $0x8f8] sm:$0xff] }
 0x605   :  { %4632 = vmatpush.msk.msra.mxu1 %vm104_vm0, %v4629_v20  ;;  %4634 = vmatpush.msk.msrb.mxu0 %vm104_vm0, %v4630_v22  ;;  %v4695_v20 = vld [vmem:[%s8890_s6 + $0x9d8] sm:$0xff]  ;;  %v4656_v22 = vld [vmem:[%s8890_s6 + $0x8d0] sm:$0xff] }
 0x606   :  { %2920 = vmatpush.msrb.mxu2 %v4628_v4  ;;  %2812 = vmatpush.msra.mxu3 %v4589_v19  ;;  %v4657_v4 = vld [vmem:[%s8890_s6 + $0x8d8] sm:$0xff]  ;;  %v4658_v19 = vld [vmem:[%s8890_s6 + $0x8e0] sm:$0xff] }
 0x607   :  { %2880 = vmatpush.msra.mxu1 %v4626_v21  ;;  %2900 = vmatpush.msrb.mxu0 %v4627_v13  ;;  %v4692_v21 = vld [vmem:[%s8890_s6 + $0x9c0] sm:$0xff]  ;;  %v4653_v13 = vld [vmem:[%s8890_s6 + $0x8b8] sm:$0xff] }
 0x608   :  { %2921 = vmatpush.msrb.mxu2 %v4625_v34  ;;  %2813 = vmatpush.msra.mxu3 %v4586_v35  ;;  %v2074_v34 = vpop.f32.mrf.mxu2  ;;  %v4654_v35 = vld [vmem:[%s8890_s6 + $0x8c0] sm:$0xff] }
 0x609   :  { %2881 = vmatpush.msra.mxu1 %v4623_v36  ;;  %2901 = vmatpush.msrb.mxu0 %v4624_v37  ;;  %v4655_v36 = vld [vmem:[%s8890_s6 + $0x8c8] sm:$0xff] }
 0x60a   :  { %2922 = vmatpush.msrb.mxu2 %v4622_v39  ;;  %2814 = vmatpush.msra.mxu3 %v4583_v16  ;;  %v4689_v37 = vld [vmem:[%s8890_s6 + $0x9a8] sm:$0xff]  ;;  %v4650_v39 = vld [vmem:[%s8890_s6 + $0x8a0] sm:$0xff] }
 0x60b   :  { %2882 = vmatpush.msra.mxu1 %v4620_v15  ;;  %2902 = vmatpush.msrb.mxu0 %v4621_v26  ;;  %v4651_v16 = vld [vmem:[%s8890_s6 + $0x8a8] sm:$0xff]  ;;  %v4652_v15 = vld [vmem:[%s8890_s6 + $0x8b0] sm:$0xff]  ;;  %v2075_v26 = vadd.f32 %v2074_v34, %v6087_v31  ;;  %v4649_v31 = vld [vmem:[%s8890_s6 + $0x898] sm:$0xff] }
 0x60c   :  { %2923 = vmatpush.msrb.mxu2 %v4619_v42  ;;  %2815 = vmatpush.msra.mxu3 %v4580_v44  ;;  %v4686_v42 = vld [vmem:[%s8890_s6 + $0x990] sm:$0xff]  ;;  %v4647_v44 = vld [vmem:[%s8890_s6 + $0x888] sm:$0xff] }
 0x60d   :  { %2883 = vmatpush.msra.mxu1 %v4617_v47  ;;  %2903 = vmatpush.msrb.mxu0 %v4618_v48  ;;  %v4648_v47 = vld [vmem:[%s8890_s6 + $0x890] sm:$0xff]  ;;  %v4683_v48 = vld [vmem:[%s8890_s6 + $0x978] sm:$0xff] }
 0x60e   :  { %2924 = vmatpush.msrb.mxu2 %v4616_v49  ;;  %2816 = vmatpush.msra.mxu3 %v4577_v50  ;;  %v4644_v49 = vld [vmem:[%s8890_s6 + $0x870] sm:$0xff]  ;;  %v4645_v50 = vld [vmem:[%s8890_s6 + $0x878] sm:$0xff] }
 0x60f   :  { %2884 = vmatpush.msra.mxu1 %v4614_v27  ;;  %2904 = vmatpush.msrb.mxu0 %v4615_v14  ;;  %v4646_v27 = vld [vmem:[%s8890_s6 + $0x880] sm:$0xff]  ;;  %v8071_v14 = vmax.f32 %v2075_v26, 0.0  ;;  %v4681_v26 = vld [vmem:[%s8890_s6 + $0x968] sm:$0xff] }
 0x610   :  { %2925 = vmatpush.msrb.mxu2 %v4613_v17  ;;  %2817 = vmatpush.msra.mxu3 %v4574_v53  ;;  %v4680_v17 = vld [vmem:[%s8890_s6 + $0x960] sm:$0xff]  ;;  %v4641_v53 = vld [vmem:[%s8890_s6 + $0x858] sm:$0xff] }
 0x611   :  { %2885 = vmatpush.msra.mxu1 %v4611_v63  ;;  %2905 = vmatpush.msrb.mxu0 %v4612_v29  ;;  %v4642_v63 = vld [vmem:[%s8890_s6 + $0x860] sm:$0xff]  ;;  %v4643_v29 = vld [vmem:[%s8890_s6 + $0x868] sm:$0xff] }
 0x612   :  { %2926 = vmatpush.msrb.mxu2 %v4610_v24  ;;  %2818 = vmatpush.msra.mxu3 %v4571_v33  ;;  %v4677_v24 = vld [vmem:[%s8890_s6 + $0x948] sm:$0xff]  ;;  %v4638_v33 = vld [vmem:[%s8890_s6 + $0x840] sm:$0xff] }
 0x613   :  { %2886 = vmatpush.msra.mxu1 %v4608_v5  ;;  %2906 = vmatpush.msrb.mxu0 %v4609_v18  ;;  %v4639_v5 = vld [vmem:[%s8890_s6 + $0x848] sm:$0xff]  ;;  %v8095_v18 = vrot.slane %v8071_v14, 1 }
 0x614   :  { %2927 = vmatpush.msrb.mxu2 %v4607_v30  ;;  %2819 = vmatpush.msra.mxu3 %v4568_v55  ;;  %v4747_v30 = vld [vmem:[%s8890_s6 + $0xb48] sm:$0x3]  ;;  %v4640_v55 = vld [vmem:[%s8890_s6 + $0x850] sm:$0xff] }
 0x615   :  { %2887 = vmatpush.msra.mxu1 %v4605_v54  ;;  %2907 = vmatpush.msrb.mxu0 %v4606_v58  ;;  %v4708_v54 = vld [vmem:[%s8890_s6 + $0xa40] sm:$0x3]  ;;  %v4709_v58 = vld [vmem:[%s8890_s6 + $0xa48] sm:$0x3] }
 0x616   :  { %2928 = vmatpush.msrb.mxu2 %v4604_v25  ;;  %2820 = vmatpush.msra.mxu3 %v4565_v32  ;;  %v4746_v25 = vld [vmem:[%s8890_s6 + $0xb40] sm:$0x3]  ;;  %v4744_v32 = vld [vmem:[%s8890_s6 + $0xb30] sm:$0xff] }
 0x617   :  { %2888 = vmatpush.msra.mxu1 %v4602_v59  ;;  %2908 = vmatpush.msrb.mxu0 %v4603_v60  ;;  %v4705_v59 = vld [vmem:[%s8890_s6 + $0xa28] sm:$0xff]  ;;  %v4706_v60 = vld [vmem:[%s8890_s6 + $0xa30] sm:$0xff] }
 0x618   :  { %2929 = vmatpush.msrb.mxu2 %v4601_v0  ;;  %2821 = vmatpush.msra.mxu3 %v4562_v3  ;;  %v4743_v0 = vld [vmem:[%s8890_s6 + $0xb28] sm:$0xff]  ;;  %v4741_v3 = vld [vmem:[%s8890_s6 + $0xb18] sm:$0xff] }
 0x619   :  { %4637 = vmatmul.msk.f32.vlgmr.msrb.gmra.mxu2 %vm141_vm2, %v2862_v56  ;;  %2889 = vmatpush.msra.mxu1 %v4599_v23  ;;  %v4702_v23 = vld [vmem:[%s8890_s6 + $0xa10] sm:$0xff] }
 0x61a   :  { %4710 = vmatpush.msk.msra.mxu2 %vm104_vm0, %v4707_v61  ;;  %2909 = vmatpush.msrb.mxu0 %v4600_v7  ;;  %v4740_v61 = vld [vmem:[%s8890_s6 + $0xb10] sm:$0xff] }
 0x61b   :  { %4598 = vmatmul.msk.f32.vlgmr.msra.gmra.mxu3 %vm141_vm2, %v7803_v1  ;;  %4633 = vmatmul.msk.f32.vlgmr.msra.gmra.mxu1 %vm141_vm2, %v2862_v56  ;;  %v4698_v1 = vld [vmem:[%s8890_s6 + $0x9f0] sm:$0xff] }
 0x61c   :  { %4635 = vmatmul.msk.f32.vlgmr.msrb.gmra.mxu0 %vm141_vm2, %v2862_v56  ;;  %4671 = vmatpush.msk.msrb.mxu3 %vm104_vm0, %v4668_v28  ;;  %v4703_v56 = vld [vmem:[%s8890_s6 + $0xa18] sm:$0xff]  ;;  %v4738_v28 = vld [vmem:[%s8890_s6 + $0xb00] sm:$0xff] }
 0x61d   :  { %4673 = vmatpush.msk.msrb.mxu1 %vm104_vm0, %v4669_v6  ;;  %4675 = vmatpush.msk.msra.mxu0 %vm104_vm0, %v4670_v38  ;;  %v4699_v6 = vld [vmem:[%s8890_s6 + $0x9f8] sm:$0xff]  ;;  %v4700_v38 = vld [vmem:[%s8890_s6 + $0xa00] sm:$0xff] }
 0x61e   :  { %3096 = vmatpush.msra.mxu2 %v4704_v8  ;;  %2988 = vmatpush.msrb.mxu3 %v4665_v41  ;;  %v4737_v8 = vld [vmem:[%s8890_s6 + $0xaf8] sm:$0xff]  ;;  %v4735_v41 = vld [vmem:[%s8890_s6 + $0xae8] sm:$0xff] }
 0x61f   :  { %3008 = vmatpush.msrb.mxu1 %v4666_v9  ;;  %3028 = vmatpush.msra.mxu0 %v4667_v45  ;;  %v4696_v9 = vld [vmem:[%s8890_s6 + $0x9e0] sm:$0xff]  ;;  %v4697_v45 = vld [vmem:[%s8890_s6 + $0x9e8] sm:$0xff] }
 0x620   :  { %3097 = vmatpush.msra.mxu2 %v4701_v46  ;;  %2989 = vmatpush.msrb.mxu3 %v4662_v10  ;;  %v4734_v46 = vld [vmem:[%s8890_s6 + $0xae0] sm:$0xff]  ;;  %v4732_v10 = vld [vmem:[%s8890_s6 + $0xad0] sm:$0xff] }
 0x621   :  { %3009 = vmatpush.msrb.mxu1 %v4663_v51  ;;  %3029 = vmatpush.msra.mxu0 %v4664_v62  ;;  %v4693_v51 = vld [vmem:[%s8890_s6 + $0x9c8] sm:$0xff]  ;;  %v4694_v62 = vld [vmem:[%s8890_s6 + $0x9d0] sm:$0xff] }
 0x622   :  { %3098 = vmatpush.msra.mxu2 %v4698_v1  ;;  %2990 = vmatpush.msrb.mxu3 %v4659_v11  ;;  %v4731_v1 = vld [vmem:[%s8890_s6 + $0xac8] sm:$0xff]  ;;  %v4729_v11 = vld [vmem:[%s8890_s6 + $0xab8] sm:$0xff] }
 0x623   :  { %3010 = vmatpush.msrb.mxu1 %v4660_v43  ;;  %3030 = vmatpush.msra.mxu0 %v4661_v2  ;;  %v4690_v43 = vld [vmem:[%s8890_s6 + $0x9b0] sm:$0xff]  ;;  %v4691_v2 = vld [vmem:[%s8890_s6 + $0x9b8] sm:$0xff] }
 0x624   :  { %3099 = vmatpush.msra.mxu2 %v4695_v20  ;;  %2991 = vmatpush.msrb.mxu3 %v4656_v22  ;;  %v4728_v20 = vld [vmem:[%s8890_s6 + $0xab0] sm:$0xff]  ;;  %v4726_v22 = vld [vmem:[%s8890_s6 + $0xaa0] sm:$0xff] }
 0x625   :  { %3011 = vmatpush.msrb.mxu1 %v4657_v4  ;;  %3031 = vmatpush.msra.mxu0 %v4658_v19  ;;  %v4687_v4 = vld [vmem:[%s8890_s6 + $0x998] sm:$0xff]  ;;  %v4688_v19 = vld [vmem:[%s8890_s6 + $0x9a0] sm:$0xff] }
 0x626   :  { %3100 = vmatpush.msra.mxu2 %v4692_v21  ;;  %2992 = vmatpush.msrb.mxu3 %v4653_v13  ;;  %v4725_v21 = vld [vmem:[%s8890_s6 + $0xa98] sm:$0xff] }
 0x627   :  { %3012 = vmatpush.msrb.mxu1 %v4654_v35  ;;  %3032 = vmatpush.msra.mxu0 %v4655_v36  ;;  %v4723_v35 = vld [vmem:[%s8890_s6 + $0xa88] sm:$0xff]  ;;  %v4684_v36 = vld [vmem:[%s8890_s6 + $0x980] sm:$0xff] }
 0x628   :  { %3101 = vmatpush.msra.mxu2 %v4689_v37  ;;  %2993 = vmatpush.msrb.mxu3 %v4650_v39  ;;  %v4685_v39 = vld [vmem:[%s8890_s6 + $0x988] sm:$0xff] }
 0x629   :  { %3013 = vmatpush.msrb.mxu1 %v4651_v16  ;;  %3033 = vmatpush.msra.mxu0 %v4652_v15  ;;  %v4722_v16 = vld [vmem:[%s8890_s6 + $0xa80] sm:$0xff]  ;;  %v4720_v15 = vld [vmem:[%s8890_s6 + $0xa70] sm:$0xff] }
 0x62a   :  { %3102 = vmatpush.msra.mxu2 %v4686_v42  ;;  %2994 = vmatpush.msrb.mxu3 %v4647_v44  ;;  %v4682_v42 = vld [vmem:[%s8890_s6 + $0x970] sm:$0xff]  ;;  %v4719_v44 = vld [vmem:[%s8890_s6 + $0xa68] sm:$0xff] }
 0x62b   :  { %3014 = vmatpush.msrb.mxu1 %v4648_v47  ;;  %3034 = vmatpush.msra.mxu0 %v4649_v31  ;;  %v4717_v31 = vld [vmem:[%s8890_s6 + $0xa58] sm:$0xff] }
 0x62c   :  { %3103 = vmatpush.msra.mxu2 %v4683_v48  ;;  %2995 = vmatpush.msrb.mxu3 %v4644_v49  ;;  %v4678_v48 = vld [vmem:[%s8890_s6 + $0x950] sm:$0xff]  ;;  %v4679_v49 = vld [vmem:[%s8890_s6 + $0x958] sm:$0xff] }
 0x62d   :  { %3015 = vmatpush.msrb.mxu1 %v4645_v50  ;;  %3035 = vmatpush.msra.mxu0 %v4646_v27  ;;  %v8250_v27 = vrot.slane %v8071_v14, 2 }
 0x62e   :  { %3104 = vmatpush.msra.mxu2 %v4680_v17  ;;  %2996 = vmatpush.msrb.mxu3 %v4641_v53  ;;  %v4787_v17 = vld [vmem:[%s8890_s6 + $0xc58] sm:$0x3]  ;;  %v4716_v53 = vld [vmem:[%s8890_s6 + $0xa50] sm:$0xff] }
 0x62f   :  { %3016 = vmatpush.msrb.mxu1 %v4642_v63  ;;  %3036 = vmatpush.msra.mxu0 %v4643_v29  ;;  %v4748_v63 = vld [vmem:[%s8890_s6 + $0xb50] sm:$0x3]  ;;  %v4785_v29 = vld [vmem:[%s8890_s6 + $0xc48] sm:$0x3] }
 0x630   :  { %3105 = vmatpush.msra.mxu2 %v4677_v24  ;;  %2997 = vmatpush.msrb.mxu3 %v4638_v33  ;;  %v4786_v24 = vld [vmem:[%s8890_s6 + $0xc50] sm:$0x3]  ;;  %v4784_v33 = vld [vmem:[%s8890_s6 + $0xc40] sm:$0xff] }
 0x631   :  { %4711 = vmatmul.msk.f32.vlgmr.msra.gmra.mxu2 %vm141_vm2, %v8095_v18  ;;  %3017 = vmatpush.msrb.mxu1 %v4639_v5  ;;  %v4745_v5 = vld [vmem:[%s8890_s6 + $0xb38] sm:$0xff] }
 0x632   :  { %4751 = vmatpush.msk.msrb.mxu2 %vm104_vm0, %v4747_v30  ;;  %3037 = vmatpush.msra.mxu0 %v4640_v55  ;;  %v4782_v30 = vld [vmem:[%s8890_s6 + $0xc30] sm:$0xff]  ;;  %v4781_v55 = vld [vmem:[%s8890_s6 + $0xc28] sm:$0xff] }
 0x633   :  { %4672 = vmatmul.msk.f32.vlgmr.msrb.gmra.mxu3 %vm141_vm2, %v8071_v14  ;;  %4674 = vmatmul.msk.f32.vlgmr.msrb.gmra.mxu1 %vm141_vm2, %v8071_v14 }
 0x634   :  { %4676 = vmatmul.msk.f32.vlgmr.msra.gmra.mxu0 %vm141_vm2, %v8071_v14  ;;  %4712 = vmatpush.msk.msra.mxu3 %vm104_vm0, %v4708_v54  ;;  %v4742_v54 = vld [vmem:[%s8890_s6 + $0xb20] sm:$0xff] }
 0x635   :  { %4714 = vmatpush.msk.msra.mxu1 %vm104_vm0, %v4709_v58  ;;  %4749 = vmatpush.msk.msrb.mxu0 %vm104_vm0, %v4746_v25  ;;  %v4779_v58 = vld [vmem:[%s8890_s6 + $0xc18] sm:$0xff]  ;;  %v4780_v25 = vld [vmem:[%s8890_s6 + $0xc20] sm:$0xff] }
 0x636   :  { %3224 = vmatpush.msrb.mxu2 %v4744_v32  ;;  %3116 = vmatpush.msra.mxu3 %v4705_v59  ;;  %v8148_v7 = vpop.f32.mrf.mxu1  ;;  %v4778_v59 = vld [vmem:[%s8890_s6 + $0xc10] sm:$0xff] }
 0x637   :  { %3136 = vmatpush.msra.mxu1 %v4706_v60  ;;  %3204 = vmatpush.msrb.mxu0 %v4743_v0  ;;  %v2215_v13 = vpop.f32.mrf.mxu0  ;;  %v4739_v60 = vld [vmem:[%s8890_s6 + $0xb08] sm:$0xff]  ;;  %v4776_v0 = vld [vmem:[%s8890_s6 + $0xc00] sm:$0xff] }
 0x638   :  { %3225 = vmatpush.msrb.mxu2 %v4741_v3  ;;  %3117 = vmatpush.msra.mxu3 %v4702_v23  ;;  %v4777_v3 = vld [vmem:[%s8890_s6 + $0xc08] sm:$0xff] }
 0x639   :  { %3137 = vmatpush.msra.mxu1 %v4703_v56  ;;  %3205 = vmatpush.msrb.mxu0 %v4740_v61  ;;  %v4775_v56 = vld [vmem:[%s8890_s6 + $0xbf8] sm:$0xff]  ;;  %v4736_v61 = vld [vmem:[%s8890_s6 + $0xaf0] sm:$0xff] }
 0x63a   :  { %3226 = vmatpush.msrb.mxu2 %v4738_v28  ;;  %3118 = vmatpush.msra.mxu3 %v4699_v6  ;;  %v8247_v50 = vpop.f32.mrf.mxu2  ;;  %v4773_v28 = vld [vmem:[%s8890_s6 + $0xbe8] sm:$0xff]  ;;  %v4774_v6 = vld [vmem:[%s8890_s6 + $0xbf0] sm:$0xff] }
 0x63b   :  { %3138 = vmatpush.msra.mxu1 %v4700_v38  ;;  %3206 = vmatpush.msrb.mxu0 %v4737_v8  ;;  %v4772_v38 = vld [vmem:[%s8890_s6 + $0xbe0] sm:$0xff]  ;;  %v4733_v8 = vld [vmem:[%s8890_s6 + $0xad8] sm:$0xff] }
 0x63c   :  { %3227 = vmatpush.msrb.mxu2 %v4735_v41  ;;  %3119 = vmatpush.msra.mxu3 %v4696_v9  ;;  %v8236_v47 = vpop.f32.mrf.mxu3  ;;  %v4770_v41 = vld [vmem:[%s8890_s6 + $0xbd0] sm:$0xff]  ;;  %v4771_v9 = vld [vmem:[%s8890_s6 + $0xbd8] sm:$0xff] }
 0x63d   :  { %3139 = vmatpush.msra.mxu1 %v4697_v45  ;;  %3207 = vmatpush.msrb.mxu0 %v4734_v46  ;;  %v4769_v45 = vld [vmem:[%s8890_s6 + $0xbc8] sm:$0xff]  ;;  %v4730_v46 = vld [vmem:[%s8890_s6 + $0xac0] sm:$0xff] }
 0x63e   :  { %3228 = vmatpush.msrb.mxu2 %v4732_v10  ;;  %3120 = vmatpush.msra.mxu3 %v4693_v51  ;;  %v4767_v10 = vld [vmem:[%s8890_s6 + $0xbb8] sm:$0xff]  ;;  %v4768_v51 = vld [vmem:[%s8890_s6 + $0xbc0] sm:$0xff] }
 0x63f   :  { %3140 = vmatpush.msra.mxu1 %v4694_v62  ;;  %3208 = vmatpush.msrb.mxu0 %v4731_v1  ;;  %v4766_v1 = vld [vmem:[%s8890_s6 + $0xbb0] sm:$0xff] }
 0x640   :  { %3229 = vmatpush.msrb.mxu2 %v4729_v11  ;;  %3121 = vmatpush.msra.mxu3 %v4690_v43  ;;  %v2286_v34 = vpop.f32.mrf.mxu1  ;;  %v4727_v11 = vld [vmem:[%s8890_s6 + $0xaa8] sm:$0xff] }
 0x641   :  { %3141 = vmatpush.msra.mxu1 %v4691_v2  ;;  %3209 = vmatpush.msrb.mxu0 %v4728_v20  ;;  %v8216_v37 = vadd.f32 %v2286_v34, %v2215_v13  ;;  %v4764_v2 = vld [vmem:[%s8890_s6 + $0xba0] sm:$0xff]  ;;  %v4765_v20 = vld [vmem:[%s8890_s6 + $0xba8] sm:$0xff] }
 0x642   :  { %3230 = vmatpush.msrb.mxu2 %v4726_v22  ;;  %3122 = vmatpush.msra.mxu3 %v4687_v4  ;;  %v8368_v4 = vpop.f32.mrf.mxu0  ;;  %v4761_v34 = vld [vmem:[%s8890_s6 + $0xb88] sm:$0xff] }
 0x643   :  { %3142 = vmatpush.msra.mxu1 %v4688_v19  ;;  %3210 = vmatpush.msrb.mxu0 %v4725_v21  ;;  %v4763_v19 = vld [vmem:[%s8890_s6 + $0xb98] sm:$0xff]  ;;  %v4724_v21 = vld [vmem:[%s8890_s6 + $0xa90] sm:$0xff] }
 0x644   :  { %3231 = vmatpush.msrb.mxu2 %v4723_v35  ;;  %3123 = vmatpush.msra.mxu3 %v4684_v36  ;;  %v8317_v23 = vpop.f32.mrf.mxu2  ;;  %v4762_v35 = vld [vmem:[%s8890_s6 + $0xb90] sm:$0xff]  ;;  %v4760_v36 = vld [vmem:[%s8890_s6 + $0xb80] sm:$0xff] }
 0x645   :  { %3143 = vmatpush.msra.mxu1 %v4685_v39  ;;  %3211 = vmatpush.msrb.mxu0 %v4722_v16  ;;  %v4758_v39 = vld [vmem:[%s8890_s6 + $0xb70] sm:$0xff]  ;;  %v4759_v16 = vld [vmem:[%s8890_s6 + $0xb78] sm:$0xff] }
 0x646   :  { %3232 = vmatpush.msrb.mxu2 %v4720_v15  ;;  %3124 = vmatpush.msra.mxu3 %v4681_v26  ;;  %v8303_v32 = vpop.f32.mrf.mxu3  ;;  %v4757_v15 = vld [vmem:[%s8890_s6 + $0xb68] sm:$0xff]  ;;  %v4718_v26 = vld [vmem:[%s8890_s6 + $0xa60] sm:$0xff] }
 0x647   :  { %3144 = vmatpush.msra.mxu1 %v4682_v42  ;;  %3212 = vmatpush.msrb.mxu0 %v4719_v44  ;;  %v4755_v42 = vld [vmem:[%s8890_s6 + $0xb58] sm:$0xff]  ;;  %v3294_v44 = vrot.slane %v8071_v14, 3 }
 0x648   :  { %3233 = vmatpush.msrb.mxu2 %v4717_v31  ;;  %3125 = vmatpush.msra.mxu3 %v4678_v48  ;;  %v4863_v31 = vld [vmem:[%s8890_s6 + $0xe58] sm:$0x3]  ;;  %v4756_v48 = vld [vmem:[%s8890_s6 + $0xb60] sm:$0xff] }
 0x649   :  { %4752 = vmatmul.msk.f32.vlgmr.msrb.gmra.mxu2 %vm141_vm2, %v8250_v27  ;;  %3145 = vmatpush.msra.mxu1 %v4679_v49 }
 0x64a   :  { %4792 = vmatpush.msk.msra.mxu2 %vm104_vm0, %v4787_v17  ;;  %3213 = vmatpush.msrb.mxu0 %v4716_v53  ;;  %v4824_v17 = vld [vmem:[%s8890_s6 + $0xd50] sm:$0x3]  ;;  %v4825_v53 = vld [vmem:[%s8890_s6 + $0xd58] sm:$0x3] }
 0x64b   :  { %4713 = vmatmul.msk.f32.vlgmr.msra.gmra.mxu3 %vm141_vm2, %v8095_v18  ;;  %4715 = vmatmul.msk.f32.vlgmr.msra.gmra.mxu1 %vm141_vm2, %v8095_v18  ;;  %v4783_v18 = vld [vmem:[%s8890_s6 + $0xc38] sm:$0xff] }
 0x64c   :  { %4750 = vmatmul.msk.f32.vlgmr.msrb.gmra.mxu0 %vm141_vm2, %v8250_v27  ;;  %4753 = vmatpush.msk.msrb.mxu3 %vm104_vm0, %v4748_v63  ;;  %v4826_v63 = vld [vmem:[%s8890_s6 + $0xd60] sm:$0x3] }
 0x64d   :  { %4788 = vmatpush.msk.msrb.mxu1 %vm104_vm0, %v4785_v29  ;;  %4790 = vmatpush.msk.msra.mxu0 %vm104_vm0, %v4786_v24  ;;  %v4860_v29 = vld [vmem:[%s8890_s6 + $0xe40] sm:$0xff]  ;;  %v4821_v24 = vld [vmem:[%s8890_s6 + $0xd38] sm:$0xff] }
 0x64e   :  { %3352 = vmatpush.msra.mxu2 %v4784_v33  ;;  %3244 = vmatpush.msrb.mxu3 %v4745_v5  ;;  %v4822_v33 = vld [vmem:[%s8890_s6 + $0xd40] sm:$0xff]  ;;  %v4857_v5 = vld [vmem:[%s8890_s6 + $0xe28] sm:$0xff] }
 0x64f   :  { %3312 = vmatpush.msrb.mxu1 %v4782_v30  ;;  %3332 = vmatpush.msra.mxu0 %v4783_v18  ;;  %v4818_v30 = vld [vmem:[%s8890_s6 + $0xd20] sm:$0xff]  ;;  %v4819_v18 = vld [vmem:[%s8890_s6 + $0xd28] sm:$0xff] }
 0x650   :  { %3353 = vmatpush.msra.mxu2 %v4781_v55  ;;  %3245 = vmatpush.msrb.mxu3 %v4742_v54  ;;  %v4820_v55 = vld [vmem:[%s8890_s6 + $0xd30] sm:$0xff] }
 0x651   :  { %3313 = vmatpush.msrb.mxu1 %v4779_v58  ;;  %3333 = vmatpush.msra.mxu0 %v4780_v25  ;;  %v8413_v49 = vpop.f32.mrf.mxu0  ;;  %v4854_v54 = vld [vmem:[%s8890_s6 + $0xe10] sm:$0xff]  ;;  %v4815_v58 = vld [vmem:[%s8890_s6 + $0xd08] sm:$0xff] }
 0x652   :  { %3354 = vmatpush.msra.mxu2 %v4778_v59  ;;  %3246 = vmatpush.msrb.mxu3 %v4739_v60  ;;  %v4816_v25 = vld [vmem:[%s8890_s6 + $0xd10] sm:$0xff]  ;;  %v4817_v59 = vld [vmem:[%s8890_s6 + $0xd18] sm:$0xff] }
 0x653   :  { %3314 = vmatpush.msrb.mxu1 %v4776_v0  ;;  %3334 = vmatpush.msra.mxu0 %v4777_v3  ;;  %v4851_v60 = vld [vmem:[%s8890_s6 + $0xdf8] sm:$0xff]  ;;  %v4812_v0 = vld [vmem:[%s8890_s6 + $0xcf0] sm:$0xff] }
 0x654   :  { %3355 = vmatpush.msra.mxu2 %v4775_v56  ;;  %3247 = vmatpush.msrb.mxu3 %v4736_v61  ;;  %v2499_v22 = vpop.f32.mrf.mxu2  ;;  %v4813_v56 = vld [vmem:[%s8890_s6 + $0xcf8] sm:$0xff]  ;;  %v4814_v61 = vld [vmem:[%s8890_s6 + $0xd00] sm:$0xff] }
 0x655   :  { %3315 = vmatpush.msrb.mxu1 %v4773_v28  ;;  %3335 = vmatpush.msra.mxu0 %v4774_v6  ;;  %v4848_v6 = vld [vmem:[%s8890_s6 + $0xde0] sm:$0xff] }
 0x656   :  { %3356 = vmatpush.msra.mxu2 %v4772_v38  ;;  %3248 = vmatpush.msrb.mxu3 %v4733_v8  ;;  %v2391_v62 = vpop.f32.mrf.mxu3  ;;  %v4809_v38 = vld [vmem:[%s8890_s6 + $0xcd8] sm:$0xff]  ;;  %v4810_v8 = vld [vmem:[%s8890_s6 + $0xce0] sm:$0xff] }
 0x657   :  { %3316 = vmatpush.msrb.mxu1 %v4770_v41  ;;  %3336 = vmatpush.msra.mxu0 %v4771_v9  ;;  %v2396_v43 = vadd.f32 %v2391_v62, %v8216_v37  ;;  %v4721_v37 = vld [vmem:[%s8890_s6 + $0xa78] sm:$0xff]  ;;  %v4811_v41 = vld [vmem:[%s8890_s6 + $0xce8] sm:$0xff] }
 0x658   :  { %3357 = vmatpush.msra.mxu2 %v4769_v45  ;;  %3249 = vmatpush.msrb.mxu3 %v4730_v46  ;;  %v4845_v9 = vld [vmem:[%s8890_s6 + $0xdc8] sm:$0xff]  ;;  %v4806_v45 = vld [vmem:[%s8890_s6 + $0xcc0] sm:$0xff] }
 0x659   :  { %3317 = vmatpush.msrb.mxu1 %v4767_v10  ;;  %3337 = vmatpush.msra.mxu0 %v4768_v51  ;;  %v8376_v13 = vadd.f32 %v2499_v22, %v2396_v43  ;;  %v4807_v46 = vld [vmem:[%s8890_s6 + $0xcc8] sm:$0xff]  ;;  %v4808_v10 = vld [vmem:[%s8890_s6 + $0xcd0] sm:$0xff]  ;;  %v4839_v43 = vld [vmem:[%s8890_s6 + $0xd98] sm:$0xff] }
 0x65a   :  { %3358 = vmatpush.msra.mxu2 %v4766_v1  ;;  %3250 = vmatpush.msrb.mxu3 %v4727_v11  ;;  %v4842_v51 = vld [vmem:[%s8890_s6 + $0xdb0] sm:$0xff]  ;;  %v4803_v62 = vld [vmem:[%s8890_s6 + $0xca8] sm:$0xff]  ;;  %v4805_v11 = vld [vmem:[%s8890_s6 + $0xcb8] sm:$0xff] }
 0x65b   :  { %3318 = vmatpush.msrb.mxu1 %v4764_v2  ;;  %3338 = vmatpush.msra.mxu0 %v4765_v20  ;;  %v4804_v1 = vld [vmem:[%s8890_s6 + $0xcb0] sm:$0xff]  ;;  %v4801_v20 = vld [vmem:[%s8890_s6 + $0xc98] sm:$0xff]  ;;  %v4802_v22 = vld [vmem:[%s8890_s6 + $0xca0] sm:$0xff] }
 0x65c   :  { %3359 = vmatpush.msra.mxu2 %v4763_v19  ;;  %3251 = vmatpush.msrb.mxu3 %v4724_v21  ;;  %v4800_v2 = vld [vmem:[%s8890_s6 + $0xc90] sm:$0xff]  ;;  %v4836_v19 = vld [vmem:[%s8890_s6 + $0xd80] sm:$0xff]  ;;  %v4797_v21 = vld [vmem:[%s8890_s6 + $0xc78] sm:$0xff] }
 0x65d   :  { %3319 = vmatpush.msrb.mxu1 %v4761_v34  ;;  %3339 = vmatpush.msra.mxu0 %v4762_v35  ;;  %v4799_v34 = vld [vmem:[%s8890_s6 + $0xc88] sm:$0xff] }
 0x65e   :  { %3360 = vmatpush.msra.mxu2 %v4760_v36  ;;  %3252 = vmatpush.msrb.mxu3 %v4721_v37  ;;  %v4833_v35 = vld [vmem:[%s8890_s6 + $0xd68] sm:$0xff]  ;;  %v4794_v36 = vld [vmem:[%s8890_s6 + $0xc60] sm:$0xff] }
 0x65f   :  { %3320 = vmatpush.msrb.mxu1 %v4758_v39  ;;  %3340 = vmatpush.msra.mxu0 %v4759_v16  ;;  %v4795_v37 = vld [vmem:[%s8890_s6 + $0xc68] sm:$0xff]  ;;  %v8553_v39 = vrot.slane %v8071_v14, 5 }
 0x660   :  { %3361 = vmatpush.msra.mxu2 %v4757_v15  ;;  %3253 = vmatpush.msrb.mxu3 %v4718_v26  ;;  %v4903_v16 = vld [vmem:[%s8890_s6 + $0xf68] sm:$0x3]  ;;  %v4796_v15 = vld [vmem:[%s8890_s6 + $0xc70] sm:$0xff]  ;;  %v3402_v26 = vrot.slane %v8071_v14, 4 }
 0x661   :  { %4793 = vmatmul.msk.f32.vlgmr.msra.gmra.mxu2 %vm141_vm2, %v3294_v44  ;;  %3321 = vmatpush.msrb.mxu1 %v4755_v42  ;;  %v4864_v42 = vld [vmem:[%s8890_s6 + $0xe60] sm:$0x3] }
 0x662   :  { %4866 = vmatpush.msk.msrb.mxu2 %vm104_vm0, %v4863_v31  ;;  %3341 = vmatpush.msra.mxu0 %v4756_v48  ;;  %v4902_v31 = vld [vmem:[%s8890_s6 + $0xf60] sm:$0x3]  ;;  %v4900_v48 = vld [vmem:[%s8890_s6 + $0xf50] sm:$0xff] }
 0x663   :  { %4754 = vmatmul.msk.f32.vlgmr.msrb.gmra.mxu3 %vm141_vm2, %v8250_v27  ;;  %4789 = vmatmul.msk.f32.vlgmr.msrb.gmra.mxu1 %vm141_vm2, %v3294_v44  ;;  %v4823_v27 = vld [vmem:[%s8890_s6 + $0xd48] sm:$0xff] }
 0x664   :  { %4791 = vmatmul.msk.f32.vlgmr.msra.gmra.mxu0 %vm141_vm2, %v3294_v44  ;;  %4827 = vmatpush.msk.msra.mxu3 %vm104_vm0, %v4824_v17  ;;  %v4865_v44 = vld [vmem:[%s8890_s6 + $0xe68] sm:$0x3] }
 0x665   :  { %4829 = vmatpush.msk.msra.mxu1 %vm104_vm0, %v4825_v53  ;;  %4831 = vmatpush.msk.msrb.mxu0 %vm104_vm0, %v4826_v63  ;;  %v4861_v17 = vld [vmem:[%s8890_s6 + $0xe48] sm:$0xff]  ;;  %v4862_v53 = vld [vmem:[%s8890_s6 + $0xe50] sm:$0xff] }
 0x666   :  { %3528 = vmatpush.msrb.mxu2 %v4860_v29  ;;  %3420 = vmatpush.msra.mxu3 %v4821_v24  ;;  %v4899_v63 = vld [vmem:[%s8890_s6 + $0xf48] sm:$0xff]  ;;  %v4897_v29 = vld [vmem:[%s8890_s6 + $0xf38] sm:$0xff]  ;;  %v4858_v24 = vld [vmem:[%s8890_s6 + $0xe30] sm:$0xff] }
 0x667   :  { %3440 = vmatpush.msra.mxu1 %v4822_v33  ;;  %3460 = vmatpush.msrb.mxu0 %v4823_v27  ;;  %v4859_v33 = vld [vmem:[%s8890_s6 + $0xe38] sm:$0xff]  ;;  %v4896_v27 = vld [vmem:[%s8890_s6 + $0xf30] sm:$0xff] }
 0x668   :  { %3529 = vmatpush.msrb.mxu2 %v4857_v5  ;;  %3421 = vmatpush.msra.mxu3 %v4818_v30  ;;  %v4894_v5 = vld [vmem:[%s8890_s6 + $0xf20] sm:$0xff]  ;;  %v4855_v30 = vld [vmem:[%s8890_s6 + $0xe18] sm:$0xff] }
 0x669   :  { %3441 = vmatpush.msra.mxu1 %v4819_v18  ;;  %3461 = vmatpush.msrb.mxu0 %v4820_v55  ;;  %v2607_v3 = vpop.f32.mrf.mxu0  ;;  %v4856_v18 = vld [vmem:[%s8890_s6 + $0xe20] sm:$0xff]  ;;  %v4893_v55 = vld [vmem:[%s8890_s6 + $0xf18] sm:$0xff] }
 0x66a   :  { %3530 = vmatpush.msrb.mxu2 %v4854_v54  ;;  %3422 = vmatpush.msra.mxu3 %v4815_v58  ;;  %v8481_v28 = vadd.f32 %v2607_v3, %v8376_v13  ;;  %v4798_v13 = vld [vmem:[%s8890_s6 + $0xc80] sm:$0xff]  ;;  %v4891_v54 = vld [vmem:[%s8890_s6 + $0xf08] sm:$0xff]  ;;  %v4850_v3 = vld [vmem:[%s8890_s6 + $0xdf0] sm:$0xff] }
 0x66b   :  { %3442 = vmatpush.msra.mxu1 %v4816_v25  ;;  %3462 = vmatpush.msrb.mxu0 %v4817_v59  ;;  %v4852_v58 = vld [vmem:[%s8890_s6 + $0xe00] sm:$0xff]  ;;  %v4853_v25 = vld [vmem:[%s8890_s6 + $0xe08] sm:$0xff] }
 0x66c   :  { %3531 = vmatpush.msrb.mxu2 %v4851_v60  ;;  %3423 = vmatpush.msra.mxu3 %v4812_v0  ;;  %v4890_v59 = vld [vmem:[%s8890_s6 + $0xf00] sm:$0xff]  ;;  %v4888_v60 = vld [vmem:[%s8890_s6 + $0xef0] sm:$0xff]  ;;  %v4849_v0 = vld [vmem:[%s8890_s6 + $0xde8] sm:$0xff] }
 0x66d   :  { %3443 = vmatpush.msra.mxu1 %v4813_v56  ;;  %3463 = vmatpush.msrb.mxu0 %v4814_v61  ;;  %v4887_v56 = vld [vmem:[%s8890_s6 + $0xee8] sm:$0xff]  ;;  %v4885_v61 = vld [vmem:[%s8890_s6 + $0xed8] sm:$0xff] }
 0x66e   :  { %3532 = vmatpush.msrb.mxu2 %v4848_v6  ;;  %3424 = vmatpush.msra.mxu3 %v4809_v38  ;;  %v4846_v6 = vld [vmem:[%s8890_s6 + $0xdd0] sm:$0xff]  ;;  %v4847_v38 = vld [vmem:[%s8890_s6 + $0xdd8] sm:$0xff] }
 0x66f   :  { %3444 = vmatpush.msra.mxu1 %v4810_v8  ;;  %3464 = vmatpush.msrb.mxu0 %v4811_v41  ;;  %v4884_v8 = vld [vmem:[%s8890_s6 + $0xed0] sm:$0xff]  ;;  %v4882_v41 = vld [vmem:[%s8890_s6 + $0xec0] sm:$0xff] }
 0x670   :  { %3533 = vmatpush.msrb.mxu2 %v4845_v9  ;;  %3425 = vmatpush.msra.mxu3 %v4806_v45  ;;  %v4843_v9 = vld [vmem:[%s8890_s6 + $0xdb8] sm:$0xff]  ;;  %v4844_v45 = vld [vmem:[%s8890_s6 + $0xdc0] sm:$0xff] }
 0x671   :  { %3445 = vmatpush.msra.mxu1 %v4807_v46  ;;  %3465 = vmatpush.msrb.mxu0 %v4808_v10  ;;  %v4881_v46 = vld [vmem:[%s8890_s6 + $0xeb8] sm:$0xff]  ;;  %v4879_v10 = vld [vmem:[%s8890_s6 + $0xea8] sm:$0xff] }
 0x672   :  { %3534 = vmatpush.msrb.mxu2 %v4842_v51  ;;  %3426 = vmatpush.msra.mxu3 %v4803_v62  ;;  %v4840_v51 = vld [vmem:[%s8890_s6 + $0xda0] sm:$0xff]  ;;  %v4841_v62 = vld [vmem:[%s8890_s6 + $0xda8] sm:$0xff] }
 0x673   :  { %3446 = vmatpush.msra.mxu1 %v4804_v1  ;;  %3466 = vmatpush.msrb.mxu0 %v4805_v11  ;;  %v4878_v1 = vld [vmem:[%s8890_s6 + $0xea0] sm:$0xff]  ;;  %v4876_v11 = vld [vmem:[%s8890_s6 + $0xe90] sm:$0xff] }
 0x674   :  { %3535 = vmatpush.msrb.mxu2 %v4839_v43  ;;  %3427 = vmatpush.msra.mxu3 %v4800_v2  ;;  %v4837_v43 = vld [vmem:[%s8890_s6 + $0xd88] sm:$0xff]  ;;  %v4838_v2 = vld [vmem:[%s8890_s6 + $0xd90] sm:$0xff] }
 0x675   :  { %3447 = vmatpush.msra.mxu1 %v4801_v20  ;;  %3467 = vmatpush.msrb.mxu0 %v4802_v22  ;;  %v4875_v20 = vld [vmem:[%s8890_s6 + $0xe88] sm:$0xff]  ;;  %v4873_v22 = vld [vmem:[%s8890_s6 + $0xe78] sm:$0xff] }
 0x676   :  { %3536 = vmatpush.msrb.mxu2 %v4836_v19  ;;  %3428 = vmatpush.msra.mxu3 %v4797_v21  ;;  %v4834_v19 = vld [vmem:[%s8890_s6 + $0xd70] sm:$0xff]  ;;  %v4835_v21 = vld [vmem:[%s8890_s6 + $0xd78] sm:$0xff] }
 0x677   :  { %3448 = vmatpush.msra.mxu1 %v4798_v13  ;;  %3468 = vmatpush.msrb.mxu0 %v4799_v34  ;;  %v8698_v13 = vrot.slane %v8071_v14, 6  ;;  %v4872_v34 = vld [vmem:[%s8890_s6 + $0xe70] sm:$0xff]  ;;  %v4901_v14 = vld [vmem:[%s8890_s6 + $0xf58] sm:$0xff] }
 0x678   :  { %3537 = vmatpush.msrb.mxu2 %v4833_v35  ;;  %3429 = vmatpush.msra.mxu3 %v4794_v36  ;;  %v4904_v35 = vld [vmem:[%s8890_s6 + $0xf70] sm:$0x3]  ;;  %v4932_v36 = vld [vmem:[%s8892_s8 + $0x78] sm:$0xff] }
 0x679   :  { %4867 = vmatmul.msk.f32.vlgmr.msrb.gmra.mxu2 %vm141_vm2, %v8553_v39  ;;  %3449 = vmatpush.msra.mxu1 %v4795_v37  ;;  %v4898_v37 = vld [vmem:[%s8890_s6 + $0xf40] sm:$0xff] }
 0x67a   :  { %4907 = vmatpush.msk.msra.mxu2 %vm104_vm0, %v4903_v16  ;;  %3469 = vmatpush.msrb.mxu0 %v4796_v15  ;;  %v4934_v16 = vld [vmem:[%s8892_s8 + $0x128] sm:$0xf]  ;;  %v4935_v15 = vld [vmem:[%s8892_s8 + $0x70] sm:$0xff] }
 0x67b   :  { %4828 = vmatmul.msk.f32.vlgmr.msra.gmra.mxu3 %vm141_vm2, %v3402_v26  ;;  %4830 = vmatmul.msk.f32.vlgmr.msra.gmra.mxu1 %vm141_vm2, %v3402_v26 }
 0x67c   :  { %4832 = vmatmul.msk.f32.vlgmr.msrb.gmra.mxu0 %vm141_vm2, %v3402_v26  ;;  %4868 = vmatpush.msk.msrb.mxu3 %vm104_vm0, %v4864_v42  ;;  %v4895_v26 = vld [vmem:[%s8890_s6 + $0xf28] sm:$0xff]  ;;  %v4936_v42 = vld [vmem:[%s8892_s8 + $0xf0] sm:$0xff] }
 0x67d   :  { %4870 = vmatpush.msk.msrb.mxu1 %vm104_vm0, %v4865_v44  ;;  %4905 = vmatpush.msk.msra.mxu0 %vm104_vm0, %v4902_v31  ;;  %v4937_v44 = vld [vmem:[%s8892_s8 + $0x120] sm:$0xff]  ;;  %v4938_v31 = vld [vmem:[%s8892_s8 + $0x68] sm:$0xff] }
 0x67e   :  { %3656 = vmatpush.msra.mxu2 %v4900_v48  ;;  %3548 = vmatpush.msrb.mxu3 %v4861_v17  ;;  %v4892_v48 = vld [vmem:[%s8890_s6 + $0xf10] sm:$0xff]  ;;  %v4939_v17 = vld [vmem:[%s8892_s8 + $0xe8] sm:$0xff] }
 0x67f   :  { %3568 = vmatpush.msrb.mxu1 %v4862_v53  ;;  %3636 = vmatpush.msra.mxu0 %v4899_v63  ;;  %v4940_v53 = vld [vmem:[%s8892_s8 + $0x118] sm:$0xff]  ;;  %v4941_v63 = vld [vmem:[%s8892_s8 + $0x60] sm:$0xff] }
 0x680   :  { %3657 = vmatpush.msra.mxu2 %v4897_v29  ;;  %3549 = vmatpush.msrb.mxu3 %v4858_v24  ;;  %v4889_v29 = vld [vmem:[%s8890_s6 + $0xef8] sm:$0xff]  ;;  %v4942_v24 = vld [vmem:[%s8892_s8 + $0xe0] sm:$0xff] }
 0x681   :  { %3569 = vmatpush.msrb.mxu1 %v4859_v33  ;;  %3637 = vmatpush.msra.mxu0 %v4896_v27  ;;  %v4943_v33 = vld [vmem:[%s8892_s8 + $0x110] sm:$0xff]  ;;  %v4944_v27 = vld [vmem:[%s8892_s8 + $0x58] sm:$0xff] }
 0x682   :  { %3658 = vmatpush.msra.mxu2 %v4894_v5  ;;  %3550 = vmatpush.msrb.mxu3 %v4855_v30  ;;  %v4886_v5 = vld [vmem:[%s8890_s6 + $0xee0] sm:$0xff]  ;;  %v4945_v30 = vld [vmem:[%s8892_s8 + $0xd8] sm:$0xff] }
 0x683   :  { %3570 = vmatpush.msrb.mxu1 %v4856_v18  ;;  %3638 = vmatpush.msra.mxu0 %v4893_v55  ;;  %v4946_v18 = vld [vmem:[%s8892_s8 + $0x108] sm:$0xff]  ;;  %v4947_v55 = vld [vmem:[%s8892_s8 + $0x50] sm:$0xff] }
 0x684   :  { %3659 = vmatpush.msra.mxu2 %v4891_v54  ;;  %3551 = vmatpush.msrb.mxu3 %v4852_v58  ;;  %v4883_v54 = vld [vmem:[%s8890_s6 + $0xec8] sm:$0xff]  ;;  %v4948_v58 = vld [vmem:[%s8892_s8 + $0xd0] sm:$0xff] }
 0x685   :  { %3571 = vmatpush.msrb.mxu1 %v4853_v25  ;;  %3639 = vmatpush.msra.mxu0 %v4890_v59  ;;  %v4949_v25 = vld [vmem:[%s8892_s8 + $0x100] sm:$0xff]  ;;  %v4950_v59 = vld [vmem:[%s8892_s8 + $0x48] sm:$0xff] }
 0x686   :  { %3660 = vmatpush.msra.mxu2 %v4888_v60  ;;  %3552 = vmatpush.msrb.mxu3 %v4849_v0  ;;  %v4880_v60 = vld [vmem:[%s8890_s6 + $0xeb0] sm:$0xff]  ;;  %v4951_v0 = vld [vmem:[%s8892_s8 + $0xc8] sm:$0xff] }
 0x687   :  { %3572 = vmatpush.msrb.mxu1 %v4850_v3  ;;  %3640 = vmatpush.msra.mxu0 %v4887_v56  ;;  %v4952_v3 = vld [vmem:[%s8892_s8 + $0x40] sm:$0xff]  ;;  %v4877_v56 = vld [vmem:[%s8890_s6 + $0xe98] sm:$0xff] }
 0x688   :  { %3661 = vmatpush.msra.mxu2 %v4885_v61  ;;  %3553 = vmatpush.msrb.mxu3 %v4846_v6  ;;  %v4953_v61 = vld [vmem:[%s8892_s8 + $0xc0] sm:$0xff]  ;;  %v4954_v6 = vld [vmem:[%s8892_s8 + $0x38] sm:$0xff] }
 0x689   :  { %3573 = vmatpush.msrb.mxu1 %v4847_v38  ;;  %3641 = vmatpush.msra.mxu0 %v4884_v8  ;;  %v4874_v38 = vld [vmem:[%s8890_s6 + $0xe80] sm:$0xff]  ;;  %v4955_v8 = vld [vmem:[%s8892_s8 + $0xb8] sm:$0xff] }
 0x68a   :  { %3662 = vmatpush.msra.mxu2 %v4882_v41  ;;  %3554 = vmatpush.msrb.mxu3 %v4843_v9  ;;  %v4956_v41 = vld [vmem:[%s8892_s8 + $0x30] sm:$0xff] }
 0x68b   :  { %3574 = vmatpush.msrb.mxu1 %v4844_v45  ;;  %3642 = vmatpush.msra.mxu0 %v4881_v46  ;;  %v4957_v9 = vld [vmem:[%s8892_s8 + $0xb0] sm:$0xff]  ;;  %v4958_v45 = vld [vmem:[%s8892_s8 + $0x28] sm:$0xff] }
 0x68c   :  { %3663 = vmatpush.msra.mxu2 %v4879_v10  ;;  %3555 = vmatpush.msrb.mxu3 %v4840_v51  ;;  %v4959_v46 = vld [vmem:[%s8892_s8 + $0xa8] sm:$0xff]  ;;  %v4960_v10 = vld [vmem:[%s8892_s8 + $0x20] sm:$0xff] }
 0x68d   :  { %3575 = vmatpush.msrb.mxu1 %v4841_v62  ;;  %3643 = vmatpush.msra.mxu0 %v4878_v1  ;;  %v4961_v51 = vld [vmem:[%s8892_s8 + $0xa0] sm:$0xff]  ;;  %v4962_v62 = vld [vmem:[%s8892_s8 + $0x18] sm:$0xff] }
 0x68e   :  { %3664 = vmatpush.msra.mxu2 %v4876_v11  ;;  %3556 = vmatpush.msrb.mxu3 %v4837_v43  ;;  %v4963_v1 = vld [vmem:[%s8892_s8 + $0x98] sm:$0xff]  ;;  %v4964_v11 = vld [vmem:[%s8892_s8 + $0x10] sm:$0xff] }
 0x68f   :  { %3576 = vmatpush.msrb.mxu1 %v4838_v2  ;;  %3644 = vmatpush.msra.mxu0 %v4875_v20  ;;  %v4965_v43 = vld [vmem:[%s8892_s8 + $0x90] sm:$0xff]  ;;  %v4966_v2 = vld [vmem:[%s8892_s8 + $0x8] sm:$0xff] }
 0x690   :  { %3665 = vmatpush.msra.mxu2 %v4873_v22  ;;  %3557 = vmatpush.msrb.mxu3 %v4834_v19  ;;  %v4967_v20 = vld [vmem:[%s8892_s8 + $0x88] sm:$0xff]  ;;  %v4968_v22 = vld [vmem:[%s8892_s8] sm:$0xff] }
 0x691   :  { %4908 = vmatmul.msk.f32.vlgmr.msra.gmra.mxu2 %vm141_vm2, %v8698_v13  ;;  %3577 = vmatpush.msrb.mxu1 %v4835_v21  ;;  %v4969_v19 = vld [vmem:[%s8892_s8 + $0x80] sm:$0xff]  ;;  %v2459_v21 = vpop.f32.mrf.mxu1 }
 0x692   :  { %3645 = vmatpush.msra.mxu0 %v4872_v34  ;;  %4869 = vmatmul.msk.f32.vlgmr.msrb.gmra.mxu3 %vm141_vm2, %v8553_v39 }
 0x693   :  { %4871 = vmatmul.msk.f32.vlgmr.msrb.gmra.mxu1 %vm141_vm2, %v8553_v39  ;;  %4906 = vmatmul.msk.f32.vlgmr.msra.gmra.mxu0 %vm141_vm2, %v8698_v13  ;;  %v4933_v39 = vld [vmem:[%s8892_s8 + $0xf8] sm:$0xff] }
 0x694   :  { %4909 = vmatpush.msk.msra.mxu3 %vm104_vm0, %v4904_v35  ;;  %3702 = vmatpush.msra.mxu1 %v4932_v36  ;;  %v2675_v35 = vpop.f32.mrf.mxu2 }
 0x695   :  { %3722 = vmatpush.msrb.mxu0 %v4933_v39  ;;  %4911 = vmatpush.msk.msrb.mxu2 %vm1896_vm5, %v4934_v16 }
 0x696   :  { %3676 = vmatpush.msra.mxu3 %v4901_v14  ;;  %3703 = vmatpush.msra.mxu1 %v4935_v15  ;;  %v2783_v14 = vpop.f32.mrf.mxu0 }
 0x697   :  { %3723 = vmatpush.msrb.mxu0 %v4936_v42  ;;  %3753 = vmatpush.msrb.mxu2 %v4937_v44  ;;  %v2247_v44 = vadd.f32 %v8247_v50, %v8236_v47 }
 0x698   :  { %3677 = vmatpush.msra.mxu3 %v4898_v37  ;;  %3704 = vmatpush.msra.mxu1 %v4938_v31 }
 0x699   :  { %3724 = vmatpush.msrb.mxu0 %v4939_v17  ;;  %3754 = vmatpush.msrb.mxu2 %v4940_v53  ;;  %v2587_v34 = vpop.f32.mrf.mxu1  ;;  %v2394_v17 = vadd.f32 %v8368_v4, %v2247_v44 }
 0x69a   :  { %3678 = vmatpush.msra.mxu3 %v4895_v26  ;;  %3705 = vmatpush.msra.mxu1 %v4941_v63 }
 0x69b   :  { %3725 = vmatpush.msrb.mxu0 %v4942_v24  ;;  %3755 = vmatpush.msrb.mxu2 %v4943_v33  ;;  %v2502_v53 = vadd.f32 %v2459_v21, %v2394_v17  ;;  %v2267_v33 = vadd.f32 %v8303_v32, %v8148_v7 }
 0x69c   :  { %3679 = vmatpush.msra.mxu3 %v4892_v48  ;;  %3706 = vmatpush.msra.mxu1 %v4944_v27  ;;  %v2803_v39 = vpop.f32.mrf.mxu2 }
 0x69d   :  { %3726 = vmatpush.msrb.mxu0 %v4945_v30  ;;  %3756 = vmatpush.msrb.mxu2 %v4946_v18  ;;  %v2395_v18 = vadd.f32 %v8317_v23, %v2267_v33 }
 0x69e   :  { %3680 = vmatpush.msra.mxu3 %v4889_v29  ;;  %3707 = vmatpush.msra.mxu1 %v4947_v55  ;;  %v2911_v16 = vpop.f32.mrf.mxu0 }
 0x69f   :  { %3727 = vmatpush.msrb.mxu0 %v4948_v58  ;;  %3757 = vmatpush.msrb.mxu2 %v4949_v25 }
 0x6a0   :  { %3681 = vmatpush.msra.mxu3 %v4886_v5  ;;  %3708 = vmatpush.msra.mxu1 %v4950_v59 }
 0x6a1   :  { %3728 = vmatpush.msrb.mxu0 %v4951_v0  ;;  %v2715_v37 = vpop.f32.mrf.mxu1 }
 0x6a2   :  { %3682 = vmatpush.msra.mxu3 %v4883_v54  ;;  %3709 = vmatpush.msra.mxu1 %v4952_v3  ;;  %v2503_v54 = vadd.f32 %v8413_v49, %v2395_v18  ;;  %v2720_v21 = vadd.f32 %v2715_v37, %v8481_v28 }
 0x6a3   :  { %3729 = vmatpush.msrb.mxu0 %v4953_v61 }
 0x6a4   :  { %3683 = vmatpush.msra.mxu3 %v4880_v60  ;;  %3710 = vmatpush.msra.mxu1 %v4954_v6  ;;  %v2931_v42 = vpop.f32.mrf.mxu2  ;;  %v2611_v25 = vadd.f32 %v2587_v34, %v2503_v54 }
 0x6a5   :  { %3730 = vmatpush.msrb.mxu0 %v4955_v8 }
 0x6a6   :  { %3684 = vmatpush.msra.mxu3 %v4877_v56  ;;  %3711 = vmatpush.msra.mxu1 %v4956_v41 }
 0x6a7   :  { %3731 = vmatpush.msrb.mxu0 %v4957_v9 }
 0x6a8   :  { %3685 = vmatpush.msra.mxu3 %v4874_v38  ;;  %3712 = vmatpush.msra.mxu1 %v4958_v45 }
 0x6a9   :  { %4910 = vmatmul.msk.f32.vlgmr.msra.gmra.mxu3 %vm141_vm2, %v8698_v13  ;;  %3732 = vmatpush.msrb.mxu0 %v4959_v46  ;;  %v2567_v13 = vpop.f32.mrf.mxu3  ;;  %v2891_v26 = vpop.f32.mrf.mxu1 }
 0x6aa   :  { %3713 = vmatpush.msra.mxu1 %v4960_v10  ;;  %v2610_v24 = vadd.f32 %v2567_v13, %v2502_v53 }
 0x6ab   :  { %3733 = vmatpush.msrb.mxu0 %v4961_v51 }
 0x6ac   :  { %3714 = vmatpush.msra.mxu1 %v4962_v62  ;;  %v2718_v30 = vadd.f32 %v2675_v35, %v2610_v24 }
 0x6ad   :  { %3734 = vmatpush.msrb.mxu0 %v4963_v1 }
 0x6ae   :  { %3715 = vmatpush.msra.mxu1 %v4964_v11  ;;  %v2826_v55 = vadd.f32 %v2783_v14, %v2718_v30 }
 0x6af   :  { %3735 = vmatpush.msrb.mxu0 %v4965_v43 }
 0x6b0   :  { %3716 = vmatpush.msra.mxu1 %v4966_v2  ;;  %v2934_v58 = vadd.f32 %v2891_v26, %v2826_v55 }
 0x6b1   :  { %3736 = vmatpush.msrb.mxu0 %v4967_v20  ;;  %v2695_v36 = vpop.f32.mrf.mxu3  ;;  %v3039_v31 = vpop.f32.mrf.mxu0 }
 0x6b2   :  { %3717 = vmatpush.msra.mxu1 %v4968_v22  ;;  %v3019_v63 = vpop.f32.mrf.mxu1  ;;  %v2719_v0 = vadd.f32 %v2695_v36, %v2611_v25 }
 0x6b3   :  { %3737 = vmatpush.msrb.mxu0 %v4969_v19 }
 0x6b4   :  { %v3107_v29 = vpop.f32.mrf.mxu2  ;;  %v2827_v56 = vadd.f32 %v2803_v39, %v2719_v0 }
 0x6b6   :  { %v2935_v6 = vadd.f32 %v2911_v16, %v2827_v56 }
 0x6b8   :  { %v3043_v41 = vadd.f32 %v3019_v63, %v2935_v6 }
 0x6b9   :  { %v2823_v15 = vpop.f32.mrf.mxu3 }
 0x6ba   :  { %v2828_v35 = vadd.f32 %v2823_v15, %v2720_v21 }
 0x6bc   :  { %v2936_v39 = vadd.f32 %v2931_v42, %v2828_v35  ;;  %v4970_v42 = vld [vmem:[%s8893_s9] sm:$0x1] }
 0x6be   :  { %v3044_v16 = vadd.f32 %v3039_v31, %v2936_v39 }
 0x6c1   :  { %v2999_v48 = vpop.f32.mrf.mxu3 }
 0x6c2   :  { %v3042_v60 = vadd.f32 %v2999_v48, %v2934_v58 }
 0x6c4   :  { %v3150_v3 = vadd.f32 %v3107_v29, %v3042_v60 }
 0x6c8   :  { %v3147_v47 = vpop.f32.mrf.mxu1 }
 0x6c9   :  { %v3215_v27 = vpop.f32.mrf.mxu0  ;;  %v3152_v26 = vadd.f32 %v3147_v47, %v3044_v16 }
 0x6ca   :  { %v3258_v32 = vadd.f32 %v3215_v27, %v3150_v3 }
 0x6cc   :  { %v3235_v50 = vpop.f32.mrf.mxu2 }
 0x6ce   :  { %v3127_v5 = vpop.f32.mrf.mxu3 }
 0x6cf   :  { %v3151_v49 = vadd.f32 %v3127_v5, %v3043_v41 }
 0x6d1   :  { %v3259_v10 = vadd.f32 %v3235_v50, %v3151_v49 }
 0x6e0   :  { %v3323_v61 = vpop.f32.mrf.mxu1 }
 0x6e1   :  { %v3343_v4 = vpop.f32.mrf.mxu0  ;;  %v3366_v23 = vadd.f32 %v3323_v61, %v3258_v32 }
 0x6e2   :  { %v3367_v11 = vadd.f32 %v3343_v4, %v3259_v10 }
 0x6e4   :  { %v3363_v7 = vpop.f32.mrf.mxu2 }
 0x6e6   :  { %v3255_v59 = vpop.f32.mrf.mxu3 }
 0x6e7   :  { %v3260_v44 = vadd.f32 %v3255_v59, %v3152_v26 }
 0x6f8   :  { %v3451_v62 = vpop.f32.mrf.mxu1 }
 0x6f9   :  { %v3471_v38 = vpop.f32.mrf.mxu0  ;;  %v3475_v2 = vadd.f32 %v3451_v62, %v3367_v11 }
 0x6fc   :  { %v3539_v45 = vpop.f32.mrf.mxu2 }
 0x6fe   :  { %v3431_v8 = vpop.f32.mrf.mxu3 }
 0x6ff   :  { %v3474_v9 = vadd.f32 %v3431_v8, %v3366_v23 }
 0x701   :  { %v3582_v46 = vadd.f32 %v3539_v45, %v3474_v9 }
 0x710   :  { %v3647_v51 = vpop.f32.mrf.mxu0  ;;  %v3579_v48 = vpop.f32.mrf.mxu1 }
 0x711   :  { %v3690_v1 = vadd.f32 %v3647_v51, %v3582_v46 }
 0x713   :  { %v3693_v43 = vadd.f32 %v3690_v1, %v1880_v40  ;;  %v3368_v40 = vadd.f32 %v3363_v7, %v3260_v44 }
 0x714   :  { %v3667_v13 = vpop.f32.mrf.mxu2 }
 0x715   :  { %v3696_v20 = vmax.f32 %v3693_v43, 0.0  ;;  %v3559_v22 = vpop.f32.mrf.mxu3  ;;  %v3476_v17 = vadd.f32 %v3471_v38, %v3368_v40 }
 0x716   :  { %v3583_v19 = vadd.f32 %v3559_v22, %v3475_v2 }
 0x717   :  { %3718 = vmatmul.f32.vlgmr.msra.gmra.mxu1 %v3696_v20  ;;  %v3584_v53 = vadd.f32 %v3579_v48, %v3476_v17 }
 0x718   :  { %v3691_v34 = vadd.f32 %v3667_v13, %v3583_v19 }
 0x71a   :  { %v3694_v14 = vadd.f32 %v3691_v34, %v1881_v52 }
 0x71c   :  { %v3697_v36 = vmax.f32 %v3694_v14, 0.0 }
 0x71e   :  { %3738 = vmatmul.f32.vlgmr.msrb.gmra.mxu0 %v3697_v36 }
 0x72c   :  { %v3687_v63 = vpop.f32.mrf.mxu3 }
 0x72d   :  { %v3692_v29 = vadd.f32 %v3687_v63, %v3584_v53 }
 0x72f   :  { %v3695_v28 = vadd.f32 %v3692_v29, %v1882_v57 }
 0x731   :  { %v3698_v37 = vmax.f32 %v3695_v28, 0.0 }
 0x733   :  { %4912 = vmatmul.msk.f32.vlgmr.msrb.gmra.mxu2 %vm1892_vm6, %v3698_v37 }
 0x794   :  { %v3719_v15 = vpop.f32.mrf.mxu1 }
 0x795   :  { %v3720_v31 = vadd.f32 %v4970_v42, %v3719_v15 }
 0x79b   :  { %v3739_v52 = vpop.f32.mrf.mxu0 }
 0x79c   :  { %v3740_v24 = vadd.f32 %v3739_v52, %v3720_v31 }
 0x7b6   :  { %v3759_v33 = vpop.f32.mrf.mxu2 }
 0x7b7   :  { %v3760_v12 = vadd.f32 %v3759_v33, %v3740_v24 }
 0x7b9   :  { %3762 = vst.msk [vmem:[#allocation2 + $0x1] sm:$0x1] %vm1960_vm7, %v3760_v12 }
 0x7ba   :  { %3773 = dma.vmem_to_hbm [thread:$0]  %s3769_s24, 32, %s3771_s0, [#allocation3]  }
 0x7bb   :  { %4995 = dma.done.wait [#allocation3], 32  }
 0x7bc   :  { %4996 = vsyncadd [#allocation3], 4294967264 }
 0x7bd   :  { %3778 = vsyncpa [#allocation3], 1 }

</bundles_post_ra>
